<compile_context>
chip_gen: v7x
topology: tpu7x:2x2x1
jax: 0.10.0
libtpu: 0.0.40
codegen_flags: <defaults>
</compile_context>

<pallas_src>
import math
import functools

import jax
import jax.numpy as jnp
from jax import lax
from jax.experimental import pallas as pl
from jax.experimental.pallas import tpu as pltpu

LN_EPS = 1e-5


# --------------------------------------------------------------------------- #
# Fused Pallas kernel (one grid step == one batch element, all heads)
# --------------------------------------------------------------------------- #
def _rel_mhsa_kernel(x_ref, p_ref, gamma_ref, beta_ref,
                     wqv_ref, bqv_ref, wkT_ref, bk_ref,
                     uk_ref, ukb_ref, vcorr_ref, wo_ref, bo_ref,
                     out_ref, *rest, seq_len, d_model, num_heads, return_attn):
    if return_attn:
        attn_ref, ctx_ref = rest
    else:
        (ctx_ref,) = rest
    T, D, H = seq_len, d_model, num_heads
    dh = D // H

    # ---- pre-norm LayerNorm (f32 statistics), computed ONCE per batch element ----
    x = x_ref[0]                                                   # (T, D) f32
    mu = jnp.mean(x, axis=-1, keepdims=True)
    var = jnp.mean(jnp.square(x - mu), axis=-1, keepdims=True)
    xn = (x - mu) * lax.rsqrt(var + LN_EPS) * gamma_ref[...] + beta_ref[...]
    xn_b = xn.astype(jnp.bfloat16)
    xnT_b = jnp.transpose(xn).astype(jnp.bfloat16)                 # (D, T), one transpose

    # ---- fused q/v projection (scale 1/sqrt(D) already folded into Wq, bq) ----
    qv = jnp.dot(xn_b, wqv_ref[...],
                 preferred_element_type=jnp.float32) + bqv_ref[...]   # (T, 2D)
    q_b = qv[:, :D].astype(jnp.bfloat16)                              # scaled q
    v_b = qv[:, D:].astype(jnp.bfloat16)

    # ---- k^T for all heads + positional projection, fused into one (D, 2T) slab ----
    kT = jnp.dot(wkT_ref[...], xnT_b,
                 preferred_element_type=jnp.float32) + bk_ref[...]    # (D, T)
    kp_b = jnp.concatenate([kT.astype(jnp.bfloat16), p_ref[...]], axis=1)   # (D, 2T) bf16

    # ---- rank-1 score corrections: u needs xn (tiny matmul), vb is precomputed ----
    u_corr = jnp.dot(uk_ref[...], xnT_b,
                     preferred_element_type=jnp.float32) + ukb_ref[...]     # (8, T)
    v_corr = vcorr_ref[...]                                                 # (8, T)

    row = lax.broadcasted_iota(jnp.int32, (T, T), 0)
    col = lax.broadcasted_iota(jnp.int32, (T, T), 1)

    for h in range(H):                     # static unroll; H is small
        # content & positional scores in a single (T, dh) @ (dh, 2T) MXU pass
        s = jnp.dot(q_b[:, h * dh:(h + 1) * dh], kp_b[h * dh:(h + 1) * dh, :],
                    preferred_element_type=jnp.float32)            # (T, 2T)
        content = s[:, :T] + u_corr[h:h + 1, :]                    # + u . k^T
        pos_raw = s[:, T:] + v_corr[h:h + 1, :]                    # + vb . p

        # ---- Transformer-XL relative shift, entirely in VMEM (XLU rolls) ----
        #   shifted[i, j] = pos_raw[i, T-1-i+j]   for j <= i
        #                 = 0                     for j == i+1
        #                 = pos_raw[i+1, j-i-2]   for j >  i+1
        skew = pltpu.roll(pos_raw, shift=1, axis=1, stride=1, stride_axis=0)
        skew_up = pltpu.roll(skew, shift=T - 1, axis=0)            # row i <- row i+1
        pos = jnp.where(col <= row, skew,
                        jnp.where(col == row + 1, 0.0, skew_up))

        # ---- softmax over keys (scale already folded in); EUP reciprocal ----
        score = content + pos
        m = jnp.max(score, axis=-1, keepdims=True)
        e = jnp.exp(score - m)
        attn = e * pl.reciprocal(jnp.sum(e, axis=-1, keepdims=True), approx=True)
        if return_attn:
            attn_ref[0, h] = attn.astype(attn_ref.dtype)           # dropout = identity (eval)

        # ---- per-head context written into its lane slice of the (T, D) ctx slab ----
        ctx_h = jnp.dot(attn.astype(jnp.bfloat16), v_b[:, h * dh:(h + 1) * dh],
                        preferred_element_type=jnp.float32)        # (T, dh)
        ctx_ref[:, h * dh:(h + 1) * dh] = ctx_h.astype(jnp.bfloat16)

    # ---- single fused output projection + bias + residual ----
    out = jnp.dot(ctx_ref[...], wo_ref[...], preferred_element_type=jnp.float32)
    out_ref[0] = out + bo_ref[...] + x


# --------------------------------------------------------------------------- #
# Wrapper
# --------------------------------------------------------------------------- #
def sinusoidal_pe(length, d_model):
    pos = jnp.arange(length, dtype=jnp.float32)[:, None]
    div = jnp.exp(jnp.arange(0, d_model, 2, dtype=jnp.float32)
                  * (-math.log(10000.0) / d_model))
    pe = jnp.zeros((length, d_model), jnp.float32)
    pe = pe.at[:, 0::2].set(jnp.sin(pos * div))
    pe = pe.at[:, 1::2].set(jnp.cos(pos * div))
    return pe


def _pad_rows8(a):
    r = (-a.shape[0]) % 8
    if r:
        a = jnp.pad(a, ((0, r),) + ((0, 0),) * (a.ndim - 1))
    return a


def _const_spec(arr):
    nd = arr.ndim
    return pl.BlockSpec(arr.shape, lambda b, _n=nd: (0,) * _n)


def relative_mhsa(inputs, params, num_heads, mask=None, *,
                  return_attn=True, attn_dtype=jnp.bfloat16):
    """Fused forward pass of RelativeMultiHeadedSelfAttention (eval mode)."""
    assert mask is None  # TODO(synk): mask path (masked_fill -1e9) not implemented.
    B, T, D = inputs.shape
    H = num_heads
    dh = D // H
    scale = 1.0 / math.sqrt(D)
    bf16 = jnp.bfloat16

    # Positional projection (batch independent), transposed so rows h*dh:(h+1)*dh
    # are head h's (dh, T) positional rhs.
    pe = sinusoidal_pe(T, D)
    p_all = (pe @ params['wp']).T                                        # (D, T)

    # Fold 1/sqrt(d_model) into q-side terms (zero in-kernel scaling cost).
    u_s = params['u'] * scale                                            # (H, dh)
    vb_s = params['vb'] * scale

    # Fused / transposed weight layouts, pre-cast to bf16.
    wqv = jnp.concatenate([params['wq'] * scale, params['wv']], axis=1)  # (D, 2D)
    bqv = jnp.concatenate([params['bq'] * scale, params['bv']], axis=1)  # (1, 2D)
    wkT = params['wk'].T                                                 # (D, D)
    bk_col = params['bk'].reshape(D, 1)

    # Rank-1 correction terms:
    #   u . k_h^T = (u_h @ Wk_h^T) @ xn^T + u_h . bk_h   -> uk (H, D), ukb (H, 1)
    #   vb . p_h  fully precomputable                     -> v_corr (H, T)
    wk_r = params['wk'].reshape(D, H, dh)
    uk = jnp.einsum('hd,khd->hk', u_s, wk_r)                             # (H, D)
    ukb = jnp.einsum('hd,hd->h', u_s, params['bk'].reshape(H, dh)).reshape(H, 1)
    v_corr = jnp.einsum('hd,hdt->ht', vb_s, p_all.reshape(H, dh, T))     # (H, T)

    const_args = [
        p_all.astype(bf16), params['gamma'], params['beta'],
        wqv.astype(bf16), bqv, wkT.astype(bf16), bk_col,
        _pad_rows8(uk).astype(bf16), _pad_rows8(ukb), _pad_rows8(v_corr),
        params['wo'].astype(bf16), params['bo'],
    ]

    kernel = functools.partial(_rel_mhsa_kernel, seq_len=T, d_model=D,
                               num_heads=H, return_attn=return_attn)

    in_specs = [pl.BlockSpec((1, T, D), lambda b: (b, 0, 0))]            # inputs / residual
    in_specs += [_const_spec(a) for a in const_args]

    out_specs = [pl.BlockSpec((1, T, D), lambda b: (b, 0, 0))]
    out_shape = [jax.ShapeDtypeStruct((B, T, D), jnp.float32)]
    if return_attn:
        out_specs.append(pl.BlockSpec((1, H, T, T), lambda b: (b, 0, 0, 0)))
        out_shape.append(jax.ShapeDtypeStruct((B, H, T, T), attn_dtype))

    results = pl.pallas_call(
        kernel,
        grid=(B,),
        in_specs=in_specs,
        out_specs=out_specs,
        out_shape=out_shape,
        scratch_shapes=[pltpu.VMEM((T, D), jnp.bfloat16)],               # ctx slab
        compiler_params=pltpu.CompilerParams(
            dimension_semantics=("parallel",)),
    )(inputs, *const_args)

    if return_attn:
        out, attn = results
        return out, attn
    return results[0]


# --------------------------------------------------------------------------- #
# Pure-JAX reference (mirrors the PyTorch forward, eval mode) for verification
# --------------------------------------------------------------------------- #
def _relative_shift(pos_score):
    b, h, t1, t2 = pos_score.shape
    zeros = jnp.zeros((b, h, t1, 1), pos_score.dtype)
    padded = jnp.concatenate([zeros, pos_score], axis=-1)
    padded = padded.reshape(b, h, t2 + 1, t1)
    return padded[:, :, 1:].reshape(b, h, t1, t2)


def reference_forward(inputs, P, num_heads):
    B, T, D = inputs.shape
    dh = D // num_heads
    pe = jnp.broadcast_to(sinusoidal_pe(T, D), (B, T, D))
    x = inputs
    mu = x.mean(-1, keepdims=True)
    var = ((x - mu) ** 2).mean(-1, keepdims=True)
    xn = (x - mu) / jnp.sqrt(var + LN_EPS) * P['gamma'][0] + P['beta'][0]
    q = xn @ P['wq'] + P['bq'][0]
    k = xn @ P['wk'] + P['bk'][0]
    v = xn @ P['wv'] + P['bv'][0]
    p = pe @ P['wp']
    q = q.reshape(B, T, num_heads, dh)
    k = k.reshape(B, T, num_heads, dh).transpose(0, 2, 1, 3)
    v = v.reshape(B, T, num_heads, dh).transpose(0, 2, 1, 3)
    p = p.reshape(B, T, num_heads, dh)
    content = jnp.einsum('bthd,bhsd->bhts', q + P['u'], k)
    pos = jnp.einsum('bthd,bshd->bhts', q + P['vb'], p)
    pos = _relative_shift(pos)
    score = (content + pos) / math.sqrt(D)
    attn = jax.nn.softmax(score, axis=-1)
    ctx = jnp.einsum('bhts,bhsd->bhtd', attn, v).transpose(0, 2, 1, 3).reshape(B, T, D)
    out = ctx @ P['wo'] + P['bo'][0]
    return out + inputs, attn


# --------------------------------------------------------------------------- #
# Main
# --------------------------------------------------------------------------- #
def _xavier(k, shape):
    fan_in, fan_out = shape[-2], shape[-1]
    lim = math.sqrt(6.0 / (fan_in + fan_out))
    return jax.random.uniform(k, shape, jnp.float32, minval=-lim, maxval=lim)


if __name__ == "__main__":
    B, T, D, H = 2, 128, 128, 4       # batch, seq, d_model, heads (d_k = d_v = D/H)
    dh = D // H
    key = jax.random.PRNGKey(0)
    ks = jax.random.split(key, 12)

    params = {
        'gamma': jnp.ones((1, D), jnp.float32),
        'beta': jnp.zeros((1, D), jnp.float32),
        'wq': _xavier(ks[0], (D, H * dh)),
        'bq': 0.02 * jax.random.normal(ks[1], (1, H * dh), jnp.float32),
        'wk': _xavier(ks[2], (D, H * dh)),
        'bk': 0.02 * jax.random.normal(ks[3], (1, H * dh), jnp.float32),
        'wv': _xavier(ks[4], (D, H * dh)),
        'bv': 0.02 * jax.random.normal(ks[5], (1, H * dh), jnp.float32),
        'wp': _xavier(ks[6], (D, D)),
        'u': _xavier(ks[7], (H, dh)),
        'vb': _xavier(ks[8], (H, dh)),
        'wo': _xavier(ks[9], (D, D)),
        'bo': 0.02 * jax.random.normal(ks[10], (1, D), jnp.float32),
    }

    x = jax.random.normal(ks[11], (B, T, D), dtype=jnp.float32)

    out, attn = relative_mhsa(x, params, H, return_attn=True, attn_dtype=jnp.bfloat16)
    out, attn = jax.block_until_ready((out, attn))

    ref_out, ref_attn = reference_forward(x, params, H)
    assert out.shape == (B, T, D) and attn.shape == (B, H, T, T)
    attn_f32 = attn.astype(jnp.float32)
    assert jnp.allclose(out, ref_out, atol=3e-2, rtol=3e-2), \
        float(jnp.max(jnp.abs(out - ref_out)))
    assert jnp.allclose(attn_f32, ref_attn, atol=2e-2, rtol=2e-2), \
        float(jnp.max(jnp.abs(attn_f32 - ref_attn)))
    print("KERNEL_OK")
</pallas_src>

<mosaic_0001>
module attributes {stable_mosaic.version = 11 : i64} {
  func.func @_rel_mhsa_kernel(%arg0: i32, %arg1: memref<1x128x128xf32, #tpu.memory_space<vmem>>, %arg2: memref<128x128xbf16, #tpu.memory_space<vmem>>, %arg3: memref<1x128xf32, #tpu.memory_space<vmem>>, %arg4: memref<1x128xf32, #tpu.memory_space<vmem>>, %arg5: memref<128x256xbf16, #tpu.memory_space<vmem>>, %arg6: memref<1x256xf32, #tpu.memory_space<vmem>>, %arg7: memref<128x128xbf16, #tpu.memory_space<vmem>>, %arg8: memref<128x1xf32, #tpu.memory_space<vmem>>, %arg9: memref<8x128xbf16, #tpu.memory_space<vmem>>, %arg10: memref<8x1xf32, #tpu.memory_space<vmem>>, %arg11: memref<8x128xf32, #tpu.memory_space<vmem>>, %arg12: memref<128x128xbf16, #tpu.memory_space<vmem>>, %arg13: memref<1x128xf32, #tpu.memory_space<vmem>>, %arg14: memref<1x128x128xf32, #tpu.memory_space<vmem>>, %arg15: memref<1x4x128x128xbf16, #tpu.memory_space<vmem>>, %arg16: memref<128x128xbf16, #tpu.memory_space<vmem>>) attributes {dimension_semantics = [#tpu.dimension_semantics<parallel>], iteration_bounds = array<i64: 2>, scalar_prefetch = 0 : i64, scratch_operands = 1 : i64, tpu.core_type = #tpu.core_type<tc>, window_params = [{transform_indices = @transform_0, window_bounds = array<i64: 1, 128, 128>}, {pipeline_mode = #tpu.pipeline_mode<synchronous>, transform_indices = @transform_1, window_bounds = array<i64: 128, 128>}, {pipeline_mode = #tpu.pipeline_mode<synchronous>, transform_indices = @transform_2, window_bounds = array<i64: 1, 128>}, {pipeline_mode = #tpu.pipeline_mode<synchronous>, transform_indices = @transform_3, window_bounds = array<i64: 1, 128>}, {pipeline_mode = #tpu.pipeline_mode<synchronous>, transform_indices = @transform_4, window_bounds = array<i64: 128, 256>}, {pipeline_mode = #tpu.pipeline_mode<synchronous>, transform_indices = @transform_5, window_bounds = array<i64: 1, 256>}, {pipeline_mode = #tpu.pipeline_mode<synchronous>, transform_indices = @transform_6, window_bounds = array<i64: 128, 128>}, {pipeline_mode = #tpu.pipeline_mode<synchronous>, transform_indices = @transform_7, window_bounds = array<i64: 128, 1>}, {pipeline_mode = #tpu.pipeline_mode<synchronous>, transform_indices = @transform_8, window_bounds = array<i64: 8, 128>}, {pipeline_mode = #tpu.pipeline_mode<synchronous>, transform_indices = @transform_9, window_bounds = array<i64: 8, 1>}, {pipeline_mode = #tpu.pipeline_mode<synchronous>, transform_indices = @transform_10, window_bounds = array<i64: 8, 128>}, {pipeline_mode = #tpu.pipeline_mode<synchronous>, transform_indices = @transform_11, window_bounds = array<i64: 128, 128>}, {pipeline_mode = #tpu.pipeline_mode<synchronous>, transform_indices = @transform_12, window_bounds = array<i64: 1, 128>}, {transform_indices = @transform_13, window_bounds = array<i64: 1, 128, 128>}, {transform_indices = @transform_14, window_bounds = array<i64: 1, 4, 128, 128>}]} {
    %c0 = arith.constant 0 : index
    %c0_0 = arith.constant 0 : index
    %c0_1 = arith.constant 0 : index
    %0 = vector.load %arg1[%c0, %c0_0, %c0_1] : memref<1x128x128xf32, #tpu.memory_space<vmem>>, vector<1x128x128xf32>
    %1 = vector.shape_cast %0 : vector<1x128x128xf32> to vector<128x128xf32>
    %cst = arith.constant dense<0.000000e+00> : vector<128xf32>
    %2 = vector.multi_reduction <add>, %1, %cst [1] : vector<128x128xf32> to vector<128xf32>
    %3 = vector.shape_cast %2 : vector<128xf32> to vector<128x1xf32>
    %cst_2 = arith.constant 1.280000e+02 : f32
    %4 = vector.broadcast %cst_2 : f32 to vector<128x1xf32>
    %5 = arith.divf %3, %4 : vector<128x1xf32>
    %6 = vector.broadcast %5 : vector<128x1xf32> to vector<128x128xf32>
    %7 = arith.subf %1, %6 : vector<128x128xf32>
    %8 = arith.mulf %7, %7 : vector<128x128xf32>
    %cst_3 = arith.constant dense<0.000000e+00> : vector<128xf32>
    %9 = vector.multi_reduction <add>, %8, %cst_3 [1] : vector<128x128xf32> to vector<128xf32>
    %10 = vector.shape_cast %9 : vector<128xf32> to vector<128x1xf32>
    %cst_4 = arith.constant 1.280000e+02 : f32
    %11 = vector.broadcast %cst_4 : f32 to vector<128x1xf32>
    %12 = arith.divf %10, %11 : vector<128x1xf32>
    %13 = vector.broadcast %5 : vector<128x1xf32> to vector<128x128xf32>
    %14 = arith.subf %1, %13 : vector<128x128xf32>
    %cst_5 = arith.constant 9.99999974E-6 : f32
    %15 = vector.broadcast %cst_5 : f32 to vector<128x1xf32>
    %16 = arith.addf %12, %15 : vector<128x1xf32>
    %17 = math.rsqrt %16 : vector<128x1xf32>
    %18 = vector.broadcast %17 : vector<128x1xf32> to vector<128x128xf32>
    %19 = arith.mulf %14, %18 : vector<128x128xf32>
    %c0_6 = arith.constant 0 : index
    %c0_7 = arith.constant 0 : index
    %20 = vector.load %arg3[%c0_6, %c0_7] : memref<1x128xf32, #tpu.memory_space<vmem>>, vector<1x128xf32>
    %21 = vector.broadcast %20 : vector<1x128xf32> to vector<128x128xf32>
    %22 = arith.mulf %19, %21 : vector<128x128xf32>
    %c0_8 = arith.constant 0 : index
    %c0_9 = arith.constant 0 : index
    %23 = vector.load %arg4[%c0_8, %c0_9] : memref<1x128xf32, #tpu.memory_space<vmem>>, vector<1x128xf32>
    %24 = vector.broadcast %23 : vector<1x128xf32> to vector<128x128xf32>
    %25 = arith.addf %22, %24 : vector<128x128xf32>
    %26 = arith.truncf %25 : vector<128x128xf32> to vector<128x128xbf16>
    %27 = tpu.transpose %25, [1, 0] : vector<128x128xf32> -> vector<128x128xf32>
    %28 = arith.truncf %27 : vector<128x128xf32> to vector<128x128xbf16>
    %c0_10 = arith.constant 0 : index
    %c0_11 = arith.constant 0 : index
    %29 = vector.load %arg5[%c0_10, %c0_11] : memref<128x256xbf16, #tpu.memory_space<vmem>>, vector<128x256xbf16>
    %cst_12 = arith.constant dense<0.000000e+00> : vector<128x256xf32>
    %30 = tpu.matmul %26, %29, %cst_12 {dimension_numbers = #tpu.dot_dimension_numbers<[1], [0], [0], [1], [0, 0, 1, 1], [], []>} : vector<128x128xbf16>, vector<128x256xbf16>, vector<128x256xf32> -> vector<128x256xf32>
    %c0_13 = arith.constant 0 : index
    %c0_14 = arith.constant 0 : index
    %31 = vector.load %arg6[%c0_13, %c0_14] : memref<1x256xf32, #tpu.memory_space<vmem>>, vector<1x256xf32>
    %32 = vector.broadcast %31 : vector<1x256xf32> to vector<128x256xf32>
    %33 = arith.addf %30, %32 : vector<128x256xf32>
    %34 = vector.extract_strided_slice %33 {offsets = [0, 0], sizes = [128, 128], strides = [1, 1]} : vector<128x256xf32> to vector<128x128xf32>
    %35 = arith.truncf %34 : vector<128x128xf32> to vector<128x128xbf16>
    %36 = vector.extract_strided_slice %33 {offsets = [0, 128], sizes = [128, 128], strides = [1, 1]} : vector<128x256xf32> to vector<128x128xf32>
    %37 = arith.truncf %36 : vector<128x128xf32> to vector<128x128xbf16>
    %c0_15 = arith.constant 0 : index
    %c0_16 = arith.constant 0 : index
    %38 = vector.load %arg7[%c0_15, %c0_16] : memref<128x128xbf16, #tpu.memory_space<vmem>>, vector<128x128xbf16>
    %cst_17 = arith.constant dense<0.000000e+00> : vector<128x128xf32>
    %39 = tpu.matmul %38, %28, %cst_17 {dimension_numbers = #tpu.dot_dimension_numbers<[1], [0], [0], [1], [0, 0, 1, 1], [], []>} : vector<128x128xbf16>, vector<128x128xbf16>, vector<128x128xf32> -> vector<128x128xf32>
    %c0_18 = arith.constant 0 : index
    %c0_19 = arith.constant 0 : index
    %40 = vector.load %arg8[%c0_18, %c0_19] : memref<128x1xf32, #tpu.memory_space<vmem>>, vector<128x1xf32>
    %41 = vector.broadcast %40 : vector<128x1xf32> to vector<128x128xf32>
    %42 = arith.addf %39, %41 : vector<128x128xf32>
    %43 = arith.truncf %42 : vector<128x128xf32> to vector<128x128xbf16>
    %c0_20 = arith.constant 0 : index
    %c0_21 = arith.constant 0 : index
    %44 = vector.load %arg2[%c0_20, %c0_21] : memref<128x128xbf16, #tpu.memory_space<vmem>>, vector<128x128xbf16>
    %45 = tpu.concatenate %43, %44 in 1 : vector<128x128xbf16>, vector<128x128xbf16> -> vector<128x256xbf16>
    %c0_22 = arith.constant 0 : index
    %c0_23 = arith.constant 0 : index
    %46 = vector.load %arg9[%c0_22, %c0_23] : memref<8x128xbf16, #tpu.memory_space<vmem>>, vector<8x128xbf16>
    %cst_24 = arith.constant dense<0.000000e+00> : vector<8x128xf32>
    %47 = tpu.matmul %46, %28, %cst_24 {dimension_numbers = #tpu.dot_dimension_numbers<[1], [0], [0], [1], [0, 0, 1, 1], [], []>} : vector<8x128xbf16>, vector<128x128xbf16>, vector<8x128xf32> -> vector<8x128xf32>
    %c0_25 = arith.constant 0 : index
    %c0_26 = arith.constant 0 : index
    %48 = vector.load %arg10[%c0_25, %c0_26] : memref<8x1xf32, #tpu.memory_space<vmem>>, vector<8x1xf32>
    %49 = vector.broadcast %48 : vector<8x1xf32> to vector<8x128xf32>
    %50 = arith.addf %47, %49 : vector<8x128xf32>
    %c0_27 = arith.constant 0 : index
    %c0_28 = arith.constant 0 : index
    %51 = vector.load %arg11[%c0_27, %c0_28] : memref<8x128xf32, #tpu.memory_space<vmem>>, vector<8x128xf32>
    %52 = tpu.iota {dimensions = array<i32: 0>} : vector<128x128xi32>
    %53 = tpu.iota {dimensions = array<i32: 1>} : vector<128x128xi32>
    %54 = vector.extract_strided_slice %35 {offsets = [0, 0], sizes = [128, 32], strides = [1, 1]} : vector<128x128xbf16> to vector<128x32xbf16>
    %55 = vector.extract_strided_slice %45 {offsets = [0, 0], sizes = [32, 256], strides = [1, 1]} : vector<128x256xbf16> to vector<32x256xbf16>
    %cst_29 = arith.constant dense<0.000000e+00> : vector<128x256xf32>
    %56 = tpu.matmul %54, %55, %cst_29 {dimension_numbers = #tpu.dot_dimension_numbers<[1], [0], [0], [1], [0, 0, 1, 1], [], []>} : vector<128x32xbf16>, vector<32x256xbf16>, vector<128x256xf32> -> vector<128x256xf32>
    %57 = vector.extract_strided_slice %56 {offsets = [0, 0], sizes = [128, 128], strides = [1, 1]} : vector<128x256xf32> to vector<128x128xf32>
    %58 = vector.extract_strided_slice %50 {offsets = [0, 0], sizes = [1, 128], strides = [1, 1]} : vector<8x128xf32> to vector<1x128xf32>
    %59 = vector.broadcast %58 : vector<1x128xf32> to vector<128x128xf32>
    %60 = arith.addf %57, %59 : vector<128x128xf32>
    %61 = vector.extract_strided_slice %56 {offsets = [0, 128], sizes = [128, 128], strides = [1, 1]} : vector<128x256xf32> to vector<128x128xf32>
    %62 = vector.extract_strided_slice %51 {offsets = [0, 0], sizes = [1, 128], strides = [1, 1]} : vector<8x128xf32> to vector<1x128xf32>
    %63 = vector.broadcast %62 : vector<1x128xf32> to vector<128x128xf32>
    %64 = arith.addf %61, %63 : vector<128x128xf32>
    %c1_i32 = arith.constant 1 : i32
    %65 = tpu.dynamic_rotate %64 by %c1_i32 dim 1 {stride = 1 : si32, stride_dimension = 0 : si32} : vector<128x128xf32>, i32 -> vector<128x128xf32>
    %c127_i32 = arith.constant 127 : i32
    %66 = tpu.dynamic_rotate %65 by %c127_i32 dim 0 : vector<128x128xf32>, i32 -> vector<128x128xf32>
    %67 = arith.cmpi sle, %53, %52 : vector<128x128xi32>
    %c1_i32_30 = arith.constant 1 : i32
    %68 = vector.broadcast %c1_i32_30 : i32 to vector<128x128xi32>
    %69 = arith.addi %52, %68 : vector<128x128xi32>
    %70 = arith.cmpi eq, %53, %69 : vector<128x128xi32>
    %cst_31 = arith.constant 0.000000e+00 : f32
    %71 = vector.broadcast %cst_31 : f32 to vector<128x128xf32>
    %72 = arith.select %70, %71, %66 : vector<128x128xi1>, vector<128x128xf32>
    %73 = arith.select %67, %65, %72 : vector<128x128xi1>, vector<128x128xf32>
    %74 = arith.addf %60, %73 : vector<128x128xf32>
    %cst_32 = arith.constant dense<0xFF800000> : vector<128xf32>
    %75 = vector.multi_reduction <maximumf>, %74, %cst_32 [1] : vector<128x128xf32> to vector<128xf32>
    %76 = vector.shape_cast %75 : vector<128xf32> to vector<128x1xf32>
    %77 = vector.broadcast %76 : vector<128x1xf32> to vector<128x128xf32>
    %78 = arith.subf %74, %77 : vector<128x128xf32>
    %79 = math.exp %78 : vector<128x128xf32>
    %cst_33 = arith.constant dense<0.000000e+00> : vector<128xf32>
    %80 = vector.multi_reduction <add>, %79, %cst_33 [1] : vector<128x128xf32> to vector<128xf32>
    %81 = vector.shape_cast %80 : vector<128xf32> to vector<128x1xf32>
    %82 = tpu.reciprocal %81 {approx = true} : vector<128x1xf32> -> vector<128x1xf32>
    %83 = vector.broadcast %82 : vector<128x1xf32> to vector<128x128xf32>
    %84 = arith.mulf %79, %83 : vector<128x128xf32>
    %85 = arith.truncf %84 : vector<128x128xf32> to vector<128x128xbf16>
    %c0_34 = arith.constant 0 : index
    %c0_35 = arith.constant 0 : index
    %c0_36 = arith.constant 0 : index
    %c0_37 = arith.constant 0 : index
    %86 = vector.load %arg15[%c0_34, %c0_35, %c0_36, %c0_37] : memref<1x4x128x128xbf16, #tpu.memory_space<vmem>>, vector<1x1x128x128xbf16>
    %87 = vector.shape_cast %86 : vector<1x1x128x128xbf16> to vector<128x128xbf16>
    %88 = vector.shape_cast %85 : vector<128x128xbf16> to vector<1x1x128x128xbf16>
    tpu.vector_store %arg15[%c0_34, %c0_35, %c0_36, %c0_37], %88 {strides = array<i32>} : memref<1x4x128x128xbf16, #tpu.memory_space<vmem>>, vector<1x1x128x128xbf16>,
    %89 = arith.truncf %84 : vector<128x128xf32> to vector<128x128xbf16>
    %90 = vector.extract_strided_slice %37 {offsets = [0, 0], sizes = [128, 32], strides = [1, 1]} : vector<128x128xbf16> to vector<128x32xbf16>
    %cst_38 = arith.constant dense<0.000000e+00> : vector<128x32xf32>
    %91 = tpu.matmul %89, %90, %cst_38 {dimension_numbers = #tpu.dot_dimension_numbers<[1], [0], [0], [1], [0, 0, 1, 1], [], []>} : vector<128x128xbf16>, vector<128x32xbf16>, vector<128x32xf32> -> vector<128x32xf32>
    %92 = arith.truncf %91 : vector<128x32xf32> to vector<128x32xbf16>
    %c0_39 = arith.constant 0 : index
    %c0_40 = arith.constant 0 : index
    %93 = vector.load %arg16[%c0_39, %c0_40] : memref<128x128xbf16, #tpu.memory_space<vmem>>, vector<128x32xbf16>
    tpu.vector_store %arg16[%c0_39, %c0_40], %92 {strides = array<i32>} : memref<128x128xbf16, #tpu.memory_space<vmem>>, vector<128x32xbf16>,
    %94 = vector.extract_strided_slice %35 {offsets = [0, 32], sizes = [128, 32], strides = [1, 1]} : vector<128x128xbf16> to vector<128x32xbf16>
    %95 = vector.extract_strided_slice %45 {offsets = [32, 0], sizes = [32, 256], strides = [1, 1]} : vector<128x256xbf16> to vector<32x256xbf16>
    %cst_41 = arith.constant dense<0.000000e+00> : vector<128x256xf32>
    %96 = tpu.matmul %94, %95, %cst_41 {dimension_numbers = #tpu.dot_dimension_numbers<[1], [0], [0], [1], [0, 0, 1, 1], [], []>} : vector<128x32xbf16>, vector<32x256xbf16>, vector<128x256xf32> -> vector<128x256xf32>
    %97 = vector.extract_strided_slice %96 {offsets = [0, 0], sizes = [128, 128], strides = [1, 1]} : vector<128x256xf32> to vector<128x128xf32>
    %98 = vector.extract_strided_slice %50 {offsets = [1, 0], sizes = [1, 128], strides = [1, 1]} : vector<8x128xf32> to vector<1x128xf32>
    %99 = vector.broadcast %98 : vector<1x128xf32> to vector<128x128xf32>
    %100 = arith.addf %97, %99 : vector<128x128xf32>
    %101 = vector.extract_strided_slice %96 {offsets = [0, 128], sizes = [128, 128], strides = [1, 1]} : vector<128x256xf32> to vector<128x128xf32>
    %102 = vector.extract_strided_slice %51 {offsets = [1, 0], sizes = [1, 128], strides = [1, 1]} : vector<8x128xf32> to vector<1x128xf32>
    %103 = vector.broadcast %102 : vector<1x128xf32> to vector<128x128xf32>
    %104 = arith.addf %101, %103 : vector<128x128xf32>
    %c1_i32_42 = arith.constant 1 : i32
    %105 = tpu.dynamic_rotate %104 by %c1_i32_42 dim 1 {stride = 1 : si32, stride_dimension = 0 : si32} : vector<128x128xf32>, i32 -> vector<128x128xf32>
    %c127_i32_43 = arith.constant 127 : i32
    %106 = tpu.dynamic_rotate %105 by %c127_i32_43 dim 0 : vector<128x128xf32>, i32 -> vector<128x128xf32>
    %107 = arith.cmpi sle, %53, %52 : vector<128x128xi32>
    %c1_i32_44 = arith.constant 1 : i32
    %108 = vector.broadcast %c1_i32_44 : i32 to vector<128x128xi32>
    %109 = arith.addi %52, %108 : vector<128x128xi32>
    %110 = arith.cmpi eq, %53, %109 : vector<128x128xi32>
    %cst_45 = arith.constant 0.000000e+00 : f32
    %111 = vector.broadcast %cst_45 : f32 to vector<128x128xf32>
    %112 = arith.select %110, %111, %106 : vector<128x128xi1>, vector<128x128xf32>
    %113 = arith.select %107, %105, %112 : vector<128x128xi1>, vector<128x128xf32>
    %114 = arith.addf %100, %113 : vector<128x128xf32>
    %cst_46 = arith.constant dense<0xFF800000> : vector<128xf32>
    %115 = vector.multi_reduction <maximumf>, %114, %cst_46 [1] : vector<128x128xf32> to vector<128xf32>
    %116 = vector.shape_cast %115 : vector<128xf32> to vector<128x1xf32>
    %117 = vector.broadcast %116 : vector<128x1xf32> to vector<128x128xf32>
    %118 = arith.subf %114, %117 : vector<128x128xf32>
    %119 = math.exp %118 : vector<128x128xf32>
    %cst_47 = arith.constant dense<0.000000e+00> : vector<128xf32>
    %120 = vector.multi_reduction <add>, %119, %cst_47 [1] : vector<128x128xf32> to vector<128xf32>
    %121 = vector.shape_cast %120 : vector<128xf32> to vector<128x1xf32>
    %122 = tpu.reciprocal %121 {approx = true} : vector<128x1xf32> -> vector<128x1xf32>
    %123 = vector.broadcast %122 : vector<128x1xf32> to vector<128x128xf32>
    %124 = arith.mulf %119, %123 : vector<128x128xf32>
    %125 = arith.truncf %124 : vector<128x128xf32> to vector<128x128xbf16>
    %c0_48 = arith.constant 0 : index
    %c1 = arith.constant 1 : index
    %c0_49 = arith.constant 0 : index
    %c0_50 = arith.constant 0 : index
    %126 = vector.load %arg15[%c0_48, %c1, %c0_49, %c0_50] : memref<1x4x128x128xbf16, #tpu.memory_space<vmem>>, vector<1x1x128x128xbf16>
    %127 = vector.shape_cast %126 : vector<1x1x128x128xbf16> to vector<128x128xbf16>
    %128 = vector.shape_cast %125 : vector<128x128xbf16> to vector<1x1x128x128xbf16>
    tpu.vector_store %arg15[%c0_48, %c1, %c0_49, %c0_50], %128 {strides = array<i32>} : memref<1x4x128x128xbf16, #tpu.memory_space<vmem>>, vector<1x1x128x128xbf16>,
    %129 = arith.truncf %124 : vector<128x128xf32> to vector<128x128xbf16>
    %130 = vector.extract_strided_slice %37 {offsets = [0, 32], sizes = [128, 32], strides = [1, 1]} : vector<128x128xbf16> to vector<128x32xbf16>
    %cst_51 = arith.constant dense<0.000000e+00> : vector<128x32xf32>
    %131 = tpu.matmul %129, %130, %cst_51 {dimension_numbers = #tpu.dot_dimension_numbers<[1], [0], [0], [1], [0, 0, 1, 1], [], []>} : vector<128x128xbf16>, vector<128x32xbf16>, vector<128x32xf32> -> vector<128x32xf32>
    %132 = arith.truncf %131 : vector<128x32xf32> to vector<128x32xbf16>
    %c0_52 = arith.constant 0 : index
    %c32 = arith.constant 32 : index
    %133 = vector.load %arg16[%c0_52, %c32] : memref<128x128xbf16, #tpu.memory_space<vmem>>, vector<128x32xbf16>
    tpu.vector_store %arg16[%c0_52, %c32], %132 {strides = array<i32>} : memref<128x128xbf16, #tpu.memory_space<vmem>>, vector<128x32xbf16>,
    %134 = vector.extract_strided_slice %35 {offsets = [0, 64], sizes = [128, 32], strides = [1, 1]} : vector<128x128xbf16> to vector<128x32xbf16>
    %135 = vector.extract_strided_slice %45 {offsets = [64, 0], sizes = [32, 256], strides = [1, 1]} : vector<128x256xbf16> to vector<32x256xbf16>
    %cst_53 = arith.constant dense<0.000000e+00> : vector<128x256xf32>
    %136 = tpu.matmul %134, %135, %cst_53 {dimension_numbers = #tpu.dot_dimension_numbers<[1], [0], [0], [1], [0, 0, 1, 1], [], []>} : vector<128x32xbf16>, vector<32x256xbf16>, vector<128x256xf32> -> vector<128x256xf32>
    %137 = vector.extract_strided_slice %136 {offsets = [0, 0], sizes = [128, 128], strides = [1, 1]} : vector<128x256xf32> to vector<128x128xf32>
    %138 = vector.extract_strided_slice %50 {offsets = [2, 0], sizes = [1, 128], strides = [1, 1]} : vector<8x128xf32> to vector<1x128xf32>
    %139 = vector.broadcast %138 : vector<1x128xf32> to vector<128x128xf32>
    %140 = arith.addf %137, %139 : vector<128x128xf32>
    %141 = vector.extract_strided_slice %136 {offsets = [0, 128], sizes = [128, 128], strides = [1, 1]} : vector<128x256xf32> to vector<128x128xf32>
    %142 = vector.extract_strided_slice %51 {offsets = [2, 0], sizes = [1, 128], strides = [1, 1]} : vector<8x128xf32> to vector<1x128xf32>
    %143 = vector.broadcast %142 : vector<1x128xf32> to vector<128x128xf32>
    %144 = arith.addf %141, %143 : vector<128x128xf32>
    %c1_i32_54 = arith.constant 1 : i32
    %145 = tpu.dynamic_rotate %144 by %c1_i32_54 dim 1 {stride = 1 : si32, stride_dimension = 0 : si32} : vector<128x128xf32>, i32 -> vector<128x128xf32>
    %c127_i32_55 = arith.constant 127 : i32
    %146 = tpu.dynamic_rotate %145 by %c127_i32_55 dim 0 : vector<128x128xf32>, i32 -> vector<128x128xf32>
    %147 = arith.cmpi sle, %53, %52 : vector<128x128xi32>
    %c1_i32_56 = arith.constant 1 : i32
    %148 = vector.broadcast %c1_i32_56 : i32 to vector<128x128xi32>
    %149 = arith.addi %52, %148 : vector<128x128xi32>
    %150 = arith.cmpi eq, %53, %149 : vector<128x128xi32>
    %cst_57 = arith.constant 0.000000e+00 : f32
    %151 = vector.broadcast %cst_57 : f32 to vector<128x128xf32>
    %152 = arith.select %150, %151, %146 : vector<128x128xi1>, vector<128x128xf32>
    %153 = arith.select %147, %145, %152 : vector<128x128xi1>, vector<128x128xf32>
    %154 = arith.addf %140, %153 : vector<128x128xf32>
    %cst_58 = arith.constant dense<0xFF800000> : vector<128xf32>
    %155 = vector.multi_reduction <maximumf>, %154, %cst_58 [1] : vector<128x128xf32> to vector<128xf32>
    %156 = vector.shape_cast %155 : vector<128xf32> to vector<128x1xf32>
    %157 = vector.broadcast %156 : vector<128x1xf32> to vector<128x128xf32>
    %158 = arith.subf %154, %157 : vector<128x128xf32>
    %159 = math.exp %158 : vector<128x128xf32>
    %cst_59 = arith.constant dense<0.000000e+00> : vector<128xf32>
    %160 = vector.multi_reduction <add>, %159, %cst_59 [1] : vector<128x128xf32> to vector<128xf32>
    %161 = vector.shape_cast %160 : vector<128xf32> to vector<128x1xf32>
    %162 = tpu.reciprocal %161 {approx = true} : vector<128x1xf32> -> vector<128x1xf32>
    %163 = vector.broadcast %162 : vector<128x1xf32> to vector<128x128xf32>
    %164 = arith.mulf %159, %163 : vector<128x128xf32>
    %165 = arith.truncf %164 : vector<128x128xf32> to vector<128x128xbf16>
    %c0_60 = arith.constant 0 : index
    %c2 = arith.constant 2 : index
    %c0_61 = arith.constant 0 : index
    %c0_62 = arith.constant 0 : index
    %166 = vector.load %arg15[%c0_60, %c2, %c0_61, %c0_62] : memref<1x4x128x128xbf16, #tpu.memory_space<vmem>>, vector<1x1x128x128xbf16>
    %167 = vector.shape_cast %166 : vector<1x1x128x128xbf16> to vector<128x128xbf16>
    %168 = vector.shape_cast %165 : vector<128x128xbf16> to vector<1x1x128x128xbf16>
    tpu.vector_store %arg15[%c0_60, %c2, %c0_61, %c0_62], %168 {strides = array<i32>} : memref<1x4x128x128xbf16, #tpu.memory_space<vmem>>, vector<1x1x128x128xbf16>,
    %169 = arith.truncf %164 : vector<128x128xf32> to vector<128x128xbf16>
    %170 = vector.extract_strided_slice %37 {offsets = [0, 64], sizes = [128, 32], strides = [1, 1]} : vector<128x128xbf16> to vector<128x32xbf16>
    %cst_63 = arith.constant dense<0.000000e+00> : vector<128x32xf32>
    %171 = tpu.matmul %169, %170, %cst_63 {dimension_numbers = #tpu.dot_dimension_numbers<[1], [0], [0], [1], [0, 0, 1, 1], [], []>} : vector<128x128xbf16>, vector<128x32xbf16>, vector<128x32xf32> -> vector<128x32xf32>
    %172 = arith.truncf %171 : vector<128x32xf32> to vector<128x32xbf16>
    %c0_64 = arith.constant 0 : index
    %c64 = arith.constant 64 : index
    %173 = vector.load %arg16[%c0_64, %c64] : memref<128x128xbf16, #tpu.memory_space<vmem>>, vector<128x32xbf16>
    tpu.vector_store %arg16[%c0_64, %c64], %172 {strides = array<i32>} : memref<128x128xbf16, #tpu.memory_space<vmem>>, vector<128x32xbf16>,
    %174 = vector.extract_strided_slice %35 {offsets = [0, 96], sizes = [128, 32], strides = [1, 1]} : vector<128x128xbf16> to vector<128x32xbf16>
    %175 = vector.extract_strided_slice %45 {offsets = [96, 0], sizes = [32, 256], strides = [1, 1]} : vector<128x256xbf16> to vector<32x256xbf16>
    %cst_65 = arith.constant dense<0.000000e+00> : vector<128x256xf32>
    %176 = tpu.matmul %174, %175, %cst_65 {dimension_numbers = #tpu.dot_dimension_numbers<[1], [0], [0], [1], [0, 0, 1, 1], [], []>} : vector<128x32xbf16>, vector<32x256xbf16>, vector<128x256xf32> -> vector<128x256xf32>
    %177 = vector.extract_strided_slice %176 {offsets = [0, 0], sizes = [128, 128], strides = [1, 1]} : vector<128x256xf32> to vector<128x128xf32>
    %178 = vector.extract_strided_slice %50 {offsets = [3, 0], sizes = [1, 128], strides = [1, 1]} : vector<8x128xf32> to vector<1x128xf32>
    %179 = vector.broadcast %178 : vector<1x128xf32> to vector<128x128xf32>
    %180 = arith.addf %177, %179 : vector<128x128xf32>
    %181 = vector.extract_strided_slice %176 {offsets = [0, 128], sizes = [128, 128], strides = [1, 1]} : vector<128x256xf32> to vector<128x128xf32>
    %182 = vector.extract_strided_slice %51 {offsets = [3, 0], sizes = [1, 128], strides = [1, 1]} : vector<8x128xf32> to vector<1x128xf32>
    %183 = vector.broadcast %182 : vector<1x128xf32> to vector<128x128xf32>
    %184 = arith.addf %181, %183 : vector<128x128xf32>
    %c1_i32_66 = arith.constant 1 : i32
    %185 = tpu.dynamic_rotate %184 by %c1_i32_66 dim 1 {stride = 1 : si32, stride_dimension = 0 : si32} : vector<128x128xf32>, i32 -> vector<128x128xf32>
    %c127_i32_67 = arith.constant 127 : i32
    %186 = tpu.dynamic_rotate %185 by %c127_i32_67 dim 0 : vector<128x128xf32>, i32 -> vector<128x128xf32>
    %187 = arith.cmpi sle, %53, %52 : vector<128x128xi32>
    %c1_i32_68 = arith.constant 1 : i32
    %188 = vector.broadcast %c1_i32_68 : i32 to vector<128x128xi32>
    %189 = arith.addi %52, %188 : vector<128x128xi32>
    %190 = arith.cmpi eq, %53, %189 : vector<128x128xi32>
    %cst_69 = arith.constant 0.000000e+00 : f32
    %191 = vector.broadcast %cst_69 : f32 to vector<128x128xf32>
    %192 = arith.select %190, %191, %186 : vector<128x128xi1>, vector<128x128xf32>
    %193 = arith.select %187, %185, %192 : vector<128x128xi1>, vector<128x128xf32>
    %194 = arith.addf %180, %193 : vector<128x128xf32>
    %cst_70 = arith.constant dense<0xFF800000> : vector<128xf32>
    %195 = vector.multi_reduction <maximumf>, %194, %cst_70 [1] : vector<128x128xf32> to vector<128xf32>
    %196 = vector.shape_cast %195 : vector<128xf32> to vector<128x1xf32>
    %197 = vector.broadcast %196 : vector<128x1xf32> to vector<128x128xf32>
    %198 = arith.subf %194, %197 : vector<128x128xf32>
    %199 = math.exp %198 : vector<128x128xf32>
    %cst_71 = arith.constant dense<0.000000e+00> : vector<128xf32>
    %200 = vector.multi_reduction <add>, %199, %cst_71 [1] : vector<128x128xf32> to vector<128xf32>
    %201 = vector.shape_cast %200 : vector<128xf32> to vector<128x1xf32>
    %202 = tpu.reciprocal %201 {approx = true} : vector<128x1xf32> -> vector<128x1xf32>
    %203 = vector.broadcast %202 : vector<128x1xf32> to vector<128x128xf32>
    %204 = arith.mulf %199, %203 : vector<128x128xf32>
    %205 = arith.truncf %204 : vector<128x128xf32> to vector<128x128xbf16>
    %c0_72 = arith.constant 0 : index
    %c3 = arith.constant 3 : index
    %c0_73 = arith.constant 0 : index
    %c0_74 = arith.constant 0 : index
    %206 = vector.load %arg15[%c0_72, %c3, %c0_73, %c0_74] : memref<1x4x128x128xbf16, #tpu.memory_space<vmem>>, vector<1x1x128x128xbf16>
    %207 = vector.shape_cast %206 : vector<1x1x128x128xbf16> to vector<128x128xbf16>
    %208 = vector.shape_cast %205 : vector<128x128xbf16> to vector<1x1x128x128xbf16>
    tpu.vector_store %arg15[%c0_72, %c3, %c0_73, %c0_74], %208 {strides = array<i32>} : memref<1x4x128x128xbf16, #tpu.memory_space<vmem>>, vector<1x1x128x128xbf16>,
    %209 = arith.truncf %204 : vector<128x128xf32> to vector<128x128xbf16>
    %210 = vector.extract_strided_slice %37 {offsets = [0, 96], sizes = [128, 32], strides = [1, 1]} : vector<128x128xbf16> to vector<128x32xbf16>
    %cst_75 = arith.constant dense<0.000000e+00> : vector<128x32xf32>
    %211 = tpu.matmul %209, %210, %cst_75 {dimension_numbers = #tpu.dot_dimension_numbers<[1], [0], [0], [1], [0, 0, 1, 1], [], []>} : vector<128x128xbf16>, vector<128x32xbf16>, vector<128x32xf32> -> vector<128x32xf32>
    %212 = arith.truncf %211 : vector<128x32xf32> to vector<128x32xbf16>
    %c0_76 = arith.constant 0 : index
    %c96 = arith.constant 96 : index
    %213 = vector.load %arg16[%c0_76, %c96] : memref<128x128xbf16, #tpu.memory_space<vmem>>, vector<128x32xbf16>
    tpu.vector_store %arg16[%c0_76, %c96], %212 {strides = array<i32>} : memref<128x128xbf16, #tpu.memory_space<vmem>>, vector<128x32xbf16>,
    %c0_77 = arith.constant 0 : index
    %c0_78 = arith.constant 0 : index
    %214 = vector.load %arg16[%c0_77, %c0_78] : memref<128x128xbf16, #tpu.memory_space<vmem>>, vector<128x128xbf16>
    %c0_79 = arith.constant 0 : index
    %c0_80 = arith.constant 0 : index
    %215 = vector.load %arg12[%c0_79, %c0_80] : memref<128x128xbf16, #tpu.memory_space<vmem>>, vector<128x128xbf16>
    %cst_81 = arith.constant dense<0.000000e+00> : vector<128x128xf32>
    %216 = tpu.matmul %214, %215, %cst_81 {dimension_numbers = #tpu.dot_dimension_numbers<[1], [0], [0], [1], [0, 0, 1, 1], [], []>} : vector<128x128xbf16>, vector<128x128xbf16>, vector<128x128xf32> -> vector<128x128xf32>
    %c0_82 = arith.constant 0 : index
    %c0_83 = arith.constant 0 : index
    %217 = vector.load %arg13[%c0_82, %c0_83] : memref<1x128xf32, #tpu.memory_space<vmem>>, vector<1x128xf32>
    %218 = vector.broadcast %217 : vector<1x128xf32> to vector<128x128xf32>
    %219 = arith.addf %216, %218 : vector<128x128xf32>
    %220 = arith.addf %219, %1 : vector<128x128xf32>
    %c0_84 = arith.constant 0 : index
    %c0_85 = arith.constant 0 : index
    %c0_86 = arith.constant 0 : index
    %221 = vector.load %arg14[%c0_84, %c0_85, %c0_86] : memref<1x128x128xf32, #tpu.memory_space<vmem>>, vector<1x128x128xf32>
    %222 = vector.shape_cast %221 : vector<1x128x128xf32> to vector<128x128xf32>
    %223 = vector.shape_cast %220 : vector<128x128xf32> to vector<1x128x128xf32>
    tpu.vector_store %arg14[%c0_84, %c0_85, %c0_86], %223 {strides = array<i32>} : memref<1x128x128xf32, #tpu.memory_space<vmem>>, vector<1x128x128xf32>,
    return
  }
  func.func @transform_0(%arg0: i32) -> (i32, i32, i32) {
    %c0_i32 = arith.constant 0 : i32
    %c0_i32_0 = arith.constant 0 : i32
    %c0_i32_1 = arith.constant 0 : i32
    return %arg0, %c0_i32, %c0_i32_0 : i32, i32, i32
  }
  func.func @transform_1(%arg0: i32) -> (i32, i32) {
    %c0_i32 = arith.constant 0 : i32
    %c0_i32_0 = arith.constant 0 : i32
    %c0_i32_1 = arith.constant 0 : i32
    return %c0_i32, %c0_i32_0 : i32, i32
  }
  func.func @transform_2(%arg0: i32) -> (i32, i32) {
    %c0_i32 = arith.constant 0 : i32
    %c0_i32_0 = arith.constant 0 : i32
    %c0_i32_1 = arith.constant 0 : i32
    return %c0_i32, %c0_i32_0 : i32, i32
  }
  func.func @transform_3(%arg0: i32) -> (i32, i32) {
    %c0_i32 = arith.constant 0 : i32
    %c0_i32_0 = arith.constant 0 : i32
    %c0_i32_1 = arith.constant 0 : i32
    return %c0_i32, %c0_i32_0 : i32, i32
  }
  func.func @transform_4(%arg0: i32) -> (i32, i32) {
    %c0_i32 = arith.constant 0 : i32
    %c0_i32_0 = arith.constant 0 : i32
    %c0_i32_1 = arith.constant 0 : i32
    return %c0_i32, %c0_i32_0 : i32, i32
  }
  func.func @transform_5(%arg0: i32) -> (i32, i32) {
    %c0_i32 = arith.constant 0 : i32
    %c0_i32_0 = arith.constant 0 : i32
    %c0_i32_1 = arith.constant 0 : i32
    return %c0_i32, %c0_i32_0 : i32, i32
  }
  func.func @transform_6(%arg0: i32) -> (i32, i32) {
    %c0_i32 = arith.constant 0 : i32
    %c0_i32_0 = arith.constant 0 : i32
    %c0_i32_1 = arith.constant 0 : i32
    return %c0_i32, %c0_i32_0 : i32, i32
  }
  func.func @transform_7(%arg0: i32) -> (i32, i32) {
    %c0_i32 = arith.constant 0 : i32
    %c0_i32_0 = arith.constant 0 : i32
    %c0_i32_1 = arith.constant 0 : i32
    return %c0_i32, %c0_i32_0 : i32, i32
  }
  func.func @transform_8(%arg0: i32) -> (i32, i32) {
    %c0_i32 = arith.constant 0 : i32
    %c0_i32_0 = arith.constant 0 : i32
    %c0_i32_1 = arith.constant 0 : i32
    return %c0_i32, %c0_i32_0 : i32, i32
  }
  func.func @transform_9(%arg0: i32) -> (i32, i32) {
    %c0_i32 = arith.constant 0 : i32
    %c0_i32_0 = arith.constant 0 : i32
    %c0_i32_1 = arith.constant 0 : i32
    return %c0_i32, %c0_i32_0 : i32, i32
  }
  func.func @transform_10(%arg0: i32) -> (i32, i32) {
    %c0_i32 = arith.constant 0 : i32
    %c0_i32_0 = arith.constant 0 : i32
    %c0_i32_1 = arith.constant 0 : i32
    return %c0_i32, %c0_i32_0 : i32, i32
  }
  func.func @transform_11(%arg0: i32) -> (i32, i32) {
    %c0_i32 = arith.constant 0 : i32
    %c0_i32_0 = arith.constant 0 : i32
    %c0_i32_1 = arith.constant 0 : i32
    return %c0_i32, %c0_i32_0 : i32, i32
  }
  func.func @transform_12(%arg0: i32) -> (i32, i32) {
    %c0_i32 = arith.constant 0 : i32
    %c0_i32_0 = arith.constant 0 : i32
    %c0_i32_1 = arith.constant 0 : i32
    return %c0_i32, %c0_i32_0 : i32, i32
  }
  func.func @transform_13(%arg0: i32) -> (i32, i32, i32) {
    %c0_i32 = arith.constant 0 : i32
    %c0_i32_0 = arith.constant 0 : i32
    %c0_i32_1 = arith.constant 0 : i32
    return %arg0, %c0_i32, %c0_i32_0 : i32, i32, i32
  }
  func.func @transform_14(%arg0: i32) -> (i32, i32, i32, i32) {
    %c0_i32 = arith.constant 0 : i32
    %c0_i32_0 = arith.constant 0 : i32
    %c0_i32_1 = arith.constant 0 : i32
    %c0_i32_2 = arith.constant 0 : i32
    return %arg0, %c0_i32, %c0_i32_0, %c0_i32_1 : i32, i32, i32, i32
  }
}

</mosaic_0001>

<bundles_post_ra>
// kernel: tpu_custom_call.1
= control target key start
LH: loop header
LB: loop body
LE: loop exit
PB: predicated region body
PF: predicated region fallthrough
CT: control target
= control target key end

     0   :  { %s9173_s0 = inlined_call_operand.hbm [shape: f32[2,128,128], index: 0, kind: input, shape index: {}]   ;;  %s9174_s1 = inlined_call_operand.hbm [shape: bf16[128,128], index: 1, kind: input, shape index: {}]   ;;  %s9175_s2 = inlined_call_operand.vmem [shape: f32[1,128], index: 2, kind: input, shape index: {}]   ;;  %s9176_s3 = inlined_call_operand.vmem [shape: f32[1,128], index: 3, kind: input, shape index: {}]   ;;  %s9177_s4 = inlined_call_operand.vmem [shape: bf16[128,256], index: 4, kind: input, shape index: {}]   ;;  %s9178_s5 = inlined_call_operand.vmem [shape: f32[1,256], index: 5, kind: input, shape index: {}]   ;;  %s9179_s6 = inlined_call_operand.hbm [shape: bf16[128,128], index: 6, kind: input, shape index: {}]   ;;  %s9180_s7 = inlined_call_operand.vmem [shape: f32[128,1], index: 7, kind: input, shape index: {}]   ;;  %s9181_s8 = inlined_call_operand.vmem [shape: bf16[8,128], index: 8, kind: input, shape index: {}]   ;;  %s9182_s9 = inlined_call_operand.vmem [shape: f32[8,1], index: 9, kind: input, shape index: {}]   ;;  %s9183_s10 = inlined_call_operand.vmem [shape: f32[8,128], index: 10, kind: input, shape index: {}]   ;;  %s9184_s11 = inlined_call_operand.hbm [shape: bf16[128,128], index: 11, kind: input, shape index: {}]   ;;  %s9185_s12 = inlined_call_operand.vmem [shape: f32[1,128], index: 12, kind: input, shape index: {}]   ;;  %s9186_s13 = inlined_call_operand.hbm [shape: f32[2,128,128], index: 13, kind: output, shape index: {0}]   ;;  %s9187_s14 = inlined_call_operand.hbm [shape: bf16[2,4,128,128], index: 14, kind: output, shape index: {1}]  }
   0x1   :  { %9333 = sst [smem:[#allocation70_spill]] %s9173_s0 }
   0x2   :  { %9334 = sst [smem:[#allocation71_spill]] %s9174_s1 }
   0x3   :  { %9335 = sst [smem:[#allocation72_spill]] %s9175_s2 }
   0x4   :  { %9336 = sst [smem:[#allocation73_spill]] %s9176_s3 }
   0x5   :  { %9337 = sst [smem:[#allocation74_spill]] %s9177_s4 }
   0x6   :  { %9338 = sst [smem:[#allocation75_spill]] %s9178_s5 }
   0x7   :  { %9339 = sst [smem:[#allocation76_spill]] %s9179_s6 }
   0x8   :  { %9340 = sst [smem:[#allocation77_spill]] %s9181_s8 }
   0x9   :  { %9341 = sst [smem:[#allocation78_spill]] %s9182_s9 }
   0xa   :  { %9342 = sst [smem:[#allocation79_spill]] %s9183_s10 }
   0xb   :  { %9343 = sst [smem:[#allocation80_spill]] %s9184_s11 }
   0xc   :  { %9344 = sst [smem:[#allocation81_spill]] %s9185_s12 }
   0xd   :  { %9345 = sst [smem:[#allocation82_spill]] %s9186_s13 }
   0xe   :  { %9346 = sst [smem:[#allocation83_spill]] %s9187_s14 }
   0xf   :  { %20 = vsyncpa [#allocation4], 0 }
  0x10   :  { %22 = vsyncpa [#allocation4 + $0x1], 0 }
  0x11   :  { %23 = vsyncpa [#allocation7], 0 }
  0x12   :  { %24 = vsyncpa [#allocation10], 0 }
  0x13   :  { %25 = vsyncpa [#allocation5], 0 }
  0x14   :  { %27 = vsyncpa [#allocation5 + $0x1], 0 }
  0x15   :  { %28 = vsyncpa [#allocation13], 0 }
  0x16   :  { %30 = vsyncpa [#allocation13 + $0x1], 0  ;;  %s6344_s29 = smov 0   ;;  %s6346_s30 = smov 0  }
  0x17   :  { %s6348_s15 = smov 0   ;;  %s6350_s16 = smov 0  }
  0x18 LB: > { %9347 = sst [smem:[#allocation19_spill]] %s6220_s29  ;;  %s6365_s17 = sadd.s32 4294967295, %s6232_s16   ;;  %s6232_s16 = sphi %s6350_s16, %s9625_s16   ;;  %s6228_s15 = sphi %s6348_s15, %s9628_s15   ;;  %s6224_s30 = sphi %s6346_s30, %s9627_s30   ;;  %s6220_s29 = sphi %s6344_s29, %s9626_s29  }
  0x19   : > { %9348 = sst [smem:[#allocation20_spill]] %s6224_s30  ;;  %s4759_s18 = sadd.s32 4294967294, %s6232_s16  }
  0x1a   : > { %9349 = sst [smem:[#allocation21_spill]] %s6228_s15  ;;  %p56_p0 = scmp.ne.s32.totalorder %s6224_s30, %s6220_s29 }
  0x1b   : > { %p9191_p1 = scmp.eq.s32.totalorder %s6365_s17, 0  ;;  %p338_p3 = scmp.eq.s32.totalorder %s4759_s18, 1 }
  0x1c   : > { %p4760_p5 = scmp.ge.s32.totalorder %s6232_s16, 1  ;;  %p371_p7 = scmp.lt.s32.totalorder %s6232_s16, 3 }
  0x1d   : > { %p6374_p4 = por %p9191_p1, %p56_p0  ;;  %p6379_p6 = por %p338_p3, %p56_p0 }
  0x1e   : > { %p6384_p8 = pnand %p4760_p5, %p371_p7  ;;  %s6234_s22 = smov [#allocation6]  }
  0x1f   : > { %s9350_s19 = scalar_select %p6374_p4, 1, 0 }
  0x20   : > { %s9351_s20 = scalar_select %p6379_p6, 1, 0 }
  0x21   : > { %s9353_s21 = scalar_select %p6384_p8, 1, 0 }
  0x22   : > { %9352 = sst [smem:[#allocation22_spill]] %s9351_s20  ;;  %s383_s23 = sshll.u32 %s6234_s22, 4  ;;  %s6388_s23 = int_to_ptr.vmem [resolvable:$true] %s383_s23 }
  0x23   : > { %p5563_p9 = pneg %p6384_p8  ;;  %s6235_s25 = smov [#allocation8]  }
  0x24   : > { %s408_s26 = sshll.u32 %s6235_s25, 4  ;;  %s6236_s27 = smov [#allocation9]   ;;  %s6399_s26 = int_to_ptr.vmem [resolvable:$true] %s408_s26 }
  0x25   : > { %p6395_p11 = pnand %p5563_p9, %p9191_p1  ;;  %s6401_s28 = sshll.u32 %s6236_s27, 4  ;;  %s434_s28 = int_to_ptr.vmem [resolvable:$true] %s6401_s28 }
  0x26   : > { %s9355_s1 = sld [smem:[#allocation71_spill]] }
  0x27   : > { %p6411_p13 = pneg %p6395_p11 }
  0x2c   : > { %s6012_s20 = scalar_lea.hbm %s9355_s1, 1024 }
  0x2d   : > { %p6013_p12 = scmp.ne.s32.totalorder %s9355_s1, %s6012_s20  ;;  %p6019_p5 = scmp.lt.u32.totalorder %s6012_s20, %s9355_s1 }
  0x2f   : > { %p6015_p0 = pnand %p6411_p13, %p6013_p12 }
  0x31   : > { %p6016_p3 = pneg %p6015_p0 }
  0x33   : > { %p6021_p7 = pnand %p6019_p5, %p6016_p3 }
  0x35   : > { %6024 = shalt.err (!%p6021_p7)
}
  0x36   : > { %s6025_s13 = scalar_lea.vmem %s6388_s23, 1024  ;;  %p6033_p2 = scmp.lt.s32.totalorder %s6388_s23, %s6388_s23 }
  0x37   : > { %p6026_p9 = scmp.ne.s32.totalorder %s6388_s23, %s6025_s13  ;;  %p6034_p6 = scmp.lt.s32.totalorder %s6025_s13, %s6025_s13 }
  0x39   : > { %p6028_p10 = pnand %p6026_p9, %p6411_p13  ;;  %p6035_p12 = por %p6034_p6, %p6033_p2 }
  0x3b   : > { %p6029_p1 = pneg %p6028_p10 }
  0x3d   : > { %p6036_p0 = pnand %p6035_p12, %p6029_p1 }
  0x3f   : > { %6039 = shalt.err (!%p6036_p0)
}
  0x40   : > { %s6237_s29 = smov 64   ;;  %s6238_s20 = smov 4  }
  0x41   : > { %5566 = dma.hbm_to_vmem [thread:$0]  (!%p6395_p11), %s9355_s1, 1024, %s6388_s23, [#allocation7], %s6237_s29, %s6237_s29, %s6238_s20  }
  0x42   : > { %s9357_s6 = sld [smem:[#allocation76_spill]] }
  0x48   : > { %s6040_s13 = scalar_lea.hbm %s9357_s6, 1024 }
  0x49   : > { %p6041_p1 = scmp.ne.s32.totalorder %s9357_s6, %s6040_s13  ;;  %p6047_p10 = scmp.lt.u32.totalorder %s6040_s13, %s9357_s6 }
  0x4b   : > { %p6043_p2 = pnand %p6041_p1, %p6411_p13 }
  0x4d   : > { %p6044_p6 = pneg %p6043_p2 }
  0x4f   : > { %p6049_p3 = pnand %p6047_p10, %p6044_p6 }
  0x51   : > { %6052 = shalt.err (!%p6049_p3)
}
  0x52   : > { %s6053_s23 = scalar_lea.vmem %s6399_s26, 1024  ;;  %p6061_p12 = scmp.lt.s32.totalorder %s6399_s26, %s6399_s26 }
  0x53   : > { %p6054_p5 = scmp.ne.s32.totalorder %s6399_s26, %s6053_s23  ;;  %p6062_p0 = scmp.lt.s32.totalorder %s6053_s23, %s6053_s23 }
  0x55   : > { %p6056_p7 = pnand %p6054_p5, %p6411_p13  ;;  %p6063_p1 = por %p6062_p0, %p6061_p12 }
  0x57   : > { %p6057_p9 = pneg %p6056_p7 }
  0x59   : > { %p6064_p2 = pnand %p6063_p1, %p6057_p9 }
  0x5b   : > { %6067 = shalt.err (!%p6064_p2)
}
  0x5c   : > { %5569 = dma.hbm_to_vmem [thread:$0]  (!%p6395_p11), %s9357_s6, 1024, %s6399_s26, [#allocation7], %s6237_s29, %s6237_s29, %s6238_s20  }
  0x5d   : > { %s9358_s11 = sld [smem:[#allocation80_spill]] }
  0x63   : > { %s6068_s18 = scalar_lea.hbm %s9358_s11, 1024 }
  0x64   : > { %p6069_p6 = scmp.ne.s32.totalorder %s9358_s11, %s6068_s18  ;;  %p6075_p5 = scmp.lt.u32.totalorder %s6068_s18, %s9358_s11 }
  0x66   : > { %p6071_p10 = pnand %p6069_p6, %p6411_p13 }
  0x68   : > { %p6072_p3 = pneg %p6071_p10 }
  0x6a   : > { %p6077_p7 = pnand %p6075_p5, %p6072_p3 }
  0x6c   : > { %6080 = shalt.err (!%p6077_p7)
}
  0x6d   : > { %s6081_s23 = scalar_lea.vmem %s434_s28, 1024  ;;  %p6089_p1 = scmp.lt.s32.totalorder %s434_s28, %s434_s28 }
  0x6e   : > { %p6082_p9 = scmp.ne.s32.totalorder %s434_s28, %s6081_s23  ;;  %p6090_p2 = scmp.lt.s32.totalorder %s6081_s23, %s6081_s23 }
  0x70   : > { %p6084_p12 = pnand %p6082_p9, %p6411_p13  ;;  %p6091_p4 = por %p6090_p2, %p6089_p1 }
  0x72   : > { %p6085_p0 = pneg %p6084_p12 }
  0x74   : > { %p6092_p8 = pnand %p6091_p4, %p6085_p0 }
  0x76   : > { %6095 = shalt.err (!%p6092_p8)
}
  0x77   : > { %5572 = dma.hbm_to_vmem [thread:$0]  (!%p6395_p11), %s9358_s11, 1024, %s434_s28, [#allocation10], %s6237_s29, %s6237_s29, %s6238_s20  }
  0x78   : > { %s6484_s12 = sadd.s32 1, %s6232_s16   ;;  %s43_s8 = sadd.s32 1, %s6228_s15 }
  0x79   : > { %9359 = sst [smem:[#allocation23_spill]] %s6484_s12  ;;  %s40_s24 = ssub.s32 %s6232_s16, %s6484_s12 }
  0x7a   : > { %p41_p4 = scmp.eq.s32.totalorder %s40_s24, 0  ;;  %p50_p8 = scmp.ne.s32.totalorder %s6228_s15, %s6224_s30 }
  0x7b   : > { %p51_p13 = scmp.eq.s32.totalorder %s6232_s16, 0  ;;  %p5587_p6 = scmp.lt.s32.totalorder %s6232_s16, 2 }
  0x7c   : > { %s6494_s10 = scalar_select %p41_p4, %s6228_s15, %s43_s8  }
  0x7d   : > { %p52_p10 = por %p51_p13, %p50_p8  ;;  %p9361_p3 = scmp.eq.s32.totalorder %s6365_s17, 1 }
  0x7e   : > { %9360 = sst [smem:[#allocation24_spill]] %s6494_s10  ;;  %s450_s18 = sand.u32 1, %s6228_s15  }
  0x7f   : > { %p6498_p5 = por %p9361_p3, %p50_p8  ;;  %s4970_s22 = sshll.u32 %s6232_s16, 11 }
  0x80   : > { %s4765_s28 = sshll.u32 %s450_s18, 7  ;;  %s9363_s0 = sld [smem:[#allocation70_spill]] }
  0x81   : > { %s454_s27 = scalar_lea.vmem [#allocation3], %s4765_s28  ;;  %p6509_p11 = pnand %p5587_p6, %p52_p10 }
  0x82   : > { %s461_s13 = sshll.u32 %s454_s27, 4  ;;  %s6515_s26 = scalar_lea.sflag [#allocation4], %s450_s18  ;;  %s6513_s13 = int_to_ptr.vmem [resolvable:$true] %s461_s13 }
  0x83   : > { %p6098_p9 = pneg %p6509_p11 }
  0x86   : > { %s6507_s25 = scalar_lea.hbm %s9363_s0, %s4970_s22  ;;  %s6101_s22 = scalar_lea.hbm %s9363_s0, 4096 }
  0x87   : > { %s6096_s5 = scalar_lea.hbm %s6507_s25, 2048  ;;  %p6102_p1 = scmp.lt.u32.totalorder %s6507_s25, %s9363_s0 }
  0x88   : > { %p6097_p7 = scmp.ne.s32.totalorder %s6507_s25, %s6096_s5  ;;  %p6103_p2 = scmp.lt.u32.totalorder %s6101_s22, %s6096_s5 }
  0x89   : > { %p6105_p8 = scmp.lt.u32.totalorder %s6096_s5, %s6507_s25 }
  0x8a   : > { %p6099_p12 = pnand %p6098_p9, %p6097_p7  ;;  %p6104_p4 = por %p6103_p2, %p6102_p1 }
  0x8c   : > { %p6100_p0 = pneg %p6099_p12  ;;  %p6106_p13 = por %p6105_p8, %p6104_p4 }
  0x8e   : > { %p6107_p6 = pnand %p6106_p13, %p6100_p0 }
  0x90   : > { %6110 = shalt.err (!%p6107_p6)
}
  0x91   : > { %s6111_s18 = scalar_lea.vmem %s6513_s13, 2048  ;;  %s6239_s20 = smov [#allocation3]  }
  0x92   : > { %p6112_p10 = scmp.ne.s32.totalorder %s6513_s13, %s6111_s18  ;;  %s6116_s27 = sshll.u32 %s6239_s20, 4  ;;  %s6117_s27 = int_to_ptr.vmem [resolvable:$false] %s6116_s27 }
  0x93   : > { %s6118_s24 = scalar_lea.vmem %s6117_s27, 4096  ;;  %p6119_p12 = scmp.lt.s32.totalorder %s6513_s13, %s6117_s27 }
  0x94   : > { %p6114_p3 = pnand %p6112_p10, %p6098_p9  ;;  %p6120_p1 = scmp.lt.s32.totalorder %s6118_s24, %s6111_s18 }
  0x96   : > { %p6115_p7 = pneg %p6114_p3  ;;  %p6121_p2 = por %p6120_p1, %p6119_p12 }
  0x98   : > { %p6122_p4 = pnand %p6121_p2, %p6115_p7 }
  0x9a   : > { %6125 = shalt.err (!%p6122_p4)
}
  0x9b   : > { %s6240_s5 = smov 128   ;;  %s6241_s8 = smov 8  }
  0x9c   : > { %5576 = dma.hbm_to_vmem [thread:$0]  (!%p6509_p11), %s6507_s25, 2048, %s6513_s13, %s6515_s26, %s6240_s5, %s6240_s5, %s6241_s8  }
  0x9d   : > { %p9365_p9 = scmp.ne.s32.totalorder %s9353_s21, 0 }
  0x9f   : > { %473 = sbr.rel (%p9365_p9) target bundleno = 4403 (0x1133), region = 72 }
  0xa6   : > { %s6546_s22 = sand.u32 1, %s6224_s30   ;;  %p9366_p0 = scmp.ne.s32.totalorder %s9350_s19, 0 }
  0xa7   : > { %s9196_s28 = sshll.u32 %s6546_s22, 7  ;;  %s476_s29 = scalar_lea.sflag [#allocation4], %s6546_s22 }
  0xa8   : > { %s6552_s18 = scalar_lea.vmem [#allocation3], %s9196_s28 }
  0xa9   : > { %6199 = dma.done.wait (%p9366_p0), %s476_s29, 2048  }
  0xaa   : > { %6201 = vsyncadd (%p9366_p0), %s476_s29, 4294965248  ;;  %p9367_p11 = scmp.eq.s32.totalorder %s6365_s17, 0 }
  0xac   : > { %6203 = dma.done.wait (%p9367_p11), [#allocation7], 2048   ;;  %p9368_p8 = pmov %p9367_p11 }
  0xae   : > { %6205 = vsyncadd (%p9368_p8), [#allocation7], 4294965248  ;;  %p9369_p13 = pmov %p9368_p8 }
  0xaf   : > { %p9370_p6 = pmov %p9368_p8 }
  0xb0   : > { %6207 = dma.done.wait (%p9369_p13), [#allocation10], 1024  }
  0xb1   : > { %6209 = vsyncadd (%p9370_p6), [#allocation10], 4294966272  ;;  %v542_v0 = vld [vmem:[%s6552_s18] sm:$0xff]  ;;  %v544_v1 = vld [vmem:[%s6552_s18 + $0x10] sm:$0xff]  ;;  %s9371_s4 = sld [smem:[#allocation74_spill]]  ;;  %s9372_s2 = sld [smem:[#allocation72_spill]] }
  0xb2   : > { %558 = vadd.xlane.f32.xlu0 %v542_v0  ;;  %562 = vadd.xlane.f32.xlu1 %v544_v1  ;;  %v543_v2 = vld [vmem:[%s6552_s18 + $0x8] sm:$0xff]  ;;  %v545_v3 = vld [vmem:[%s6552_s18 + $0x18] sm:$0xff]  ;;  %v546_v4 = vld [vmem:[%s6552_s18 + $0x20] sm:$0xff]  ;;  %s9373_s3 = sld [smem:[#allocation73_spill]]  ;;  %s9374_s9 = sld [smem:[#allocation78_spill]]  ;;  %vm6244_vm0 = vmmov 0  }
  0xb3   : > { %v547_v5 = vld [vmem:[%s6552_s18 + $0x28] sm:$0xff]  ;;  %v548_v6 = vld [vmem:[%s6552_s18 + $0x30] sm:$0xff]  ;;  %v549_v7 = vld [vmem:[%s6552_s18 + $0x38] sm:$0xff]  ;;  %s9375_s19 = sld [smem:[#allocation75_spill]]  ;;  %s9376_s13 = sld [smem:[#allocation77_spill]]  ;;  %vm1462_vm1 = vcmask 261120  }
  0xb4   : > { %v6575_v8 = vld [vmem:[%s6552_s18 + $0x40] sm:$0xff]  ;;  %v6578_v9 = vld [vmem:[%s6552_s18 + $0x48] sm:$0xff]  ;;  %v6581_v10 = vld [vmem:[%s6552_s18 + $0x50] sm:$0xff]  ;;  %s9392_s20 = sld [smem:[#allocation79_spill]]  ;;  %s9288_s27 = smov 257  }
  0xb5   : > { %v6584_v11 = vld [vmem:[%s6552_s18 + $0x58] sm:$0xff]  ;;  %v6589_v12 = vld [vmem:[%s6552_s18 + $0x60] sm:$0xff]  ;;  %v6592_v13 = vld [vmem:[%s6552_s18 + $0x68] sm:$0xff]  ;;  %s9286_s24 = smov 265   ;;  %s9284_s5 = smov 273  }
  0xb6   : > { %560 = vadd.xlane.f32.xlu0 %v543_v2  ;;  %564 = vadd.xlane.f32.xlu1 %v545_v3  ;;  %v6597_v14 = vld [vmem:[%s6552_s18 + $0x70] sm:$0xff]  ;;  %v6602_v15 = vld [vmem:[%s6552_s18 + $0x78] sm:$0xff]  ;;  %s9282_s8 = smov 281   ;;  %s9280_s29 = smov 289  }
  0xb7   : > { %v5658_v16 = vld [vmem:[%s9371_s4 + $0x4] ss:$8 sps:$4 sm:$0xff]   ;;  %v5660_v17 = vld [vmem:[%s9371_s4] ss:$8 sps:$4 sm:$0xff]   ;;  %v5661_v18 = vld [vmem:[%s9371_s4 + $0x14] ss:$8 sps:$4 sm:$0xff]  }
  0xb8   : > { %937 = vmatprep.subr.bf16.mxu0 %v5658_v16  ;;  %v5663_v57 = vld [vmem:[%s9371_s4 + $0x10] ss:$8 sps:$4 sm:$0xff]   ;;  %v5664_v63 = vld [vmem:[%s9371_s4 + $0x24] ss:$8 sps:$4 sm:$0xff]   ;;  %v5667_v16 = vld [vmem:[%s9371_s4 + $0x34] ss:$8 sps:$4 sm:$0xff]  }
  0xb9   : > { %938 = vmatpush1.bf16.msra.mxu0 %v5660_v17  ;;  %s9276_s21 = smov 305   ;;  %s9274_s25 = smov 313  }
  0xba   : > { %566 = vadd.xlane.f32.xlu0 %v546_v4  ;;  %568 = vadd.xlane.f32.xlu1 %v547_v5  ;;  %s9197_s23 = smov 329   ;;  %s9199_s26 = smov 337  }
  0xbb   : > { %939 = vmatprep.subr.bf16.mxu0 %v5661_v18  ;;  %s9201_s28 = smov 345   ;;  %s9427_s0 = smov 96  }
  0xbc   : > { %s9487_s6 = smov 257   ;;  %s9488_s1 = smov 265  }
  0xbd   : > { %940 = vmatpush1.bf16.msra.mxu0 %v5663_v57  ;;  %s6263_s15 = smov 32  }
  0xbe   : > { %570 = vadd.xlane.f32.xlu0 %v548_v6  ;;  %572 = vadd.xlane.f32.xlu1 %v549_v7 }
  0xbf   : > { %941 = vmatprep.subr.bf16.mxu0 %v5664_v63 }
  0xc2   : > { %574 = vadd.xlane.f32.xlu0 %v6575_v8  ;;  %576 = vadd.xlane.f32.xlu1 %v6578_v9 }
  0xc6   : > { %578 = vadd.xlane.f32.xlu0 %v6581_v10  ;;  %580 = vadd.xlane.f32.xlu1 %v6584_v11 }
  0xca   : > { %582 = vadd.xlane.f32.xlu0 %v6589_v12  ;;  %584 = vadd.xlane.f32.xlu1 %v6592_v13 }
  0xce   : > { %586 = vadd.xlane.f32.xlu0 %v6597_v14  ;;  %588 = vadd.xlane.f32.xlu1 %v6602_v15 }
 0x13f   : > { %v559_v19 = vpop.xlane.xlu0 %558  ;;  %v563_v20 = vpop.xlane.xlu1 %562 }
 0x140   : > { %v591_v21 = vmul.f32 0.0078125, %v559_v19  ;;  %v593_v22 = vmul.f32 0.0078125, %v563_v20  ;;  %v5669_v19 = vld [vmem:[%s9371_s4 + $0x30] ss:$8 sps:$4 sm:$0xff]  }
 0x142   : > { %v6615_v23 = vsub.f32 %v542_v0, %v591_v21  ;;  %v6617_v24 = vsub.f32 %v544_v1, %v593_v22 }
 0x143   : > { %v561_v25 = vpop.xlane.xlu0 %560  ;;  %v565_v26 = vpop.xlane.xlu1 %564 }
 0x144   : > { %v592_v27 = vmul.f32 0.0078125, %v561_v25  ;;  %v623_v28 = vmul.f32 %v6615_v23, %v6615_v23  ;;  %v594_v29 = vmul.f32 0.0078125, %v565_v26  ;;  %v625_v30 = vmul.f32 %v6617_v24, %v6617_v24  ;;  %v5670_v26 = vld [vmem:[%s9371_s4 + $0x44] ss:$8 sps:$4 sm:$0xff]  }
 0x146   : > { %639 = vadd.xlane.f32.xlu0 %v623_v28  ;;  %v6623_v31 = vsub.f32 %v543_v2, %v592_v27  ;;  %v6625_v32 = vsub.f32 %v545_v3, %v594_v29  ;;  %v5672_v27 = vld [vmem:[%s9371_s4 + $0x40] ss:$8 sps:$4 sm:$0xff]   ;;  %v5675_v29 = vld [vmem:[%s9371_s4 + $0x50] ss:$8 sps:$4 sm:$0xff]  }
 0x147   : > { %v567_v33 = vpop.xlane.xlu0 %566  ;;  %v569_v34 = vpop.xlane.xlu1 %568 }
 0x148   : > { %v595_v35 = vmul.f32 0.0078125, %v567_v33  ;;  %v624_v36 = vmul.f32 %v6623_v31, %v6623_v31  ;;  %v596_v37 = vmul.f32 0.0078125, %v569_v34  ;;  %v626_v38 = vmul.f32 %v6625_v32, %v6625_v32  ;;  %v5678_v33 = vld [vmem:[%s9371_s4 + $0x60] ss:$8 sps:$4 sm:$0xff]   ;;  %v5679_v34 = vld [vmem:[%s9371_s4 + $0x74] ss:$8 sps:$4 sm:$0xff]  }
 0x14a   : > { %643 = vadd.xlane.f32.xlu0 %v625_v30  ;;  %641 = vadd.xlane.f32.xlu1 %v624_v36  ;;  %v6631_v39 = vsub.f32 %v546_v4, %v595_v35  ;;  %v6633_v40 = vsub.f32 %v547_v5, %v596_v37  ;;  %v5666_v5 = vld [vmem:[%s9371_s4 + $0x20] ss:$8 sps:$4 sm:$0xff]   ;;  %v5676_v30 = vld [vmem:[%s9371_s4 + $0x64] ss:$8 sps:$4 sm:$0xff]   ;;  %v5681_v35 = vld [vmem:[%s9371_s4 + $0x70] ss:$8 sps:$4 sm:$0xff]  }
 0x14b   : > { %v571_v41 = vpop.xlane.xlu0 %570  ;;  %v573_v42 = vpop.xlane.xlu1 %572  ;;  %942 = vmatpush1.bf16.msra.mxu0 %v5666_v5  ;;  %v9205_v36 = vmov 0  }
 0x14c   : > { %v597_v43 = vmul.f32 0.0078125, %v571_v41  ;;  %v627_v44 = vmul.f32 %v6631_v39, %v6631_v39  ;;  %v598_v45 = vmul.f32 0.0078125, %v573_v42  ;;  %v628_v46 = vmul.f32 %v6633_v40, %v6633_v40  ;;  %943 = vmatprep.subr.bf16.mxu0 %v5667_v16  ;;  %969 = vmatprep.mubr.bf16.mxu0 %v9205_v36 }
 0x14d   : > { %5656 = vset.pattern.permute.xlu1 %v9205_v36 }
 0x14e   : > { %645 = vadd.xlane.f32.xlu1 %v626_v38  ;;  %647 = vadd.xlane.f32.xlu0 %v627_v44  ;;  %v6639_v47 = vsub.f32 %v548_v6, %v597_v43  ;;  %v6641_v48 = vsub.f32 %v549_v7, %v598_v45 }
 0x14f   : > { %v575_v49 = vpop.xlane.xlu0 %574  ;;  %v577_v50 = vpop.xlane.xlu1 %576  ;;  %944 = vmatpush1.bf16.msra.mxu0 %v5669_v19 }
 0x150   : > { %v599_v51 = vmul.f32 0.0078125, %v575_v49  ;;  %v629_v52 = vmul.f32 %v6639_v47, %v6639_v47  ;;  %v600_v53 = vmul.f32 0.0078125, %v577_v50  ;;  %v630_v54 = vmul.f32 %v6641_v48, %v6641_v48  ;;  %945 = vmatprep.subr.bf16.mxu0 %v5670_v26 }
 0x152   : > { %649 = vadd.xlane.f32.xlu1 %v628_v46  ;;  %651 = vadd.xlane.f32.xlu0 %v629_v52  ;;  %v6648_v55 = vsub.f32 %v6575_v8, %v599_v51  ;;  %v6651_v56 = vsub.f32 %v6578_v9, %v600_v53 }
 0x153   : > { %v579_v58 = vpop.xlane.xlu0 %578  ;;  %v581_v59 = vpop.xlane.xlu1 %580  ;;  %946 = vmatpush1.bf16.msra.mxu0 %v5672_v27 }
 0x154   : > { %v601_v60 = vmul.f32 0.0078125, %v579_v58  ;;  %v631_v61 = vmul.f32 %v6648_v55, %v6648_v55  ;;  %v602_v62 = vmul.f32 0.0078125, %v581_v59  ;;  %v632_v0 = vmul.f32 %v6651_v56, %v6651_v56 }
 0x156   : > { %653 = vadd.xlane.f32.xlu1 %v630_v54  ;;  %655 = vadd.xlane.f32.xlu0 %v631_v61  ;;  %v6664_v1 = vsub.f32 %v6581_v10, %v601_v60  ;;  %v6667_v2 = vsub.f32 %v6584_v11, %v602_v62 }
 0x157   : > { %v583_v3 = vpop.xlane.xlu0 %582  ;;  %v585_v4 = vpop.xlane.xlu1 %584 }
 0x158   : > { %v603_v6 = vmul.f32 0.0078125, %v583_v3  ;;  %v633_v7 = vmul.f32 %v6664_v1, %v6664_v1  ;;  %v604_v8 = vmul.f32 0.0078125, %v585_v4  ;;  %v634_v9 = vmul.f32 %v6667_v2, %v6667_v2 }
 0x15a   : > { %657 = vadd.xlane.f32.xlu1 %v632_v0  ;;  %659 = vadd.xlane.f32.xlu0 %v633_v7  ;;  %v6677_v10 = vsub.f32 %v6589_v12, %v603_v6  ;;  %v6680_v11 = vsub.f32 %v6592_v13, %v604_v8  ;;  %v6731_v0 = vld [vmem:[%s9372_s2] ss:$0 sm:$0xff]  ;;  %s9489_s2 = smov 273  }
 0x15b   : > { %v587_v17 = vpop.xlane.xlu0 %586  ;;  %v589_v18 = vpop.xlane.xlu1 %588  ;;  %v6737_v6 = vld [vmem:[%s9373_s3] ss:$0 sm:$0xff]  ;;  %s9301_s3 = smov 64  }
 0x15c   : > { %v605_v20 = vmul.f32 0.0078125, %v587_v17  ;;  %v635_v21 = vmul.f32 %v6677_v10, %v6677_v10  ;;  %v606_v22 = vmul.f32 0.0078125, %v589_v18  ;;  %v636_v12 = vmul.f32 %v6680_v11, %v6680_v11 }
 0x15e   : > { %661 = vadd.xlane.f32.xlu1 %v634_v9  ;;  %663 = vadd.xlane.f32.xlu0 %v635_v21  ;;  %v6693_v13 = vsub.f32 %v6597_v14, %v605_v20  ;;  %v6696_v25 = vsub.f32 %v6602_v15, %v606_v22  ;;  %v5673_v15 = vld [vmem:[%s9371_s4 + $0x54] ss:$8 sps:$4 sm:$0xff]   ;;  %s9490_s4 = smov 281  }
 0x15f   : > { %947 = vmatprep.subr.bf16.mxu0 %v5673_v15 }
 0x160   : > { %v637_v28 = vmul.f32 %v6693_v13, %v6693_v13  ;;  %v638_v14 = vmul.f32 %v6696_v25, %v6696_v25  ;;  %948 = vmatpush1.bf16.msra.mxu0 %v5675_v29 }
 0x161   : > { %949 = vmatprep.subr.bf16.mxu0 %v5676_v30 }
 0x162   : > { %665 = vadd.xlane.f32.xlu1 %v636_v12  ;;  %667 = vadd.xlane.f32.xlu0 %v637_v28 }
 0x164   : > { %950 = vmatpush1.bf16.msra.mxu0 %v5678_v33 }
 0x165   : > { %951 = vmatprep.subr.bf16.mxu0 %v5679_v34 }
 0x166   : > { %669 = vadd.xlane.f32.xlu1 %v638_v14 }
 0x168   : > { %952 = vmatpush1.bf16.msra.mxu0 %v5681_v35 }
 0x1d3   : > { %v640_v37 = vpop.xlane.xlu0 %639 }
 0x1d4   : > { %v671_v38 = vmul.f32 0.0078125, %v640_v37 }
 0x1d6   : > { %v687_v41 = vadd.f32 1e-05, %v671_v38 }
 0x1d7   : > { %v642_v42 = vpop.xlane.xlu1 %641  ;;  %v644_v43 = vpop.xlane.xlu0 %643 }
 0x1d8   : > { %5706 = vrsqrt.f32 %v687_v41  ;;  %v672_v44 = vmul.f32 0.0078125, %v642_v42  ;;  %v673_v45 = vmul.f32 0.0078125, %v644_v43 }
 0x1da   : > { %v688_v46 = vadd.f32 1e-05, %v672_v44  ;;  %v689_v49 = vadd.f32 1e-05, %v673_v45 }
 0x1db   : > { %v646_v50 = vpop.xlane.xlu1 %645  ;;  %v648_v51 = vpop.xlane.xlu0 %647 }
 0x1dc   : > { %5708 = vrsqrt.f32 %v688_v46  ;;  %v674_v52 = vmul.f32 0.0078125, %v646_v50  ;;  %v675_v53 = vmul.f32 0.0078125, %v648_v51 }
 0x1dd   : > { %5710 = vrsqrt.f32 %v689_v49 }
 0x1de   : > { %v690_v54 = vadd.f32 1e-05, %v674_v52  ;;  %v691_v57 = vadd.f32 1e-05, %v675_v53 }
 0x1df   : > { %v650_v58 = vpop.xlane.xlu1 %649  ;;  %v652_v59 = vpop.xlane.xlu0 %651 }
 0x1e0   : > { %5712 = vrsqrt.f32 %v690_v54  ;;  %v676_v60 = vmul.f32 0.0078125, %v650_v58  ;;  %v677_v63 = vmul.f32 0.0078125, %v652_v59 }
 0x1e1   : > { %5714 = vrsqrt.f32 %v691_v57 }
 0x1e2   : > { %v5707_v61 = vpop.eup %5706  ;;  %v692_v62 = vadd.f32 1e-05, %v676_v60  ;;  %v693_v9 = vadd.f32 1e-05, %v677_v63 }
 0x1e3   : > { %v654_v3 = vpop.xlane.xlu1 %653  ;;  %v719_v4 = vmul.f32 %v5707_v61, %v6615_v23  ;;  %v656_v17 = vpop.xlane.xlu0 %655 }
 0x1e4   : > { %5716 = vrsqrt.f32 %v692_v62  ;;  %v678_v5 = vmul.f32 0.0078125, %v654_v3  ;;  %v679_v26 = vmul.f32 0.0078125, %v656_v17 }
 0x1e5   : > { %v742_v7 = vmul.f32 %v6731_v0, %v719_v4  ;;  %5718 = vrsqrt.f32 %v693_v9 }
 0x1e6   : > { %v5709_v8 = vpop.eup %5708  ;;  %v694_v20 = vadd.f32 1e-05, %v678_v5  ;;  %v695_v33 = vadd.f32 1e-05, %v679_v26 }
 0x1e7   : > { %v5711_v16 = vpop.eup %5710  ;;  %v720_v18 = vmul.f32 %v5709_v8, %v6623_v31  ;;  %v765_v19 = vadd.f32 %v6737_v6, %v742_v7  ;;  %v658_v21 = vpop.xlane.xlu1 %657 }
 0x1e8   : > { %v721_v23 = vmul.f32 %v5711_v16, %v6617_v24  ;;  %5720 = vrsqrt.f32 %v694_v20  ;;  %v680_v31 = vmul.f32 0.0078125, %v658_v21  ;;  %v660_v34 = vpop.xlane.xlu0 %659 }
 0x1e9   : > { %v743_v22 = vmul.f32 %v6731_v0, %v720_v18  ;;  %789 = vxpose.xlu0.b32.start [1/16] %v765_v19, 128  ;;  %5722 = vrsqrt.f32 %v695_v33  ;;  %v681_v43 = vmul.f32 0.0078125, %v660_v34 }
 0x1ea   : > { %v5713_v12 = vpop.eup %5712  ;;  %v744_v28 = vmul.f32 %v6731_v0, %v721_v23  ;;  %v696_v38 = vadd.f32 1e-05, %v680_v31 }
 0x1eb   : > { %v766_v27 = vadd.f32 %v6737_v6, %v743_v22  ;;  %v722_v14 = vmul.f32 %v5713_v12, %v6625_v32  ;;  %v5715_v15 = vpop.eup %5714  ;;  %v662_v41 = vpop.xlane.xlu1 %661  ;;  %v697_v51 = vadd.f32 1e-05, %v681_v43 }
 0x1ec   : > { %v767_v35 = vadd.f32 %v6737_v6, %v744_v28  ;;  %v723_v37 = vmul.f32 %v5715_v15, %v6631_v39  ;;  %5724 = vrsqrt.f32 %v696_v38  ;;  %v682_v46 = vmul.f32 0.0078125, %v662_v41  ;;  %v664_v52 = vpop.xlane.xlu0 %663 }
 0x1ed   : > { %v781_v29 = vpack.c.bf16 %v766_v27, %v765_v19  ;;  %790 = vxpose.xlu0.b32.cont [2/16] %v766_v27, 128  ;;  %v745_v24 = vmul.f32 %v6731_v0, %v722_v14  ;;  %5726 = vrsqrt.f32 %v697_v51  ;;  %v683_v60 = vmul.f32 0.0078125, %v664_v52  ;;  %v5682_v51 = vld [vmem:[#allocation8] sm:$0xff]  }
 0x1ee   : > { %v5717_v30 = vpop.eup %5716  ;;  %v746_v44 = vmul.f32 %v6731_v0, %v723_v37  ;;  %5349 = vmatprep.mubr.bf16.mxu1 %v5682_v51 }
 0x1ef   : > { %970 = vmatmul.mubr.bf16.vlgmr.msra.gmra.mrb[0].mxu0 %v781_v29  ;;  %v768_v32 = vadd.f32 %v6737_v6, %v745_v24  ;;  %v724_v42 = vmul.f32 %v5717_v30, %v6633_v40  ;;  %v5719_v45 = vpop.eup %5718  ;;  %v698_v40 = vadd.f32 1e-05, %v682_v46  ;;  %v666_v57 = vpop.xlane.xlu1 %665  ;;  %v699_v5 = vadd.f32 1e-05, %v683_v60 }
 0x1f0   : > { %979 = vmatprep.mubr.bf16.mxu0 %v9205_v36  ;;  %v769_v53 = vadd.f32 %v6737_v6, %v746_v44  ;;  %v725_v54 = vmul.f32 %v5719_v45, %v6639_v47  ;;  %v684_v63 = vmul.f32 0.0078125, %v666_v57  ;;  %v668_v7 = vpop.xlane.xlu0 %667 }
 0x1f1   : > { %791 = vxpose.xlu0.b32.cont [3/16] %v767_v35, 128  ;;  %v782_v49 = vpack.c.bf16 %v768_v32, %v767_v35  ;;  %v747_v39 = vmul.f32 %v6731_v0, %v724_v42  ;;  %5728 = vrsqrt.f32 %v698_v40  ;;  %v685_v19 = vmul.f32 0.0078125, %v668_v7  ;;  %v1084_v40 = vld [vmem:[%s9180_s7 + $0x10] sm:$0xff] }
 0x1f2   : > { %v5721_v50 = vpop.eup %5720  ;;  %v748_v61 = vmul.f32 %v6731_v0, %v725_v54  ;;  %5730 = vrsqrt.f32 %v699_v5 }
 0x1f3   : > { %v770_v58 = vadd.f32 %v6737_v6, %v747_v39  ;;  %v726_v59 = vmul.f32 %v5721_v50, %v6641_v48  ;;  %v5723_v62 = vpop.eup %5722  ;;  %v700_v48 = vadd.f32 1e-05, %v684_v63  ;;  %v670_v16 = vpop.xlane.xlu1 %669  ;;  %v701_v26 = vadd.f32 1e-05, %v685_v19 }
 0x1f4   : > { %v771_v8 = vadd.f32 %v6737_v6, %v748_v61  ;;  %v727_v9 = vmul.f32 %v5723_v62, %v6648_v55  ;;  %v686_v21 = vmul.f32 0.0078125, %v670_v16  ;;  %v1396_v61 = vld [vmem:[%s9374_s9] sm:$0xff]  ;;  %s9492_s9 = smov 64  }
 0x1f5   : > { %792 = vxpose.xlu0.b32.cont [4/16] %v768_v32, 128  ;;  %v783_v3 = vpack.c.bf16 %v770_v58, %v769_v53  ;;  %v749_v47 = vmul.f32 %v6731_v0, %v726_v59  ;;  %5732 = vrsqrt.f32 %v700_v48  ;;  %v1085_v59 = vld [vmem:[%s9180_s7 + $0x18] sm:$0xff] }
 0x1f6   : > { %v5725_v4 = vpop.eup %5724  ;;  %v750_v20 = vmul.f32 %v6731_v0, %v727_v9  ;;  %v702_v14 = vadd.f32 1e-05, %v686_v21  ;;  %5734 = vrsqrt.f32 %v701_v26  ;;  %v5685_v26 = vld [vmem:[#allocation8 + $0x18] sm:$0xff]  }
 0x1f7   : > { %980 = vmatmul.mubr.bf16.gmra.mrb[4].mxu0 %v782_v49  ;;  %v772_v17 = vadd.f32 %v6737_v6, %v749_v47  ;;  %v728_v18 = vmul.f32 %v5725_v4, %v6651_v56  ;;  %v5727_v23 = vpop.eup %5726 }
 0x1f8   : > { %989 = vmatprep.mubr.bf16.mxu0 %v9205_v36  ;;  %v773_v27 = vadd.f32 %v6737_v6, %v750_v20  ;;  %v729_v28 = vmul.f32 %v5727_v23, %v6664_v1  ;;  %5736 = vrsqrt.f32 %v702_v14 }
 0x1f9   : > { %793 = vxpose.xlu0.b32.cont [5/16] %v769_v53, 128  ;;  %v784_v22 = vpack.c.bf16 %v772_v17, %v771_v8  ;;  %v751_v55 = vmul.f32 %v6731_v0, %v728_v18 }
 0x1fa   : > { %v752_v31 = vmul.f32 %v6731_v0, %v729_v28  ;;  %v847_v28 = vlaneseq }
 0x1fb   : > { %v5729_v12 = vpop.eup %5728  ;;  %v774_v56 = vadd.f32 %v6737_v6, %v751_v55  ;;  %v5684_v55 = vld [vmem:[#allocation8 + $0x10] sm:$0xff]  }
 0x1fc   : > { %v730_v15 = vmul.f32 %v5729_v12, %v6667_v2  ;;  %v5731_v29 = vpop.eup %5730  ;;  %v775_v1 = vadd.f32 %v6737_v6, %v752_v31  ;;  %v6243_v12 = vmov 0.0   ;;  %v6810_v14 = vshrl.u32 %v847_v28, 7 }
 0x1fd   : > { %794 = vxpose.xlu0.b32.cont [6/16] %v770_v58, 128  ;;  %v785_v24 = vpack.c.bf16 %v774_v56, %v773_v27  ;;  %v731_v34 = vmul.f32 %v5731_v29, %v6677_v10  ;;  %v845_v29 = vld [vmem:[%s9375_s19] sm:$0x3]  ;;  %s9278_s19 = smov 297  }
 0x1fe   : > { %v753_v30 = vmul.f32 %v6731_v0, %v730_v15  ;;  %v5688_v15 = vld [vmem:[#allocation8 + $0x30] sm:$0xff]   ;;  %v6813_v31 = vsub.s32 0, %v6810_v14  ;;  %vm1720_vm2 = vcmp.lt.s32.totalorder %v6810_v14, 7 }
 0x1ff   : > { %990 = vmatmul.mubr.bf16.gmra.mrb[8].mxu0 %v783_v3  ;;  %v5733_v33 = vpop.eup %5732  ;;  %v754_v37 = vmul.f32 %v6731_v0, %v731_v34 }
 0x200   : > { %999 = vmatprep.mubr.bf16.mxu0 %v9205_v36  ;;  %v776_v2 = vadd.f32 %v6737_v6, %v753_v30  ;;  %v732_v35 = vmul.f32 %v5733_v33, %v6680_v11  ;;  %v5735_v38 = vpop.eup %5734  ;;  %v6822_v30 = vrot.slane %v845_v29, %v6813_v31  ;;  %v5689_v33 = vld [vmem:[#allocation8 + $0x38] sm:$0xff]  }
 0x201   : > { %795 = vxpose.xlu0.b32.cont [7/16] %v771_v8, 128  ;;  %v777_v43 = vadd.f32 %v6737_v6, %v754_v37  ;;  %v733_v10 = vmul.f32 %v5735_v38, %v6693_v13 }
 0x202   : > { %v786_v41 = vpack.c.bf16 %v776_v2, %v775_v1  ;;  %v755_v32 = vmul.f32 %v6731_v0, %v732_v35  ;;  %v5737_v42 = vpop.eup %5736 }
 0x203   : > { %v734_v11 = vmul.f32 %v5737_v42, %v6696_v25  ;;  %v756_v45 = vmul.f32 %v6731_v0, %v733_v10 }
 0x204   : > { %v778_v44 = vadd.f32 %v6737_v6, %v755_v32 }
 0x205   : > { %796 = vxpose.xlu0.b32.cont [8/16] %v772_v17, 128  ;;  %v757_v49 = vmul.f32 %v6731_v0, %v734_v11  ;;  %v779_v39 = vadd.f32 %v6737_v6, %v756_v45  ;;  %v1082_v0 = vld [vmem:[%s9180_s7] sm:$0xff] }
 0x206   : > { %v787_v46 = vpack.c.bf16 %v778_v44, %v777_v43  ;;  %1100 = vperm.xlu1 %5656, %v1082_v0  }
 0x207   : > { %1000 = vmatmul.mubr.bf16.gmra.mrb[12].mxu0 %v784_v22  ;;  %v780_v13 = vadd.f32 %v6737_v6, %v757_v49  ;;  %v1083_v6 = vld [vmem:[%s9180_s7 + $0x8] sm:$0xff] }
 0x208   : > { %1009 = vmatprep.mubr.bf16.mxu0 %v9205_v36  ;;  %v5683_v22 = vld [vmem:[#allocation8 + $0x8] sm:$0xff]  }
 0x209   : > { %797 = vxpose.xlu0.b32.cont [9/16] %v773_v27, 128  ;;  %v788_v50 = vpack.c.bf16 %v780_v13, %v779_v39  ;;  %v5686_v27 = vld [vmem:[#allocation8 + $0x20] sm:$0xff]  }
 0x20a   : > { %1105 = vperm.xlu1 %5656, %v1083_v6  }
 0x20d   : > { %798 = vxpose.xlu0.b32.cont [10/16] %v774_v56, 128  ;;  %v5687_v56 = vld [vmem:[#allocation8 + $0x28] sm:$0xff]  }
 0x20e   : > { %1110 = vperm.xlu1 %5656, %v1084_v40  }
 0x20f   : > { %1010 = vmatmul.mubr.bf16.gmra.mrb[16].mxu0 %v785_v24  ;;  %v6819_v24 = vsub.s32 1, %v6810_v14 }
 0x210   : > { %1019 = vmatprep.mubr.bf16.mxu0 %v9205_v36 }
 0x211   : > { %799 = vxpose.xlu0.b32.cont [11/16] %v775_v1, 128  ;;  %v6825_v34 = vrot.slane %v845_v29, %v6819_v24 }
 0x212   : > { %1115 = vperm.xlu1 %5656, %v1085_v59  }
 0x215   : > { %800 = vxpose.xlu0.b32.cont [12/16] %v776_v2, 128 }
 0x216   : > { %1399 = vperm.xlu1 %5656, %v1396_v61  }
 0x217   : > { %1020 = vmatmul.mubr.bf16.gmra.mrb[20].mxu0 %v786_v41 }
 0x218   : > { %1029 = vmatprep.mubr.bf16.mxu0 %v9205_v36 }
 0x219   : > { %801 = vxpose.xlu0.b32.cont [13/16] %v777_v43, 128 }
 0x21d   : > { %802 = vxpose.xlu0.b32.cont [14/16] %v778_v44, 128  ;;  %v1395_v44 = vld [vmem:[%s9376_s13] sm:$0xf]  ;;  %s9272_s13 = smov 321  }
 0x21f   : > { %1030 = vmatmul.mubr.bf16.gmra.mrb[24].mxu0 %v787_v46 }
 0x220   : > { %1039 = vmatprep.mubr.bf16.mxu0 %v9205_v36 }
 0x221   : > { %803 = vxpose.xlu0.b32.cont [15/16] %v779_v39, 128 }
 0x225   : > { %804 = vxpose.xlu0.b32.end [16/16] %v780_v13, 128 }
 0x227   : > { %1040 = vmatmul.mubr.bf16.gmra.mrb[28].mxu0 %v788_v50 }
 0x24e   : > { %5657 = vset.pattern.permute.xlu0 %v9205_v36 }
 0x269   : > { %v805_v25 = vpop.trf.xlu0 }
 0x26d   : > { %v806_v52 = vpop.trf.xlu0 }
 0x26e   : > { %v821_v53 = vpack.c.bf16 %v806_v52, %v805_v25 }
 0x270   : > { %5333 = vmatprep.subr.bf16.mxu1 %v821_v53 }
 0x271   : > { %5334 = vmatpush3.bf16.msra.mxu1 %v821_v53  ;;  %v807_v54 = vpop.trf.xlu0 }
 0x275   : > { %v808_v57 = vpop.trf.xlu0 }
 0x276   : > { %v822_v58 = vpack.c.bf16 %v808_v57, %v807_v54 }
 0x278   : > { %5335 = vmatprep.subr.bf16.mxu1 %v822_v58 }
 0x279   : > { %5336 = vmatpush3.bf16.msra.mxu1 %v822_v58  ;;  %v809_v60 = vpop.trf.xlu0 }
 0x27d   : > { %v810_v62 = vpop.trf.xlu0 }
 0x27e   : > { %v823_v63 = vpack.c.bf16 %v810_v62, %v809_v60 }
 0x280   : > { %5337 = vmatprep.subr.bf16.mxu1 %v823_v63 }
 0x281   : > { %5338 = vmatpush3.bf16.msra.mxu1 %v823_v63  ;;  %v811_v3 = vpop.trf.xlu0 }
 0x285   : > { %v812_v47 = vpop.trf.xlu0 }
 0x286   : > { %v824_v4 = vpack.c.bf16 %v812_v47, %v811_v3 }
 0x288   : > { %5339 = vmatprep.subr.bf16.mxu1 %v824_v4 }
 0x289   : > { %5340 = vmatpush3.bf16.msra.mxu1 %v824_v4  ;;  %v813_v5 = vpop.trf.xlu0 }
 0x28d   : > { %v814_v7 = vpop.trf.xlu0 }
 0x28e   : > { %v825_v8 = vpack.c.bf16 %v814_v7, %v813_v5 }
 0x290   : > { %5341 = vmatprep.subr.bf16.mxu1 %v825_v8 }
 0x291   : > { %5342 = vmatpush3.bf16.msra.mxu1 %v825_v8  ;;  %v815_v9 = vpop.trf.xlu0 }
 0x295   : > { %v816_v48 = vpop.trf.xlu0 }
 0x296   : > { %v826_v16 = vpack.c.bf16 %v816_v48, %v815_v9 }
 0x298   : > { %5343 = vmatprep.subr.bf16.mxu1 %v826_v16 }
 0x299   : > { %5344 = vmatpush3.bf16.msra.mxu1 %v826_v16  ;;  %v817_v17 = vpop.trf.xlu0 }
 0x29d   : > { %v818_v18 = vpop.trf.xlu0 }
 0x29e   : > { %v827_v19 = vpack.c.bf16 %v818_v18, %v817_v17 }
 0x2a0   : > { %5345 = vmatprep.subr.bf16.mxu1 %v827_v19 }
 0x2a1   : > { %5346 = vmatpush3.bf16.msra.mxu1 %v827_v19  ;;  %v819_v20 = vpop.trf.xlu0 }
 0x2a5   : > { %v820_v23 = vpop.trf.xlu0 }
 0x2a6   : > { %v828_v21 = vpack.c.bf16 %v820_v23, %v819_v20 }
 0x2a8   : > { %5347 = vmatprep.subr.bf16.mxu1 %v828_v21 }
 0x2a9   : > { %5348 = vmatpush3.bf16.msra.mxu1 %v828_v21 }
 0x2aa   : > { %5365 = vmatprep.subr.bf16.mxu1 %v6243_v12 }
 0x2ac   : > { %5350 = vmatmul.mubr.bf16.vlgmr.msra.gmra.mrb[0].mxu1 %v5683_v22 }
 0x2ad   : > { %5366 = vmatpush3.bf16.msra.mxu1 %v821_v53  ;;  %5353 = vmatprep.mubr.bf16.mxu1 %v5684_v55 }
 0x2ae   : > { %5367 = vmatprep.subr.bf16.mxu1 %v6243_v12 }
 0x2b1   : > { %5368 = vmatpush3.bf16.msra.mxu1 %v822_v58 }
 0x2b2   : > { %5369 = vmatprep.subr.bf16.mxu1 %v6243_v12 }
 0x2b4   : > { %5354 = vmatmul.mubr.bf16.gmra.mrb[4].mxu1 %v5685_v26 }
 0x2b5   : > { %5370 = vmatpush3.bf16.msra.mxu1 %v823_v63  ;;  %5357 = vmatprep.mubr.bf16.mxu1 %v5686_v27 }
 0x2b6   : > { %5371 = vmatprep.subr.bf16.mxu1 %v6243_v12 }
 0x2b9   : > { %5372 = vmatpush3.bf16.msra.mxu1 %v824_v4 }
 0x2ba   : > { %5373 = vmatprep.subr.bf16.mxu1 %v6243_v12 }
 0x2bc   : > { %5358 = vmatmul.mubr.bf16.gmra.mrb[8].mxu1 %v5687_v56 }
 0x2bd   : > { %5374 = vmatpush3.bf16.msra.mxu1 %v825_v8  ;;  %5361 = vmatprep.mubr.bf16.mxu1 %v5688_v15 }
 0x2be   : > { %5375 = vmatprep.subr.bf16.mxu1 %v6243_v12 }
 0x2c1   : > { %5376 = vmatpush3.bf16.msra.mxu1 %v826_v16 }
 0x2c2   : > { %v971_v1 = vpop.f32.mrb[0].mxu0  ;;  %5377 = vmatprep.subr.bf16.mxu1 %v6243_v12 }
 0x2c3   : > { %v972_v2 = vadd.f32 %v971_v1, %v6822_v30  ;;  %v973_v35 = vpop.f32.mrb[1].mxu0 }
 0x2c4   : > { %v975_v37 = vpop.f32.mrb[2].mxu0  ;;  %5362 = vmatmul.mubr.bf16.gmra.mrb[12].mxu1 %v5689_v33  ;;  %v974_v32 = vadd.f32 %v973_v35, %v6825_v34 }
 0x2c5   : > { %v976_v38 = vadd.f32 %v975_v37, %v6822_v30  ;;  %v977_v41 = vpop.f32.mrb[3].mxu0  ;;  %5378 = vmatpush3.bf16.msra.mxu1 %v827_v19  ;;  %5381 = vmatprep.mubr.msk.bf16.mxu1 %vm6244_vm0, %v6243_v12 }
 0x2c6   : > { %v978_v42 = vadd.f32 %v977_v41, %v6825_v34  ;;  %5379 = vmatprep.subr.bf16.mxu1 %v6243_v12 }
 0x2c7   : > { %v6831_v43 = vpack.c.bf16 %v976_v38, %v972_v2 }
 0x2c8   : > { %v6833_v10 = vpack.c.bf16 %v978_v42, %v974_v32 }
 0x2c9   : > { %5380 = vmatpush3.bf16.msra.mxu1 %v828_v21 }
 0x2ca   : > { %v981_v11 = vpop.f32.mrb[4].mxu0  ;;  %5385 = vmatprep.subr.bf16.mxu0 %v6833_v10 }
 0x2cb   : > { %v982_v45 = vadd.f32 %v981_v11, %v6822_v30  ;;  %v983_v46 = vpop.f32.mrb[5].mxu0  ;;  %5386 = vmatpush3.bf16.msra.mxu0 %v6833_v10 }
 0x2cc   : > { %v985_v49 = vpop.f32.mrb[6].mxu0  ;;  %5382 = vmatmul.mubr.bf16.vlgmr.msra.gmra.mrb[16].mxu1 %v1395_v44  ;;  %v984_v50 = vadd.f32 %v983_v46, %v6825_v34 }
 0x2cd   : > { %v986_v39 = vadd.f32 %v985_v49, %v6822_v30  ;;  %v987_v13 = vpop.f32.mrb[7].mxu0  ;;  %1519 = vmatprep.mubr.bf16.mxu1 %v9205_v36 }
 0x2ce   : > { %v988_v51 = vadd.f32 %v987_v13, %v6825_v34 }
 0x2cf   : > { %v6845_v25 = vpack.c.bf16 %v986_v39, %v982_v45 }
 0x2d0   : > { %v6847_v0 = vpack.c.bf16 %v988_v51, %v984_v50 }
 0x2d2   : > { %v991_v52 = vpop.f32.mrb[8].mxu0  ;;  %5387 = vmatprep.subr.bf16.mxu0 %v6847_v0 }
 0x2d3   : > { %v992_v53 = vadd.f32 %v991_v52, %v6822_v30  ;;  %v993_v6 = vpop.f32.mrb[9].mxu0  ;;  %5388 = vmatpush3.bf16.msra.mxu0 %v6847_v0 }
 0x2d4   : > { %v995_v54 = vpop.f32.mrb[10].mxu0  ;;  %v994_v58 = vadd.f32 %v993_v6, %v6825_v34 }
 0x2d5   : > { %v996_v40 = vadd.f32 %v995_v54, %v6822_v30  ;;  %v997_v57 = vpop.f32.mrb[11].mxu0 }
 0x2d6   : > { %v998_v59 = vadd.f32 %v997_v57, %v6825_v34 }
 0x2d7   : > { %v6855_v60 = vpack.c.bf16 %v996_v40, %v992_v53 }
 0x2d8   : > { %v6857_v61 = vpack.c.bf16 %v998_v59, %v994_v58  ;;  %v5690_v59 = vld [vmem:[#allocation6] sm:$0xff]  }
 0x2d9   : > { %1487 = vmatprep.subr.bf16.mxu1 %v5690_v59 }
 0x2da   : > { %9377 = vst [vmem:[#allocation25_spill] sm:$0xff] %v6857_v61  ;;  %v1001_v62 = vpop.f32.mrb[12].mxu0  ;;  %5389 = vmatprep.subr.bf16.mxu0 %v6857_v61 }
 0x2db   : > { %v1002_v63 = vadd.f32 %v1001_v62, %v6822_v30  ;;  %v1003_v3 = vpop.f32.mrb[13].mxu0  ;;  %5390 = vmatpush3.bf16.msra.mxu0 %v6857_v61  ;;  %v1101_v62 = vpop.permute.xlu1 %1100 }
 0x2dc   : > { %v1005_v47 = vpop.f32.mrb[14].mxu0  ;;  %v1004_v7 = vadd.f32 %v1003_v3, %v6825_v34 }
 0x2dd   : > { %v1006_v4 = vadd.f32 %v1005_v47, %v6822_v30  ;;  %v1007_v5 = vpop.f32.mrb[15].mxu0 }
 0x2de   : > { %v1008_v8 = vadd.f32 %v1007_v5, %v6825_v34 }
 0x2df   : > { %v6865_v9 = vpack.c.bf16 %v1006_v4, %v1002_v63  ;;  %v1106_v63 = vpop.permute.xlu1 %1105 }
 0x2e0   : > { %v6867_v48 = vpack.c.bf16 %v1008_v8, %v1004_v7 }
 0x2e2   : > { %9378 = vst [vmem:[#allocation26_spill] sm:$0xff] %v6867_v48  ;;  %v1011_v16 = vpop.f32.mrb[16].mxu0  ;;  %5391 = vmatprep.subr.bf16.mxu0 %v6867_v48 }
 0x2e3   : > { %v1012_v17 = vadd.f32 %v1011_v16, %v6822_v30  ;;  %v1013_v18 = vpop.f32.mrb[17].mxu0  ;;  %5392 = vmatpush3.bf16.msra.mxu0 %v6867_v48  ;;  %v1111_v3 = vpop.permute.xlu1 %1110 }
 0x2e4   : > { %v1015_v19 = vpop.f32.mrb[18].mxu0  ;;  %v1014_v21 = vadd.f32 %v1013_v18, %v6825_v34 }
 0x2e5   : > { %v1016_v20 = vadd.f32 %v1015_v19, %v6822_v30  ;;  %v1017_v23 = vpop.f32.mrb[19].mxu0  ;;  %v5691_v19 = vld [vmem:[#allocation6 + $0x8] sm:$0xff]  }
 0x2e6   : > { %v1018_v22 = vadd.f32 %v1017_v23, %v6825_v34 }
 0x2e7   : > { %v6875_v55 = vpack.c.bf16 %v1016_v20, %v1012_v17  ;;  %v1116_v4 = vpop.permute.xlu1 %1115 }
 0x2e8   : > { %v6877_v12 = vpack.c.bf16 %v1018_v22, %v1014_v21 }
 0x2ea   : > { %9379 = vst [vmem:[#allocation27_spill] sm:$0xff] %v6877_v12  ;;  %v1021_v26 = vpop.f32.mrb[20].mxu0  ;;  %5393 = vmatprep.subr.bf16.mxu0 %v6877_v12 }
 0x2eb   : > { %v1022_v27 = vadd.f32 %v1021_v26, %v6822_v30  ;;  %v1023_v56 = vpop.f32.mrb[21].mxu0  ;;  %5394 = vmatpush3.bf16.msra.mxu0 %v6877_v12 }
 0x2ec   : > { %v1025_v15 = vpop.f32.mrb[22].mxu0  ;;  %v1024_v1 = vadd.f32 %v1023_v56, %v6825_v34 }
 0x2ed   : > { %v1026_v29 = vadd.f32 %v1025_v15, %v6822_v30  ;;  %v1027_v33 = vpop.f32.mrb[23].mxu0 }
 0x2ee   : > { %v1028_v2 = vadd.f32 %v1027_v33, %v6825_v34 }
 0x2ef   : > { %v6885_v35 = vpack.c.bf16 %v1026_v29, %v1022_v27 }
 0x2f0   : > { %v6887_v37 = vpack.c.bf16 %v1028_v2, %v1024_v1 }
 0x2f2   : > { %9380 = vst [vmem:[#allocation28_spill] sm:$0xff] %v6887_v37  ;;  %v1031_v38 = vpop.f32.mrb[24].mxu0  ;;  %5395 = vmatprep.subr.bf16.mxu0 %v6887_v37 }
 0x2f3   : > { %v1032_v41 = vadd.f32 %v1031_v38, %v6822_v30  ;;  %v1033_v32 = vpop.f32.mrb[25].mxu0  ;;  %5396 = vmatpush3.bf16.msra.mxu0 %v6887_v37 }
 0x2f4   : > { %v1035_v42 = vpop.f32.mrb[26].mxu0  ;;  %v1034_v45 = vadd.f32 %v1033_v32, %v6825_v34 }
 0x2f5   : > { %v1036_v44 = vadd.f32 %v1035_v42, %v6822_v30  ;;  %v1037_v11 = vpop.f32.mrb[27].mxu0 }
 0x2f6   : > { %v1038_v46 = vadd.f32 %v1037_v11, %v6825_v34  ;;  %v1400_v11 = vpop.permute.xlu1 %1399 }
 0x2f7   : > { %v6895_v49 = vpack.c.bf16 %v1036_v44, %v1032_v41 }
 0x2f8   : > { %v6897_v39 = vpack.c.bf16 %v1038_v46, %v1034_v45  ;;  %v1442_v46 = vld [vmem:[%s9392_s20] sm:$0xff] }
 0x2fa   : > { %9381 = vst [vmem:[#allocation29_spill] sm:$0xff] %v6897_v39  ;;  %v1041_v13 = vpop.f32.mrb[28].mxu0  ;;  %5397 = vmatprep.subr.bf16.mxu0 %v6897_v39 }
 0x2fb   : > { %v1042_v50 = vadd.f32 %v1041_v13, %v6822_v30  ;;  %v1043_v51 = vpop.f32.mrb[29].mxu0  ;;  %5398 = vmatpush3.bf16.msra.mxu0 %v6897_v39  ;;  %v6964_v13 = vrot.slane %v1442_v46, %v6813_v31 }
 0x2fc   : > { %v1045_v52 = vpop.f32.mrb[30].mxu0  ;;  %v1044_v54 = vadd.f32 %v1043_v51, %v6825_v34 }
 0x2fd   : > { %v1046_v53 = vadd.f32 %v1045_v52, %v6822_v30  ;;  %v1047_v6 = vpop.f32.mrb[31].mxu0 }
 0x2fe   : > { %v1048_v40 = vadd.f32 %v1047_v6, %v6825_v34 }
 0x2ff   : > { %v6905_v57 = vpack.c.bf16 %v1046_v53, %v1042_v50 }
 0x300   : > { %v6907_v58 = vpack.c.bf16 %v1048_v40, %v1044_v54 }
 0x301   : > { %9382 = vst [vmem:[#allocation30_spill] sm:$0xff] %v6905_v57 }
 0x302   : > { %9383 = vst [vmem:[#allocation31_spill] sm:$0xff] %v6907_v58  ;;  %5399 = vmatprep.subr.bf16.mxu0 %v6907_v58 }
 0x303   : > { %5400 = vmatpush3.bf16.msra.mxu0 %v6907_v58 }
 0x37f   : > { %v5351_v47 = vpop.f32.mrb[0].mxu1 }
 0x380   : > { %v1260_v30 = vpop.f32.mrb[1].mxu1  ;;  %v1269_v7 = vadd.f32 %v5351_v47, %v1111_v3 }
 0x381   : > { %v5352_v5 = vpop.f32.mrb[2].mxu1  ;;  %v1261_v16 = vadd.f32 %v1260_v30, %v1101_v62 }
 0x382   : > { %v1272_v8 = vadd.f32 %v5352_v5, %v1116_v4  ;;  %v1263_v34 = vpop.f32.mrb[3].mxu1 }
 0x383   : > { %v1264_v17 = vadd.f32 %v1263_v34, %v1106_v63 }
 0x384   : > { %v1324_v18 = vpack.c.bf16 %v1272_v8, %v1269_v7 }
 0x385   : > { %v1323_v20 = vpack.c.bf16 %v1264_v17, %v1261_v16 }
 0x387   : > { %1488 = vmatpush1.bf16.msra.mxu1 %v1323_v20  ;;  %v6911_v23 = vpop.f32.mrb[4].mxu1 }
 0x388   : > { %1489 = vmatprep.subr.bf16.mxu1 %v5691_v19  ;;  %v6913_v21 = vpop.f32.mrb[5].mxu1 }
 0x389   : > { %v6915_v22 = vpop.f32.mrb[6].mxu1 }
 0x38a   : > { %v6917_v26 = vpop.f32.mrb[7].mxu1 }
 0x38b   : > { %1490 = vmatpush1.bf16.msra.mxu1 %v1324_v18 }
 0x38e   : > { %4809 = vmatmul.mubr.msk.bf16.vlgmr.msra.gmra.mrb[20].mxu1 %vm1462_vm1, %v6831_v43 }
 0x38f   : > { %1529 = vmatprep.mubr.bf16.mxu1 %v9205_v36  ;;  %v6922_v27 = vpop.f32.mrb[8].mxu1 }
 0x390   : > { %9384 = vst [vmem:[#allocation32_spill] sm:$0xff] %v6922_v27  ;;  %v6924_v56 = vpop.f32.mrb[9].mxu1 }
 0x391   : > { %9385 = vst [vmem:[#allocation33_spill] sm:$0xff] %v6924_v56  ;;  %v6926_v15 = vpop.f32.mrb[10].mxu1 }
 0x392   : > { %9386 = vst [vmem:[#allocation34_spill] sm:$0xff] %v6926_v15  ;;  %v6928_v29 = vpop.f32.mrb[11].mxu1 }
 0x393   : > { %9387 = vst [vmem:[#allocation35_spill] sm:$0xff] %v6928_v29 }
 0x396   : > { %4810 = vmatmul.mubr.msk.bf16.gmra.mrb[24].mxu1 %vm1462_vm1, %v6845_v25 }
 0x397   : > { %v6932_v33 = vpop.f32.mrb[12].mxu1  ;;  %1539 = vmatprep.mubr.bf16.mxu1 %v9205_v36 }
 0x398   : > { %9388 = vst [vmem:[#allocation36_spill] sm:$0xff] %v6932_v33  ;;  %v6935_v1 = vpop.f32.mrb[13].mxu1 }
 0x399   : > { %9389 = vst [vmem:[#allocation37_spill] sm:$0xff] %v6935_v1  ;;  %v6937_v2 = vpop.f32.mrb[14].mxu1 }
 0x39a   : > { %9390 = vst [vmem:[#allocation38_spill] sm:$0xff] %v6937_v2  ;;  %v6939_v38 = vpop.f32.mrb[15].mxu1 }
 0x39b   : > { %9391 = vst [vmem:[#allocation39_spill] sm:$0xff] %v6939_v38 }
 0x39e   : > { %4811 = vmatmul.mubr.msk.bf16.gmra.mrb[28].mxu1 %vm1462_vm1, %v6855_v60 }
 0x39f   : > { %v1436_v41 = vpop.f32.mrb[16].mxu1  ;;  %1549 = vmatprep.mubr.bf16.mxu1 %v9205_v36 }
 0x3a0   : > { %v5383_v32 = vpop.f32.mrb[17].mxu1  ;;  %v6958_v45 = vadd.f32 %v1436_v41, %v1400_v11 }
 0x3a1   : > { %v1439_v42 = vpop.f32.mrb[18].mxu1 }
 0x3a2   : > { %v5384_v44 = vpop.f32.mrb[19].mxu1  ;;  %v6968_v50 = vrot.slane %v6958_v45, %v6813_v31 }
 0x3a6   : > { %4812 = vmatmul.mubr.msk.bf16.gmra.mrb[32].mxu1 %vm1462_vm1, %v6865_v9 }
 0x3a7   : > { %1559 = vmatprep.mubr.bf16.mxu1 %v9205_v36 }
 0x3ae   : > { %4813 = vmatmul.mubr.msk.bf16.gmra.mrb[36].mxu1 %vm1462_vm1, %v6875_v55 }
 0x3af   : > { %1569 = vmatprep.mubr.bf16.mxu1 %v9205_v36 }
 0x3b6   : > { %4814 = vmatmul.mubr.msk.bf16.gmra.mrb[40].mxu1 %vm1462_vm1, %v6885_v35 }
 0x3b7   : > { %1579 = vmatprep.mubr.bf16.mxu1 %v9205_v36 }
 0x3be   : > { %4815 = vmatmul.mubr.msk.bf16.gmra.mrb[44].mxu1 %vm1462_vm1, %v6895_v49 }
 0x3bf   : > { %1589 = vmatprep.mubr.bf16.mxu1 %v9205_v36 }
 0x3c6   : > { %4816 = vmatmul.mubr.msk.bf16.gmra.mrb[48].mxu1 %vm1462_vm1, %v6905_v57 }
 0x461   : > { %v1521_v51 = vpop.f32.mrb[20].mxu1 }
 0x462   : > { %v6971_v52 = vadd.f32 %v6968_v50, %v1521_v51  ;;  %v1523_v53 = vpop.f32.mrb[21].mxu1 }
 0x463   : > { %v1624_v6 = vadd.f32 %v6964_v13, %v1523_v53  ;;  %v1525_v54 = vpop.f32.mrb[22].mxu1 }
 0x464   : > { %v6975_v40 = vadd.f32 %v6968_v50, %v1525_v54  ;;  %v1527_v59 = vpop.f32.mrb[23].mxu1 }
 0x465   : > { %1642 = vrot.lane.b32.xlu1 %v1624_v6, %s9288_s27  ;;  %v1625_v62 = vadd.f32 %v6964_v13, %v1527_v59 }
 0x469   : > { %1646 = vrot.lane.b32.xlu1 %v1625_v62, %s9286_s24  ;;  %v1531_v31 = vpop.f32.mrb[24].mxu1 }
 0x46a   : > { %v6981_v63 = vadd.f32 %v6968_v50, %v1531_v31  ;;  %v1533_v3 = vpop.f32.mrb[25].mxu1 }
 0x46b   : > { %v1626_v47 = vadd.f32 %v6964_v13, %v1533_v3  ;;  %v1535_v30 = vpop.f32.mrb[26].mxu1 }
 0x46c   : > { %v6985_v4 = vadd.f32 %v6968_v50, %v1535_v30  ;;  %v1537_v5 = vpop.f32.mrb[27].mxu1 }
 0x46d   : > { %1650 = vrot.lane.b32.xlu1 %v1626_v47, %s9284_s5  ;;  %v1627_v7 = vadd.f32 %v6964_v13, %v1537_v5 }
 0x471   : > { %1654 = vrot.lane.b32.xlu1 %v1627_v7, %s9282_s8  ;;  %v1541_v8 = vpop.f32.mrb[28].mxu1 }
 0x472   : > { %v6991_v34 = vadd.f32 %v6968_v50, %v1541_v8  ;;  %v1543_v16 = vpop.f32.mrb[29].mxu1 }
 0x473   : > { %v1628_v17 = vadd.f32 %v6964_v13, %v1543_v16  ;;  %v1545_v18 = vpop.f32.mrb[30].mxu1 }
 0x474   : > { %v6995_v19 = vadd.f32 %v6968_v50, %v1545_v18  ;;  %v1547_v20 = vpop.f32.mrb[31].mxu1 }
 0x475   : > { %1658 = vrot.lane.b32.xlu1 %v1628_v17, %s9280_s29  ;;  %v1629_v41 = vadd.f32 %v6964_v13, %v1547_v20 }
 0x479   : > { %1662 = vrot.lane.b32.xlu1 %v1629_v41, %s9278_s19  ;;  %v1551_v32 = vpop.f32.mrb[32].mxu1  ;;  %s9290_s19 = smov 96  }
 0x47a   : > { %v7001_v42 = vadd.f32 %v6968_v50, %v1551_v32  ;;  %v1553_v44 = vpop.f32.mrb[33].mxu1 }
 0x47b   : > { %v1630_v11 = vadd.f32 %v6964_v13, %v1553_v44  ;;  %v1555_v46 = vpop.f32.mrb[34].mxu1 }
 0x47c   : > { %v7005_v51 = vadd.f32 %v6968_v50, %v1555_v46  ;;  %v1557_v53 = vpop.f32.mrb[35].mxu1 }
 0x47d   : > { %1666 = vrot.lane.b32.xlu1 %v1630_v11, %s9276_s21  ;;  %v1631_v6 = vadd.f32 %v6964_v13, %v1557_v53  ;;  %s4774_s21 = sshll.u32 %s6546_s22, 8 }
 0x481   : > { %1670 = vrot.lane.b32.xlu1 %v1631_v6, %s9274_s25  ;;  %v1561_v54 = vpop.f32.mrb[36].mxu1  ;;  %s7508_s25 = scalar_lea.vmem [#allocation12], %s4774_s21  ;;  %s9418_s21 = smov 313  }
 0x482   : > { %v7011_v59 = vadd.f32 %v6968_v50, %v1561_v54  ;;  %v1563_v62 = vpop.f32.mrb[37].mxu1 }
 0x483   : > { %v1632_v31 = vadd.f32 %v6964_v13, %v1563_v62  ;;  %v1565_v3 = vpop.f32.mrb[38].mxu1 }
 0x484   : > { %v7015_v47 = vadd.f32 %v6968_v50, %v1565_v3  ;;  %v1567_v30 = vpop.f32.mrb[39].mxu1 }
 0x485   : > { %1674 = vrot.lane.b32.xlu1 %v1632_v31, %s9272_s13  ;;  %v1633_v5 = vadd.f32 %v6964_v13, %v1567_v30  ;;  %s9419_s13 = smov 321  }
 0x489   : > { %1678 = vrot.lane.b32.xlu1 %v1633_v5, %s9197_s23  ;;  %v1571_v7 = vpop.f32.mrb[40].mxu1  ;;  %s9203_s23 = smov 353  }
 0x48a   : > { %v7021_v8 = vadd.f32 %v6968_v50, %v1571_v7  ;;  %v1573_v16 = vpop.f32.mrb[41].mxu1 }
 0x48b   : > { %v1634_v17 = vadd.f32 %v6964_v13, %v1573_v16  ;;  %v1575_v18 = vpop.f32.mrb[42].mxu1 }
 0x48c   : > { %v7025_v20 = vadd.f32 %v6968_v50, %v1575_v18  ;;  %v1577_v41 = vpop.f32.mrb[43].mxu1 }
 0x48d   : > { %1682 = vrot.lane.b32.xlu1 %v1634_v17, %s9199_s26  ;;  %v1635_v32 = vadd.f32 %v6964_v13, %v1577_v41  ;;  %s9270_s26 = smov 361  }
 0x491   : > { %1686 = vrot.lane.b32.xlu1 %v1635_v32, %s9201_s28  ;;  %v1581_v44 = vpop.f32.mrb[44].mxu1  ;;  %s9266_s28 = smov 369   ;;  %v7051_v32 = vand.u32 127, %v847_v28 }
 0x492   : > { %v7031_v11 = vadd.f32 %v6968_v50, %v1581_v44  ;;  %v1583_v46 = vpop.f32.mrb[45].mxu1 }
 0x493   : > { %v1636_v53 = vadd.f32 %v6964_v13, %v1583_v46  ;;  %v1585_v6 = vpop.f32.mrb[46].mxu1  ;;  %v7056_v46 = vadd.s32 1, %v6810_v14  ;;  %vm1737_vm4 = vcmp.le.s32.totalorder %v7051_v32, %v6810_v14 }
 0x494   : > { %v7035_v54 = vadd.f32 %v6968_v50, %v1585_v6  ;;  %v1587_v62 = vpop.f32.mrb[47].mxu1 }
 0x495   : > { %1690 = vrot.lane.b32.xlu1 %v1636_v53, %s9203_s23  ;;  %v1637_v31 = vadd.f32 %v6964_v13, %v1587_v62  ;;  %s9264_s23 = smov 377   ;;  %vm1769_vm3 = vcmp.eq.s32.totalorder %v7051_v32, %v7056_v46  ;;  %v7069_v62 = vadd.s32 16, %v6810_v14 }
 0x497   : > { %vm9292_vm8 = vcmp.le.s32.totalorder %v7051_v32, %v7069_v62 }
 0x499   : > { %1694 = vrot.lane.b32.xlu1 %v1637_v31, %s9270_s26  ;;  %v1591_v3 = vpop.f32.mrb[48].mxu1  ;;  %s9420_s26 = smov 329  }
 0x49a   : > { %v7041_v30 = vadd.f32 %v6968_v50, %v1591_v3  ;;  %v1593_v5 = vpop.f32.mrb[49].mxu1 }
 0x49b   : > { %v1638_v7 = vadd.f32 %v6964_v13, %v1593_v5  ;;  %v1595_v16 = vpop.f32.mrb[50].mxu1 }
 0x49c   : > { %v7045_v17 = vadd.f32 %v6968_v50, %v1595_v16  ;;  %v1597_v18 = vpop.f32.mrb[51].mxu1  ;;  %v7059_v50 = vadd.s32 8, %v6810_v14 }
 0x49d   : > { %1698 = vrot.lane.b32.xlu1 %v1638_v7, %s9266_s28  ;;  %v1639_v41 = vadd.f32 %v6964_v13, %v1597_v18  ;;  %v7081_v7 = vadd.s32 24, %v6810_v14  ;;  %s9416_s28 = smov 297  }
 0x49e   : > { %v7066_v28 = vadd.s32 1, %v7059_v50  ;;  %vm1738_vm6 = vcmp.le.s32.totalorder %v7051_v32, %v7059_v50 }
 0x49f   : > { %9393 = vst [vmem:[#allocation40_spill] sm:$0xff] %v7081_v7  ;;  %v7104_v2 = vadd.s32 1, %v7081_v7  ;;  %vm9297_vm10 = vcmp.le.s32.totalorder %v7051_v32, %v7081_v7 }
 0x4a0   : > { %vm1770_vm5 = vcmp.eq.s32.totalorder %v7051_v32, %v7066_v28 }
 0x4a1   : > { %1702 = vrot.lane.b32.xlu1 %v1639_v41, %s9264_s23  ;;  %v7090_v41 = vadd.s32 1, %v7069_v62  ;;  %9394 = vst [vmem:[#allocation41_spill] sm:$0xff] %v7104_v2  ;;  %vm9298_vm9 = vcmp.eq.s32.totalorder %v7051_v32, %v7104_v2  ;;  %s9417_s23 = smov 305  }
 0x4a3   : > { %vm1771_vm7 = vcmp.eq.s32.totalorder %v7051_v32, %v7090_v41 }
 0x4d7   : > { %v7053_v44 = vpop.permute.xlu1 %1642 }
 0x4d8   : > { %v9207_v13 = vrot.slane %v7053_v44, 1 }
 0x4db   : > { %v1647_v53 = vpop.permute.xlu1 %1646 }
 0x4dc   : > { %v1705_v6 = vrot.slane %v1647_v53, 1 }
 0x4de   : > { %v1735_v31 = vsel %vm1720_vm2, %v9207_v13, %v1705_v6 }
 0x4df   : > { %v1651_v3 = vpop.permute.xlu1 %1650  ;;  %v1785_v5 = vsel %vm1769_vm3, 0.0, %v1735_v31 }
 0x4e0   : > { %v1706_v16 = vrot.slane %v1651_v3, 1  ;;  %v1801_v18 = vsel %vm1737_vm4, %v7053_v44, %v1785_v5 }
 0x4e1   : > { %v7093_v36 = vadd.f32 %v1801_v18, %v6971_v52 }
 0x4e2   : > { %v1734_v31 = vsel %vm1720_vm2, %v1705_v6, %v1706_v16  ;;  %v7112_v6 = vadd.s32 32, %v6810_v14 }
 0x4e3   : > { %v1655_v13 = vpop.permute.xlu1 %1654  ;;  %1833 = vmax.xlane.f32.xlu1 %v7093_v36  ;;  %v1786_v5 = vsel %vm1770_vm5, 0.0, %v1734_v31 }
 0x4e4   : > { %v1707_v33 = vrot.slane %v1655_v13, 1  ;;  %v1802_v52 = vsel %vm1738_vm6, %v1647_v53, %v1786_v5  ;;  %9395 = vst [vmem:[#allocation42_spill] sm:$0xff] %v7112_v6  ;;  %vm9262_vm12 = vcmp.le.s32.totalorder %v7051_v32, %v7112_v6 }
 0x4e5   : > { %v7115_v18 = vadd.f32 %v1802_v52, %v6975_v40  ;;  %v7131_v52 = vadd.s32 1, %v7112_v6 }
 0x4e6   : > { %v1733_v31 = vsel %vm1720_vm2, %v1706_v16, %v1707_v33  ;;  %v7134_v16 = vadd.s32 40, %v6810_v14 }
 0x4e7   : > { %1835 = vmax.xlane.f32.xlu0 %v7115_v18  ;;  %v1659_v1 = vpop.permute.xlu1 %1658  ;;  %v1787_v53 = vsel %vm1771_vm7, 0.0, %v1733_v31  ;;  %9396 = vst [vmem:[#allocation43_spill] sm:$0xff] %v7131_v52  ;;  %vm9296_vm11 = vcmp.eq.s32.totalorder %v7051_v32, %v7131_v52 }
 0x4e8   : > { %v1708_v5 = vrot.slane %v1659_v1, 1  ;;  %v1803_v40 = vsel %vm9292_vm8, %v1651_v3, %v1787_v53  ;;  %9397 = vst [vmem:[#allocation44_spill] sm:$0xff] %v7134_v16  ;;  %v7148_v53 = vadd.s32 48, %v6810_v14  ;;  %vm9216_vm14 = vcmp.le.s32.totalorder %v7051_v32, %v7134_v16 }
 0x4e9   : > { %v7137_v38 = vadd.f32 %v1803_v40, %v6981_v63 }
 0x4ea   : > { %v1732_v31 = vsel %vm1720_vm2, %v1707_v33, %v1708_v5  ;;  %9398 = vst [vmem:[#allocation45_spill] sm:$0xff] %v7148_v53  ;;  %v7156_v33 = vadd.s32 1, %v7134_v16  ;;  %vm9222_vm0 = vcmp.le.s32.totalorder %v7051_v32, %v7148_v53 }
 0x4eb   : > { %v1663_v15 = vpop.permute.xlu1 %1662  ;;  %1837 = vmax.xlane.f32.xlu1 %v7137_v38  ;;  %v1788_v3 = vsel %vm9298_vm9, 0.0, %v1732_v31 }
 0x4ec   : > { %v1709_v27 = vrot.slane %v1663_v15, 1  ;;  %v1804_v63 = vsel %vm9297_vm10, %v1655_v13, %v1788_v3  ;;  %9399 = vst [vmem:[#allocation46_spill] sm:$0xff] %v7156_v33  ;;  %v7170_v3 = vadd.s32 1, %v7148_v53  ;;  %vm9261_vm13 = vcmp.eq.s32.totalorder %v7051_v32, %v7156_v33 }
 0x4ed   : > { %v7159_v40 = vadd.f32 %v1804_v63, %v6985_v4 }
 0x4ee   : > { %v1731_v31 = vsel %vm1720_vm2, %v1708_v5, %v1709_v27  ;;  %9400 = vst [vmem:[#allocation47_spill] sm:$0xff] %v7170_v3  ;;  %v7178_v5 = vadd.s32 56, %v6810_v14  ;;  %vm9217_vm15 = vcmp.eq.s32.totalorder %v7051_v32, %v7170_v3 }
 0x4ef   : > { %v1667_v56 = vpop.permute.xlu1 %1666  ;;  %1839 = vmax.xlane.f32.xlu1 %v7159_v40  ;;  %v1789_v13 = vsel %vm9296_vm11, 0.0, %v1731_v31 }
 0x4f0   : > { %v1710_v29 = vrot.slane %v1667_v56, 1  ;;  %v1805_v4 = vsel %vm9262_vm12, %v1659_v1, %v1789_v13  ;;  %9401 = vst [vmem:[#allocation48_spill] sm:$0xff] %v7178_v5 }
 0x4f1   : > { %v7181_v63 = vadd.f32 %v1805_v4, %v6991_v34  ;;  %v7197_v4 = vadd.s32 1, %v7178_v5 }
 0x4f2   : > { %v1730_v31 = vsel %vm1720_vm2, %v1709_v27, %v1710_v29  ;;  %v7200_v27 = vadd.s32 64, %v6810_v14 }
 0x4f3   : > { %v1671_v52 = vpop.permute.xlu1 %1670  ;;  %1841 = vmax.xlane.f32.xlu1 %v7181_v63  ;;  %v1790_v1 = vsel %vm9261_vm13, 0.0, %v1730_v31  ;;  %9402 = vst [vmem:[#allocation49_spill] sm:$0xff] %v7197_v4 }
 0x4f4   : > { %v1711_v13 = vrot.slane %v1671_v52, 1  ;;  %v1806_v34 = vsel %vm9216_vm14, %v1663_v15, %v1790_v1  ;;  %9403 = vst [vmem:[#allocation50_spill] sm:$0xff] %v7200_v27  ;;  %v7214_v1 = vadd.s32 72, %v6810_v14  ;;  %vm9223_vm14 = vcmp.eq.s32.totalorder %v7051_v32, %v7197_v4 }
 0x4f5   : > { %v7203_v6 = vadd.f32 %v1806_v34, %v6995_v19 }
 0x4f6   : > { %v1729_v31 = vsel %vm1720_vm2, %v1710_v29, %v1711_v13  ;;  %9404 = vst [vmem:[#allocation51_spill] sm:$0xff] %v7214_v1  ;;  %v7222_v29 = vadd.s32 1, %v7200_v27 }
 0x4f7   : > { %v1675_v33 = vpop.permute.xlu1 %1674  ;;  %1843 = vmax.xlane.f32.xlu1 %v7203_v6  ;;  %v1791_v15 = vsel %vm9217_vm15, 0.0, %v1729_v31  ;;  %vm9226_vm15 = vcmp.le.s32.totalorder %v7051_v32, %v7178_v5 }
 0x4f8   : > { %v1712_v16 = vrot.slane %v1675_v33, 1  ;;  %v1807_v19 = vsel %vm9222_vm0, %v1667_v56, %v1791_v15  ;;  %9405 = vst [vmem:[#allocation52_spill] sm:$0xff] %v7222_v29  ;;  %v7236_v15 = vadd.s32 1, %v7214_v1  ;;  %vm9229_vm0 = vcmp.eq.s32.totalorder %v7051_v32, %v7222_v29 }
 0x4f9   : > { %v7225_v34 = vadd.f32 %v1807_v19, %v7001_v42 }
 0x4fa   : > { %v1728_v31 = vsel %vm1720_vm2, %v1711_v13, %v1712_v16  ;;  %9406 = vst [vmem:[#allocation53_spill] sm:$0xff] %v7236_v15  ;;  %v7244_v13 = vadd.s32 80, %v6810_v14 }
 0x4fb   : > { %v1679_v3 = vpop.permute.xlu1 %1678  ;;  %1845 = vmax.xlane.f32.xlu1 %v7225_v34  ;;  %v1792_v56 = vsel %vm9223_vm14, 0.0, %v1728_v31  ;;  %vm9234_vm14 = vcmp.le.s32.totalorder %v7051_v32, %v7200_v27 }
 0x4fc   : > { %v1713_v53 = vrot.slane %v1679_v3, 1  ;;  %v1808_v42 = vsel %vm9226_vm15, %v1671_v52, %v1792_v56  ;;  %9407 = vst [vmem:[#allocation54_spill] sm:$0xff] %v7244_v13  ;;  %vm9235_vm15 = vcmp.eq.s32.totalorder %v7051_v32, %v7236_v15 }
 0x4fd   : > { %v7247_v19 = vadd.f32 %v1808_v42, %v7005_v51  ;;  %v7263_v42 = vadd.s32 1, %v7244_v13 }
 0x4fe   : > { %v1727_v31 = vsel %vm1720_vm2, %v1712_v16, %v1713_v53  ;;  %v7266_v16 = vadd.s32 88, %v6810_v14 }
 0x4ff   : > { %1847 = vmax.xlane.f32.xlu0 %v7247_v19  ;;  %v1683_v4 = vpop.permute.xlu1 %1682  ;;  %v1793_v52 = vsel %vm9229_vm0, 0.0, %v1727_v31  ;;  %9408 = vst [vmem:[#allocation55_spill] sm:$0xff] %v7263_v42  ;;  %vm9240_vm0 = vcmp.le.s32.totalorder %v7051_v32, %v7214_v1  ;;  %v7305_v1 = vadd.s32 104, %v6810_v14 }
 0x500   : > { %v1714_v56 = vrot.slane %v1683_v4, 1  ;;  %v1809_v51 = vsel %vm9234_vm14, %v1675_v33, %v1793_v52  ;;  %9409 = vst [vmem:[#allocation56_spill] sm:$0xff] %v7266_v16  ;;  %v7280_v52 = vadd.s32 96, %v6810_v14  ;;  %vm9241_vm14 = vcmp.eq.s32.totalorder %v7051_v32, %v7263_v42 }
 0x501   : > { %v7269_v5 = vadd.f32 %v1809_v51, %v7011_v59 }
 0x502   : > { %v1726_v31 = vsel %vm1720_vm2, %v1713_v53, %v1714_v56  ;;  %9410 = vst [vmem:[#allocation57_spill] sm:$0xff] %v7280_v52  ;;  %v7288_v53 = vadd.s32 1, %v7266_v16 }
 0x503   : > { %v1687_v29 = vpop.permute.xlu1 %1686  ;;  %1849 = vmax.xlane.f32.xlu1 %v7269_v5  ;;  %v1794_v33 = vsel %vm9235_vm15, 0.0, %v1726_v31  ;;  %vm9246_vm15 = vcmp.le.s32.totalorder %v7051_v32, %v7244_v13 }
 0x504   : > { %v1715_v27 = vrot.slane %v1687_v29, 1  ;;  %v1810_v59 = vsel %vm9240_vm0, %v1679_v3, %v1794_v33  ;;  %9411 = vst [vmem:[#allocation58_spill] sm:$0xff] %v7288_v53  ;;  %v7302_v33 = vadd.s32 1, %v7280_v52  ;;  %vm9249_vm0 = vcmp.eq.s32.totalorder %v7051_v32, %v7288_v53 }
 0x505   : > { %v7291_v51 = vadd.f32 %v1810_v59, %v7015_v47 }
 0x506   : > { %v1725_v31 = vsel %vm1720_vm2, %v1714_v56, %v1715_v27  ;;  %9412 = vst [vmem:[#allocation59_spill] sm:$0xff] %v7302_v33 }
 0x507   : > { %1851 = vmax.xlane.f32.xlu0 %v7291_v51  ;;  %v1691_v15 = vpop.permute.xlu1 %1690  ;;  %v1795_v3 = vsel %vm9241_vm14, 0.0, %v1725_v31  ;;  %vm9252_vm14 = vcmp.le.s32.totalorder %v7051_v32, %v7266_v16 }
 0x508   : > { %v1716_v47 = vrot.slane %v1691_v15, 1  ;;  %v1811_v59 = vsel %vm9246_vm15, %v1683_v4, %v1795_v3  ;;  %vm9255_vm15 = vcmp.eq.s32.totalorder %v7051_v32, %v7302_v33  ;;  %v7326_v4 = vadd.s32 1, %v7305_v1 }
 0x509   : > { %v7313_v56 = vadd.f32 %v1811_v59, %v7021_v8  ;;  %v7335_v59 = vadd.s32 112, %v6810_v14 }
 0x50a   : > { %v1724_v31 = vsel %vm1720_vm2, %v1715_v27, %v1716_v47  ;;  %v7332_v27 = vadd.s32 120, %v6810_v14 }
 0x50b   : > { %v1695_v42 = vpop.permute.xlu1 %1694  ;;  %1853 = vmax.xlane.f32.xlu1 %v7313_v56  ;;  %v1796_v13 = vsel %vm9249_vm0, 0.0, %v1724_v31  ;;  %9413 = vst [vmem:[#allocation60_spill] sm:$0xff] %v7335_v59  ;;  %vm9260_vm0 = vcmp.le.s32.totalorder %v7051_v32, %v7280_v52 }
 0x50c   : > { %v1717_v8 = vrot.slane %v1695_v42, 1  ;;  %v1812_v3 = vsel %vm9252_vm14, %v1687_v29, %v1796_v13  ;;  %vm9263_vm14 = vcmp.eq.s32.totalorder %v7051_v32, %v7326_v4  ;;  %vm1752_vm12 = vcmp.le.s32.totalorder %v7051_v32, %v7332_v27 }
 0x50d   : > { %v7338_v53 = vadd.f32 %v1812_v3, %v7025_v20  ;;  %v7354_v3 = vadd.s32 1, %v7332_v27  ;;  %v9576_v27 = vld [vmem:[#allocation27_spill] sm:$0xff] }
 0x50e   : > { %v1723_v31 = vsel %vm1720_vm2, %v1716_v47, %v1717_v8  ;;  %v7357_v47 = vadd.s32 1, %v7335_v59 }
 0x50f   : > { %1855 = vmax.xlane.f32.xlu0 %v7338_v53  ;;  %v1699_v7 = vpop.permute.xlu1 %1698  ;;  %v1797_v29 = vsel %vm9255_vm15, 0.0, %v1723_v31  ;;  %vm1750_vm15 = vcmp.le.s32.totalorder %v7051_v32, %v7305_v1 }
 0x510   : > { %v1718_v13 = vrot.slane %v1699_v7, 1  ;;  %v1813_v20 = vsel %vm9260_vm0, %v1691_v15, %v1797_v29  ;;  %vm1784_vm0 = vcmp.eq.s32.totalorder %v7051_v32, %v7354_v3  ;;  %vm1783_vm13 = vcmp.eq.s32.totalorder %v7051_v32, %v7357_v47  ;;  %v9578_v47 = vld [vmem:[#allocation26_spill] sm:$0xff] }
 0x511   : > { %v7360_v16 = vadd.f32 %v1813_v20, %v7031_v11 }
 0x512   : > { %v1722_v31 = vsel %vm1720_vm2, %v1717_v8, %v1718_v13  ;;  %v9414_v8 = vrot.slane %v7053_v44, 1 }
 0x513   : > { %1857 = vmax.xlane.f32.xlu1 %v7360_v16  ;;  %v1703_v33 = vpop.permute.xlu1 %1702  ;;  %v1798_v15 = vsel %vm9263_vm14, 0.0, %v1722_v31  ;;  %vm1751_vm14 = vcmp.le.s32.totalorder %v7051_v32, %v7335_v59 }
 0x514   : > { %v1719_v29 = vrot.slane %v1703_v33, 1  ;;  %v1814_v52 = vsel %vm1750_vm15, %v1695_v42, %v1798_v15 }
 0x515   : > { %v7378_v11 = vadd.f32 %v1814_v52, %v7035_v54 }
 0x516   : > { %v1736_v42 = vsel %vm1720_vm2, %v1719_v29, %v9414_v8  ;;  %v1721_v20 = vsel %vm1720_vm2, %v1718_v13, %v1719_v29  ;;  %v1086_v29 = vld [vmem:[%s9180_s7 + $0x20] sm:$0xff] }
 0x517   : > { %1859 = vmax.xlane.f32.xlu0 %v7378_v11  ;;  %v1800_v54 = vsel %vm1784_vm0, 0.0, %v1736_v42  ;;  %v1799_v52 = vsel %vm1783_vm13, 0.0, %v1721_v20 }
 0x518   : > { %v1816_v44 = vsel %vm1752_vm12, %v1703_v33, %v1800_v54  ;;  %v1815_v31 = vsel %vm1751_vm14, %v1699_v7, %v1799_v52 }
 0x519   : > { %v7404_v13 = vadd.f32 %v1816_v44, %v7045_v17  ;;  %v7407_v15 = vadd.f32 %v1815_v31, %v7041_v30 }
 0x51b   : > { %1863 = vmax.xlane.f32.xlu0 %v7404_v13  ;;  %1861 = vmax.xlane.f32.xlu1 %v7407_v15 }
 0x52c   : > { %1120 = vperm.xlu1 %5656, %v1086_v29  }
 0x570   : > { %v1834_v33 = vpop.xlane.xlu1 %1833 }
 0x571   : > { %v1865_v8 = vsub.f32 %v7093_v36, %v1834_v33 }
 0x573   : > { %v1881_v42 = vmul.f32 1.442695, %v1865_v8 }
 0x574   : > { %v1836_v7 = vpop.xlane.xlu0 %1835 }
 0x575   : > { %5738 = vpow2.f32 %v1881_v42  ;;  %v1866_v17 = vsub.f32 %v7115_v18, %v1836_v7 }
 0x577   : > { %v1883_v20 = vmul.f32 1.442695, %v1866_v17 }
 0x578   : > { %v1838_v30 = vpop.xlane.xlu1 %1837 }
 0x579   : > { %5740 = vpow2.f32 %v1883_v20  ;;  %v1867_v54 = vsub.f32 %v7137_v38, %v1838_v30 }
 0x57b   : > { %v1885_v52 = vmul.f32 1.442695, %v1867_v54 }
 0x57c   : > { %v1840_v44 = vpop.xlane.xlu1 %1839 }
 0x57d   : > { %5742 = vpow2.f32 %v1885_v52  ;;  %v1868_v31 = vsub.f32 %v7159_v40, %v1840_v44 }
 0x57f   : > { %v7418_v59 = vpop.eup %5738  ;;  %v1887_v29 = vmul.f32 1.442695, %v1868_v31 }
 0x580   : > { %1913 = vadd.xlane.f32.xlu1 %v7418_v59  ;;  %v1842_v36 = vpop.xlane.xlu1 %1841 }
 0x581   : > { %5744 = vpow2.f32 %v1887_v29  ;;  %v1869_v33 = vsub.f32 %v7181_v63, %v1842_v36 }
 0x583   : > { %v7422_v18 = vpop.eup %5740  ;;  %v1889_v8 = vmul.f32 1.442695, %v1869_v33 }
 0x584   : > { %1915 = vadd.xlane.f32.xlu0 %v7422_v18  ;;  %v1844_v38 = vpop.xlane.xlu1 %1843 }
 0x585   : > { %5746 = vpow2.f32 %v1889_v8  ;;  %v1870_v42 = vsub.f32 %v7203_v6, %v1844_v38 }
 0x587   : > { %v7426_v7 = vpop.eup %5742  ;;  %v1891_v40 = vmul.f32 1.442695, %v1870_v42 }
 0x588   : > { %1917 = vadd.xlane.f32.xlu1 %v7426_v7  ;;  %v1846_v17 = vpop.xlane.xlu1 %1845 }
 0x589   : > { %5748 = vpow2.f32 %v1891_v40  ;;  %v1871_v20 = vsub.f32 %v7225_v34, %v1846_v17 }
 0x58b   : > { %v7430_v30 = vpop.eup %5744  ;;  %v1893_v63 = vmul.f32 1.442695, %v1871_v20 }
 0x58c   : > { %v1848_v54 = vpop.xlane.xlu0 %1847  ;;  %1919 = vadd.xlane.f32.xlu0 %v7430_v30 }
 0x58d   : > { %5750 = vpow2.f32 %v1893_v63  ;;  %v1872_v52 = vsub.f32 %v7247_v19, %v1848_v54 }
 0x58f   : > { %v7434_v44 = vpop.eup %5746  ;;  %v1895_v6 = vmul.f32 1.442695, %v1872_v52 }
 0x590   : > { %1921 = vadd.xlane.f32.xlu1 %v7434_v44  ;;  %v1850_v31 = vpop.xlane.xlu1 %1849 }
 0x591   : > { %5752 = vpow2.f32 %v1895_v6  ;;  %v1873_v29 = vsub.f32 %v7269_v5, %v1850_v31 }
 0x593   : > { %v7438_v36 = vpop.eup %5748  ;;  %v1897_v34 = vmul.f32 1.442695, %v1873_v29 }
 0x594   : > { %v1852_v33 = vpop.xlane.xlu0 %1851  ;;  %1923 = vadd.xlane.f32.xlu0 %v7438_v36 }
 0x595   : > { %5754 = vpow2.f32 %v1897_v34  ;;  %v1874_v8 = vsub.f32 %v7291_v51, %v1852_v33 }
 0x597   : > { %v7442_v38 = vpop.eup %5750  ;;  %v1899_v19 = vmul.f32 1.442695, %v1874_v8 }
 0x598   : > { %1925 = vadd.xlane.f32.xlu1 %v7442_v38  ;;  %v1854_v42 = vpop.xlane.xlu1 %1853 }
 0x599   : > { %5756 = vpow2.f32 %v1899_v19  ;;  %v1875_v40 = vsub.f32 %v7313_v56, %v1854_v42 }
 0x59b   : > { %v7446_v17 = vpop.eup %5752  ;;  %v1901_v5 = vmul.f32 1.442695, %v1875_v40 }
 0x59c   : > { %v1856_v20 = vpop.xlane.xlu0 %1855  ;;  %1927 = vadd.xlane.f32.xlu0 %v7446_v17 }
 0x59d   : > { %5758 = vpow2.f32 %v1901_v5  ;;  %v1876_v63 = vsub.f32 %v7338_v53, %v1856_v20 }
 0x59f   : > { %v7450_v54 = vpop.eup %5754  ;;  %v1903_v51 = vmul.f32 1.442695, %v1876_v63 }
 0x5a0   : > { %1929 = vadd.xlane.f32.xlu1 %v7450_v54  ;;  %v1858_v52 = vpop.xlane.xlu1 %1857 }
 0x5a1   : > { %5760 = vpow2.f32 %v1903_v51  ;;  %v1877_v6 = vsub.f32 %v7360_v16, %v1858_v52  ;;  %v1089_v52 = vld [vmem:[%s9180_s7 + $0x38] sm:$0xff] }
 0x5a3   : > { %v7454_v31 = vpop.eup %5756  ;;  %v1905_v56 = vmul.f32 1.442695, %v1877_v6  ;;  %v1087_v6 = vld [vmem:[%s9180_s7 + $0x28] sm:$0xff] }
 0x5a4   : > { %v1860_v29 = vpop.xlane.xlu0 %1859  ;;  %1931 = vadd.xlane.f32.xlu0 %v7454_v31 }
 0x5a5   : > { %5762 = vpow2.f32 %v1905_v56  ;;  %v1878_v34 = vsub.f32 %v7378_v11, %v1860_v29  ;;  %v5692_v56 = vld [vmem:[#allocation6 + $0x10] sm:$0xff]  }
 0x5a6   : > { %2218 = vmatprep.subr.bf16.mxu0 %v5692_v56 }
 0x5a7   : > { %v7458_v33 = vpop.eup %5758  ;;  %v1907_v53 = vmul.f32 1.442695, %v1878_v34 }
 0x5a8   : > { %v1864_v8 = vpop.xlane.xlu0 %1863  ;;  %1933 = vadd.xlane.f32.xlu1 %v7458_v33  ;;  %v1862_v19 = vpop.xlane.xlu1 %1861 }
 0x5a9   : > { %5764 = vpow2.f32 %v1907_v53  ;;  %v1880_v42 = vsub.f32 %v7404_v13, %v1864_v8  ;;  %v1879_v16 = vsub.f32 %v7407_v15, %v1862_v19  ;;  %v1088_v15 = vld [vmem:[%s9180_s7 + $0x30] sm:$0xff] }
 0x5ab   : > { %v7463_v40 = vpop.eup %5760  ;;  %v1911_v5 = vmul.f32 1.442695, %v1880_v42  ;;  %v1909_v20 = vmul.f32 1.442695, %v1879_v16 }
 0x5ac   : > { %1935 = vadd.xlane.f32.xlu0 %v7463_v40  ;;  %v7503_v29 = vpop.permute.xlu1 %1120 }
 0x5ad   : > { %5766 = vpow2.f32 %v1911_v5 }
 0x5ae   : > { %5768 = vpow2.f32 %v1909_v20 }
 0x5af   : > { %v7466_v11 = vpop.eup %5762 }
 0x5b0   : > { %1937 = vadd.xlane.f32.xlu1 %v7466_v11 }
 0x5b3   : > { %v7469_v63 = vpop.eup %5764 }
 0x5b4   : > { %1939 = vadd.xlane.f32.xlu0 %v7469_v63 }
 0x5b7   : > { %v7472_v51 = vpop.eup %5766 }
 0x5b8   : > { %v7474_v13 = vpop.eup %5768  ;;  %1943 = vadd.xlane.f32.xlu0 %v7472_v51 }
 0x5b9   : > { %1941 = vadd.xlane.f32.xlu1 %v7474_v13 }
 0x5ca   : > { %1130 = vperm.xlu1 %5656, %v1088_v15  }
 0x5ce   : > { %1135 = vperm.xlu1 %5656, %v1089_v52   ;;  %1125 = vperm.xlu0 %5657, %v1087_v6  }
 0x5d2   : > { %2178 = vrot.lane.b32.xlu1 %v6831_v43, %s9290_s19  ;;  %2188 = vrot.lane.b32.xlu0 %v6885_v35, %s9290_s19 }
 0x5d6   : > { %2180 = vrot.lane.b32.xlu1 %v6845_v25, %s9290_s19  ;;  %2192 = vrot.lane.b32.xlu0 %v6905_v57, %s9290_s19 }
 0x5da   : > { %2182 = vrot.lane.b32.xlu1 %v6855_v60, %s9290_s19 }
 0x5de   : > { %2184 = vrot.lane.b32.xlu1 %v6865_v9, %s9290_s19 }
 0x5e2   : > { %2186 = vrot.lane.b32.xlu1 %v6875_v55, %s9290_s19 }
 0x5e6   : > { %2190 = vrot.lane.b32.xlu1 %v6895_v49, %s9290_s19  ;;  %s9426_s19 = smov 377  }
 0x60d   : > { %v1914_v34 = vpop.xlane.xlu1 %1913 }
 0x60e   : > { %5770 = vrcp.f32 %v1914_v34 }
 0x611   : > { %v1916_v53 = vpop.xlane.xlu0 %1915 }
 0x612   : > { %5772 = vrcp.f32 %v1916_v53 }
 0x615   : > { %v1918_v8 = vpop.xlane.xlu1 %1917 }
 0x616   : > { %5774 = vrcp.f32 %v1918_v8 }
 0x618   : > { %v5771_v42 = vpop.eup %5770 }
 0x619   : > { %v1920_v19 = vpop.xlane.xlu0 %1919  ;;  %v1961_v20 = vmul.f32 %v5771_v42, %v7418_v59 }
 0x61a   : > { %5776 = vrcp.f32 %v1920_v19 }
 0x61c   : > { %v5773_v16 = vpop.eup %5772 }
 0x61d   : > { %v1922_v5 = vpop.xlane.xlu1 %1921  ;;  %v1962_v15 = vmul.f32 %v5773_v16, %v7422_v18 }
 0x61e   : > { %5778 = vrcp.f32 %v1922_v5 }
 0x61f   : > { %v1977_v52 = vpack.c.bf16 %v1962_v15, %v1961_v20 }
 0x620   : > { %v5775_v56 = vpop.eup %5774 }
 0x621   : > { %v1924_v6 = vpop.xlane.xlu0 %1923  ;;  %5041 = vst [vmem:[%s7508_s25] sm:$0xff] %v1977_v52   ;;  %5401 = vmatprep.mubr.bf16.mxu0 %v1977_v52  ;;  %v1963_v53 = vmul.f32 %v5775_v56, %v7426_v7 }
 0x622   : > { %5780 = vrcp.f32 %v1924_v6 }
 0x624   : > { %v5777_v34 = vpop.eup %5776 }
 0x625   : > { %v1964_v8 = vmul.f32 %v5777_v34, %v7430_v30  ;;  %v1926_v59 = vpop.xlane.xlu1 %1925 }
 0x626   : > { %5782 = vrcp.f32 %v1926_v59 }
 0x627   : > { %v1978_v19 = vpack.c.bf16 %v1964_v8, %v1963_v53 }
 0x628   : > { %v5779_v42 = vpop.eup %5778 }
 0x629   : > { %v1928_v18 = vpop.xlane.xlu0 %1927  ;;  %5197 = vst [vmem:[%s7508_s25 + $0x8] sm:$0xff] %v1978_v19   ;;  %5402 = vmatmul.mubr.bf16.vlgmr.msra.gmra.mrb[32].mxu0 %v1978_v19  ;;  %v1965_v20 = vmul.f32 %v5779_v42, %v7434_v44 }
 0x62a   : > { %5784 = vrcp.f32 %v1928_v18 }
 0x62c   : > { %v5781_v16 = vpop.eup %5780 }
 0x62d   : > { %v1930_v5 = vpop.xlane.xlu1 %1929  ;;  %v1966_v15 = vmul.f32 %v5781_v16, %v7438_v36 }
 0x62e   : > { %5786 = vrcp.f32 %v1930_v5 }
 0x62f   : > { %v1979_v52 = vpack.c.bf16 %v1966_v15, %v1965_v20 }
 0x630   : > { %v5783_v30 = vpop.eup %5782 }
 0x631   : > { %v1932_v7 = vpop.xlane.xlu0 %1931  ;;  %5198 = vst [vmem:[%s7508_s25 + $0x10] sm:$0xff] %v1979_v52   ;;  %5405 = vmatprep.mubr.bf16.mxu0 %v1979_v52  ;;  %v1967_v34 = vmul.f32 %v5783_v30, %v7442_v38 }
 0x632   : > { %5788 = vrcp.f32 %v1932_v7 }
 0x634   : > { %v5785_v6 = vpop.eup %5784 }
 0x635   : > { %v1934_v56 = vpop.xlane.xlu1 %1933  ;;  %v1968_v53 = vmul.f32 %v5785_v6, %v7446_v17 }
 0x636   : > { %5790 = vrcp.f32 %v1934_v56 }
 0x637   : > { %v1980_v8 = vpack.c.bf16 %v1968_v53, %v1967_v34 }
 0x638   : > { %v5787_v36 = vpop.eup %5786 }
 0x639   : > { %v1936_v44 = vpop.xlane.xlu0 %1935  ;;  %5199 = vst [vmem:[%s7508_s25 + $0x18] sm:$0xff] %v1980_v8   ;;  %5406 = vmatmul.mubr.bf16.gmra.mrb[36].mxu0 %v1980_v8  ;;  %v1969_v18 = vmul.f32 %v5787_v36, %v7450_v54 }
 0x63a   : > { %5792 = vrcp.f32 %v1936_v44 }
 0x63c   : > { %v5789_v59 = vpop.eup %5788 }
 0x63d   : > { %v1938_v19 = vpop.xlane.xlu1 %1937  ;;  %v1970_v42 = vmul.f32 %v5789_v59, %v7454_v31 }
 0x63e   : > { %5794 = vrcp.f32 %v1938_v19  ;;  %v5693_v19 = vld [vmem:[#allocation6 + $0x18] sm:$0xff]  }
 0x63f   : > { %v1981_v16 = vpack.c.bf16 %v1970_v42, %v1969_v18 }
 0x640   : > { %v5791_v17 = vpop.eup %5790 }
 0x641   : > { %v1940_v38 = vpop.xlane.xlu0 %1939  ;;  %5200 = vst [vmem:[%s7508_s25 + $0x20] sm:$0xff] %v1981_v16   ;;  %5409 = vmatprep.mubr.bf16.mxu0 %v1981_v16  ;;  %v1971_v15 = vmul.f32 %v5791_v17, %v7458_v33  ;;  %v1277_v33 = vadd.f32 %v6913_v21, %v7503_v29 }
 0x642   : > { %5796 = vrcp.f32 %v1940_v38 }
 0x644   : > { %v5793_v5 = vpop.eup %5792 }
 0x645   : > { %v1944_v20 = vpop.xlane.xlu0 %1943  ;;  %v1972_v52 = vmul.f32 %v5793_v5, %v7463_v40 }
 0x646   : > { %5798 = vrcp.f32 %v1944_v20  ;;  %v1942_v7 = vpop.xlane.xlu1 %1941 }
 0x647   : > { %5800 = vrcp.f32 %v1942_v7  ;;  %v1982_v54 = vpack.c.bf16 %v1972_v52, %v1971_v15 }
 0x648   : > { %v5795_v31 = vpop.eup %5794 }
 0x649   : > { %5201 = vst [vmem:[%s7508_s25 + $0x28] sm:$0xff] %v1982_v54   ;;  %5410 = vmatmul.mubr.bf16.gmra.mrb[40].mxu0 %v1982_v54  ;;  %v1973_v34 = vmul.f32 %v5795_v31, %v7466_v11 }
 0x64a   : > { %v1131_v30 = vpop.permute.xlu1 %1130 }
 0x64b   : > { %v1285_v44 = vadd.f32 %v6911_v23, %v1131_v30  ;;  %v9415_v23 = vmov 0  }
 0x64c   : > { %v5797_v6 = vpop.eup %5796 }
 0x64d   : > { %v1126_v56 = vpop.permute.xlu0 %1125  ;;  %v1974_v53 = vmul.f32 %v5797_v6, %v7469_v63 }
 0x64e   : > { %v1280_v40 = vadd.f32 %v6917_v26, %v1126_v56  ;;  %v1136_v8 = vpop.permute.xlu1 %1135 }
 0x64f   : > { %v1288_v36 = vadd.f32 %v6915_v22, %v1136_v8  ;;  %v1983_v59 = vpack.c.bf16 %v1974_v53, %v1973_v34 }
 0x650   : > { %v5799_v18 = vpop.eup %5798  ;;  %v1325_v42 = vpack.c.bf16 %v1280_v40, %v1277_v33 }
 0x651   : > { %v5801_v16 = vpop.eup %5800  ;;  %v1326_v38 = vpack.c.bf16 %v1288_v36, %v1285_v44  ;;  %5202 = vst [vmem:[%s7508_s25 + $0x30] sm:$0xff] %v1983_v59   ;;  %5413 = vmatprep.mubr.bf16.mxu0 %v1983_v59  ;;  %v1976_v11 = vmul.f32 %v5799_v18, %v7472_v51  ;;  %v2189_v17 = vpop.permute.xlu0 %2188 }
 0x652   : > { %2219 = vmatpush1.bf16.msra.mxu0 %v1325_v42  ;;  %v1975_v21 = vmul.f32 %v5801_v16, %v7474_v13  ;;  %v2179_v22 = vpop.permute.xlu1 %2178 }
 0x653   : > { %2220 = vmatprep.subr.bf16.mxu0 %v5693_v19 }
 0x654   : > { %v1984_v26 = vpack.c.bf16 %v1976_v11, %v1975_v21 }
 0x655   : > { %v2193_v20 = vpop.permute.xlu0 %2192 }
 0x656   : > { %5203 = vst [vmem:[%s7508_s25 + $0x38] sm:$0xff] %v1984_v26   ;;  %5414 = vmatmul.mubr.bf16.gmra.mrb[44].mxu0 %v1984_v26  ;;  %v2181_v63 = vpop.permute.xlu1 %2180 }
 0x657   : > { %2221 = vmatpush1.bf16.msra.mxu0 %v1326_v38  ;;  %2250 = vmatprep.mubr.bf16.mxu0 %v9415_v23 }
 0x65a   : > { %v2183_v51 = vpop.permute.xlu1 %2182 }
 0x65e   : > { %4833 = vmatmul.mubr.msk.bf16.vlgmr.msra.gmra.mrb[48].mxu0 %vm1462_vm1, %v2179_v22  ;;  %v2185_v13 = vpop.permute.xlu1 %2184  ;;  %v7564_v22 = vld [vmem:[%s9392_s20] sm:$0xff] }
 0x65f   : > { %2260 = vmatprep.mubr.bf16.mxu0 %v9415_v23 }
 0x662   : > { %v2187_v29 = vpop.permute.xlu1 %2186 }
 0x666   : > { %4834 = vmatmul.mubr.msk.bf16.gmra.mrb[52].mxu0 %vm1462_vm1, %v2181_v63  ;;  %v2191_v5 = vpop.permute.xlu1 %2190  ;;  %v7568_v63 = vrot.slane %v7564_v22, %v6819_v24 }
 0x667   : > { %2270 = vmatprep.mubr.bf16.mxu0 %v9415_v23 }
 0x66e   : > { %4835 = vmatmul.mubr.msk.bf16.gmra.mrb[56].mxu0 %vm1462_vm1, %v2183_v51  ;;  %v7572_v51 = vrot.slane %v6958_v45, %v6819_v24 }
 0x66f   : > { %2280 = vmatprep.mubr.bf16.mxu0 %v9415_v23 }
 0x676   : > { %4836 = vmatmul.mubr.msk.bf16.gmra.mrb[60].mxu0 %vm1462_vm1, %v2185_v13 }
 0x677   : > { %2290 = vmatprep.mubr.bf16.mxu0 %v9415_v23 }
 0x67e   : > { %4837 = vmatmul.mubr.msk.bf16.gmra.mrb[64].mxu0 %vm1462_vm1, %v2187_v29 }
 0x67f   : > { %2300 = vmatprep.mubr.bf16.mxu0 %v9415_v23 }
 0x686   : > { %4838 = vmatmul.mubr.msk.bf16.gmra.mrb[68].mxu0 %vm1462_vm1, %v2189_v17 }
 0x687   : > { %2310 = vmatprep.mubr.bf16.mxu0 %v9415_v23 }
 0x68e   : > { %4839 = vmatmul.mubr.msk.bf16.gmra.mrb[72].mxu0 %vm1462_vm1, %v2191_v5 }
 0x68f   : > { %2320 = vmatprep.mubr.bf16.mxu0 %v9415_v23 }
 0x696   : > { %4840 = vmatmul.mubr.msk.bf16.gmra.mrb[76].mxu0 %vm1462_vm1, %v2193_v20 }
 0x6fc   : > { %v5403_v15 = vpop.f32.mrb[32].mxu0 }
 0x6fd   : > { %v2091_v52 = vpop.f32.mrb[33].mxu0 }
 0x6fe   : > { %v5404_v7 = vpop.f32.mrb[34].mxu0 }
 0x6ff   : > { %v2155_v54 = vpack.c.bf16 %v5404_v7, %v5403_v15  ;;  %v2094_v31 = vpop.f32.mrb[35].mxu0 }
 0x700   : > { %v2154_v30 = vpack.c.bf16 %v2094_v31, %v2091_v52 }
 0x701   : > { %2163 = vst.msk [vmem:[#allocation2 + $0x8] sm:$0xff] %vm1462_vm1, %v2155_v54 }
 0x702   : > { %2162 = vst.msk [vmem:[#allocation2] sm:$0xff] %vm1462_vm1, %v2154_v30 }
 0x70c   : > { %v5407_v6 = vpop.f32.mrb[36].mxu0 }
 0x70d   : > { %v2107_v56 = vpop.f32.mrb[37].mxu0 }
 0x70e   : > { %v5408_v34 = vpop.f32.mrb[38].mxu0 }
 0x70f   : > { %v2157_v53 = vpack.c.bf16 %v5408_v34, %v5407_v6  ;;  %v2110_v33 = vpop.f32.mrb[39].mxu0 }
 0x710   : > { %v2156_v40 = vpack.c.bf16 %v2110_v33, %v2107_v56 }
 0x711   : > { %2165 = vst.msk [vmem:[#allocation2 + $0x18] sm:$0xff] %vm1462_vm1, %v2157_v53 }
 0x712   : > { %2164 = vst.msk [vmem:[#allocation2 + $0x10] sm:$0xff] %vm1462_vm1, %v2156_v40 }
 0x71c   : > { %v5411_v8 = vpop.f32.mrb[40].mxu0 }
 0x71d   : > { %v2123_v44 = vpop.f32.mrb[41].mxu0 }
 0x71e   : > { %v5412_v36 = vpop.f32.mrb[42].mxu0 }
 0x71f   : > { %v2159_v59 = vpack.c.bf16 %v5412_v36, %v5411_v8  ;;  %v2126_v19 = vpop.f32.mrb[43].mxu0 }
 0x720   : > { %v2158_v18 = vpack.c.bf16 %v2126_v19, %v2123_v44 }
 0x721   : > { %2167 = vst.msk [vmem:[#allocation2 + $0x28] sm:$0xff] %vm1462_vm1, %v2159_v59 }
 0x722   : > { %2166 = vst.msk [vmem:[#allocation2 + $0x20] sm:$0xff] %vm1462_vm1, %v2158_v18 }
 0x729   : > { %v5415_v42 = vpop.f32.mrb[44].mxu0 }
 0x72a   : > { %v2139_v16 = vpop.f32.mrb[45].mxu0 }
 0x72b   : > { %v5416_v38 = vpop.f32.mrb[46].mxu0 }
 0x72c   : > { %v2161_v11 = vpack.c.bf16 %v5416_v38, %v5415_v42  ;;  %v2142_v21 = vpop.f32.mrb[47].mxu0 }
 0x72d   : > { %v2160_v26 = vpack.c.bf16 %v2142_v21, %v2139_v16 }
 0x72e   : > { %2169 = vst.msk [vmem:[#allocation2 + $0x38] sm:$0xff] %vm1462_vm1, %v2161_v11 }
 0x72f   : > { %2168 = vst.msk [vmem:[#allocation2 + $0x30] sm:$0xff] %vm1462_vm1, %v2160_v26 }
 0x731   : > { %v2252_v13 = vpop.f32.mrb[48].mxu0 }
 0x732   : > { %v7575_v29 = vadd.f32 %v7572_v51, %v2252_v13  ;;  %v2254_v17 = vpop.f32.mrb[49].mxu0 }
 0x733   : > { %v2355_v5 = vadd.f32 %v7568_v63, %v2254_v17  ;;  %v2256_v20 = vpop.f32.mrb[50].mxu0 }
 0x734   : > { %v7579_v15 = vadd.f32 %v7572_v51, %v2256_v20  ;;  %v2258_v52 = vpop.f32.mrb[51].mxu0 }
 0x735   : > { %v2356_v7 = vadd.f32 %v7568_v63, %v2258_v52  ;;  %2373 = vrot.lane.b32.xlu1 %v2355_v5, %s9288_s27  ;;  %s9425_s27 = smov 369  }
 0x737   : > { %2377 = vrot.lane.b32.xlu0 %v2356_v7, %s9286_s24  ;;  %s9424_s24 = smov 361  }
 0x739   : > { %v2262_v24 = vpop.f32.mrb[52].mxu0 }
 0x73a   : > { %v7585_v54 = vadd.f32 %v7572_v51, %v2262_v24  ;;  %v2264_v31 = vpop.f32.mrb[53].mxu0 }
 0x73b   : > { %v2357_v30 = vadd.f32 %v7568_v63, %v2264_v31  ;;  %v2266_v6 = vpop.f32.mrb[54].mxu0 }
 0x73c   : > { %v7589_v56 = vadd.f32 %v7572_v51, %v2266_v6  ;;  %v2268_v34 = vpop.f32.mrb[55].mxu0 }
 0x73d   : > { %v2358_v53 = vadd.f32 %v7568_v63, %v2268_v34  ;;  %2381 = vrot.lane.b32.xlu1 %v2357_v30, %s9284_s5  ;;  %s9423_s5 = smov 353  }
 0x73f   : > { %2385 = vrot.lane.b32.xlu0 %v2358_v53, %s9282_s8  ;;  %s9422_s8 = smov 345  }
 0x741   : > { %v2272_v33 = vpop.f32.mrb[56].mxu0 }
 0x742   : > { %v7595_v40 = vadd.f32 %v7572_v51, %v2272_v33  ;;  %v2274_v8 = vpop.f32.mrb[57].mxu0 }
 0x743   : > { %v2359_v44 = vadd.f32 %v7568_v63, %v2274_v8  ;;  %v2276_v36 = vpop.f32.mrb[58].mxu0 }
 0x744   : > { %v7599_v59 = vadd.f32 %v7572_v51, %v2276_v36  ;;  %v2278_v19 = vpop.f32.mrb[59].mxu0 }
 0x745   : > { %v2360_v18 = vadd.f32 %v7568_v63, %v2278_v19  ;;  %2389 = vrot.lane.b32.xlu1 %v2359_v44, %s9280_s29  ;;  %s9421_s29 = smov 337  }
 0x747   : > { %2393 = vrot.lane.b32.xlu0 %v2360_v18, %s9416_s28 }
 0x749   : > { %v2282_v42 = vpop.f32.mrb[60].mxu0 }
 0x74a   : > { %v7605_v16 = vadd.f32 %v7572_v51, %v2282_v42  ;;  %v2284_v38 = vpop.f32.mrb[61].mxu0 }
 0x74b   : > { %v2361_v11 = vadd.f32 %v7568_v63, %v2284_v38  ;;  %v2286_v21 = vpop.f32.mrb[62].mxu0 }
 0x74c   : > { %v7609_v26 = vadd.f32 %v7572_v51, %v2286_v21  ;;  %v2288_v13 = vpop.f32.mrb[63].mxu0 }
 0x74d   : > { %v2362_v17 = vadd.f32 %v7568_v63, %v2288_v13  ;;  %2397 = vrot.lane.b32.xlu1 %v2361_v11, %s9417_s23 }
 0x74f   : > { %2401 = vrot.lane.b32.xlu0 %v2362_v17, %s9418_s21 }
 0x751   : > { %v2292_v5 = vpop.f32.mrb[64].mxu0 }
 0x752   : > { %v7615_v20 = vadd.f32 %v7572_v51, %v2292_v5  ;;  %v2294_v52 = vpop.f32.mrb[65].mxu0 }
 0x753   : > { %v2363_v7 = vadd.f32 %v7568_v63, %v2294_v52  ;;  %v2296_v24 = vpop.f32.mrb[66].mxu0 }
 0x754   : > { %v7619_v31 = vadd.f32 %v7572_v51, %v2296_v24  ;;  %v2298_v30 = vpop.f32.mrb[67].mxu0 }
 0x755   : > { %v2364_v6 = vadd.f32 %v7568_v63, %v2298_v30  ;;  %2405 = vrot.lane.b32.xlu1 %v2363_v7, %s9419_s13 }
 0x757   : > { %2409 = vrot.lane.b32.xlu0 %v2364_v6, %s9420_s26 }
 0x759   : > { %v2302_v34 = vpop.f32.mrb[68].mxu0 }
 0x75a   : > { %v7625_v53 = vadd.f32 %v7572_v51, %v2302_v34  ;;  %v2304_v33 = vpop.f32.mrb[69].mxu0 }
 0x75b   : > { %v2365_v8 = vadd.f32 %v7568_v63, %v2304_v33  ;;  %v2306_v44 = vpop.f32.mrb[70].mxu0 }
 0x75c   : > { %v7629_v36 = vadd.f32 %v7572_v51, %v2306_v44  ;;  %v2308_v19 = vpop.f32.mrb[71].mxu0 }
 0x75d   : > { %v2366_v18 = vadd.f32 %v7568_v63, %v2308_v19  ;;  %2413 = vrot.lane.b32.xlu1 %v2365_v8, %s9421_s29 }
 0x75f   : > { %2417 = vrot.lane.b32.xlu0 %v2366_v18, %s9422_s8 }
 0x761   : > { %v2312_v42 = vpop.f32.mrb[72].mxu0 }
 0x762   : > { %v7635_v38 = vadd.f32 %v7572_v51, %v2312_v42  ;;  %v2314_v11 = vpop.f32.mrb[73].mxu0 }
 0x763   : > { %v2367_v21 = vadd.f32 %v7568_v63, %v2314_v11  ;;  %v2316_v13 = vpop.f32.mrb[74].mxu0 }
 0x764   : > { %v7639_v17 = vadd.f32 %v7572_v51, %v2316_v13  ;;  %v2318_v5 = vpop.f32.mrb[75].mxu0 }
 0x765   : > { %v2368_v52 = vadd.f32 %v7568_v63, %v2318_v5  ;;  %2421 = vrot.lane.b32.xlu1 %v2367_v21, %s9423_s5 }
 0x767   : > { %2425 = vrot.lane.b32.xlu0 %v2368_v52, %s9424_s24 }
 0x769   : > { %v2322_v7 = vpop.f32.mrb[76].mxu0 }
 0x76a   : > { %v7645_v24 = vadd.f32 %v7572_v51, %v2322_v7  ;;  %v2324_v30 = vpop.f32.mrb[77].mxu0 }
 0x76b   : > { %v2369_v6 = vadd.f32 %v7568_v63, %v2324_v30  ;;  %v2326_v34 = vpop.f32.mrb[78].mxu0 }
 0x76c   : > { %v7649_v33 = vadd.f32 %v7572_v51, %v2326_v34  ;;  %v2328_v8 = vpop.f32.mrb[79].mxu0 }
 0x76d   : > { %v2370_v44 = vadd.f32 %v7568_v63, %v2328_v8  ;;  %2429 = vrot.lane.b32.xlu1 %v2369_v6, %s9425_s27 }
 0x76f   : > { %2433 = vrot.lane.b32.xlu0 %v2370_v44, %s9426_s19 }
 0x771   : > { %2750 = vrot.lane.b32.xlu1 %v6847_v0, %s9427_s0 }
 0x773   : > { %2748 = vrot.lane.b32.xlu0 %v6833_v10, %s9427_s0 }
 0x775   : > { %2756 = vrot.lane.b32.xlu1 %v6877_v12, %s9427_s0 }
 0x777   : > { %2752 = vrot.lane.b32.xlu0 %v6857_v61, %s9427_s0 }
 0x779   : > { %2758 = vrot.lane.b32.xlu1 %v6887_v37, %s9427_s0 }
 0x77b   : > { %2754 = vrot.lane.b32.xlu0 %v6867_v48, %s9427_s0 }
 0x77d   : > { %2762 = vrot.lane.b32.xlu1 %v6907_v58, %s9427_s0 }
 0x77f   : > { %2760 = vrot.lane.b32.xlu0 %v6897_v39, %s9427_s0 }
 0x7a7   : > { %v7670_v63 = vpop.permute.xlu1 %2373 }
 0x7a8   : > { %v9293_v19 = vrot.slane %v7670_v63, 1 }
 0x7a9   : > { %v2378_v51 = vpop.permute.xlu0 %2377 }
 0x7aa   : > { %v2436_v18 = vrot.slane %v2378_v51, 1 }
 0x7ac   : > { %v2465_v42 = vsel %vm1720_vm2, %v9293_v19, %v2436_v18 }
 0x7ad   : > { %v2467_v11 = vsel %vm1769_vm3, 0.0, %v2465_v42 }
 0x7ae   : > { %v2483_v21 = vsel %vm1737_vm4, %v7670_v63, %v2467_v11 }
 0x7af   : > { %v2382_v13 = vpop.permute.xlu1 %2381  ;;  %v7685_v5 = vadd.f32 %v2483_v21, %v7575_v29 }
 0x7b0   : > { %v2437_v52 = vrot.slane %v2382_v13, 1 }
 0x7b1   : > { %v2386_v7 = vpop.permute.xlu0 %2385  ;;  %2515 = vmax.xlane.f32.xlu1 %v7685_v5 }
 0x7b2   : > { %v2464_v30 = vsel %vm1720_vm2, %v2436_v18, %v2437_v52  ;;  %v2438_v6 = vrot.slane %v2386_v7, 1 }
 0x7b3   : > { %v2468_v34 = vsel %vm1770_vm5, 0.0, %v2464_v30 }
 0x7b4   : > { %v2463_v8 = vsel %vm1720_vm2, %v2437_v52, %v2438_v6  ;;  %v2484_v29 = vsel %vm1738_vm6, %v2378_v51, %v2468_v34 }
 0x7b5   : > { %v7699_v44 = vadd.f32 %v2484_v29, %v7579_v15  ;;  %v2469_v42 = vsel %vm1771_vm7, 0.0, %v2463_v8 }
 0x7b6   : > { %v2485_v18 = vsel %vm9292_vm8, %v2382_v13, %v2469_v42 }
 0x7b7   : > { %2517 = vmax.xlane.f32.xlu0 %v7699_v44  ;;  %v2390_v11 = vpop.permute.xlu1 %2389  ;;  %v7709_v30 = vadd.f32 %v2485_v18, %v7585_v54  ;;  %v9430_v18 = vld [vmem:[#allocation42_spill] sm:$0xff] }
 0x7b8   : > { %v2439_v21 = vrot.slane %v2390_v11, 1  ;;  %vm9431_vm8 = vcmp.le.s32.totalorder %v7051_v32, %v9430_v18 }
 0x7b9   : > { %v2394_v52 = vpop.permute.xlu0 %2393 }
 0x7ba   : > { %v2462_v15 = vsel %vm1720_vm2, %v2438_v6, %v2439_v21  ;;  %v2440_v51 = vrot.slane %v2394_v52, 1 }
 0x7bb   : > { %2519 = vmax.xlane.f32.xlu0 %v7709_v30  ;;  %v2470_v34 = vsel %vm9298_vm9, 0.0, %v2462_v15 }
 0x7bc   : > { %v2461_v13 = vsel %vm1720_vm2, %v2439_v21, %v2440_v51  ;;  %v2486_v29 = vsel %vm9297_vm10, %v2386_v7, %v2470_v34  ;;  %v9432_v34 = vld [vmem:[#allocation46_spill] sm:$0xff] }
 0x7bd   : > { %v7723_v54 = vadd.f32 %v2486_v29, %v7589_v56  ;;  %v2471_v6 = vsel %vm9296_vm11, 0.0, %v2461_v13  ;;  %vm9433_vm11 = vcmp.eq.s32.totalorder %v7051_v32, %v9432_v34  ;;  %v9434_v29 = vld [vmem:[#allocation44_spill] sm:$0xff] }
 0x7be   : > { %v2487_v19 = vsel %vm9431_vm8, %v2390_v11, %v2471_v6  ;;  %vm9435_vm8 = vcmp.le.s32.totalorder %v7051_v32, %v9434_v29  ;;  %v9436_v6 = vld [vmem:[#allocation47_spill] sm:$0xff] }
 0x7bf   : > { %2521 = vmax.xlane.f32.xlu1 %v7723_v54  ;;  %v2398_v15 = vpop.permute.xlu1 %2397  ;;  %v7733_v21 = vadd.f32 %v2487_v19, %v7595_v40  ;;  %vm9437_vm10 = vcmp.eq.s32.totalorder %v7051_v32, %v9436_v6 }
 0x7c0   : > { %v2441_v2 = vrot.slane %v2398_v15, 1 }
 0x7c1   : > { %v2402_v8 = vpop.permute.xlu0 %2401  ;;  %2523 = vmax.xlane.f32.xlu0 %v7733_v21 }
 0x7c2   : > { %v2460_v56 = vsel %vm1720_vm2, %v2440_v51, %v2441_v2  ;;  %v2442_v7 = vrot.slane %v2402_v8, 1  ;;  %v9438_v51 = vld [vmem:[#allocation45_spill] sm:$0xff] }
 0x7c3   : > { %v2472_v13 = vsel %vm9433_vm11, 0.0, %v2460_v56  ;;  %vm9439_vm9 = vcmp.le.s32.totalorder %v7051_v32, %v9438_v51 }
 0x7c4   : > { %v2459_v11 = vsel %vm1720_vm2, %v2441_v2, %v2442_v7  ;;  %v2488_v40 = vsel %vm9435_vm8, %v2394_v52, %v2472_v13  ;;  %v9440_v13 = vld [vmem:[#allocation49_spill] sm:$0xff] }
 0x7c5   : > { %v7747_v19 = vadd.f32 %v2488_v40, %v7599_v59  ;;  %v2473_v18 = vsel %vm9437_vm10, 0.0, %v2459_v11  ;;  %vm9441_vm10 = vcmp.eq.s32.totalorder %v7051_v32, %v9440_v13  ;;  %v9444_v40 = vld [vmem:[#allocation52_spill] sm:$0xff] }
 0x7c6   : > { %v2489_v42 = vsel %vm9439_vm9, %v2398_v15, %v2473_v18  ;;  %v9442_v15 = vld [vmem:[#allocation48_spill] sm:$0xff]  ;;  %vm9445_vm11 = vcmp.eq.s32.totalorder %v7051_v32, %v9444_v40 }
 0x7c7   : > { %2525 = vmax.xlane.f32.xlu1 %v7747_v19  ;;  %v2406_v56 = vpop.permute.xlu1 %2405  ;;  %v7757_v2 = vadd.f32 %v2489_v42, %v7605_v16  ;;  %vm9443_vm9 = vcmp.le.s32.totalorder %v7051_v32, %v9442_v15 }
 0x7c8   : > { %v2443_v34 = vrot.slane %v2406_v56, 1 }
 0x7c9   : > { %v2410_v29 = vpop.permute.xlu0 %2409  ;;  %2527 = vmax.xlane.f32.xlu0 %v7757_v2 }
 0x7ca   : > { %v2458_v59 = vsel %vm1720_vm2, %v2442_v7, %v2443_v34  ;;  %v2444_v52 = vrot.slane %v2410_v29, 1  ;;  %v9446_v7 = vld [vmem:[#allocation50_spill] sm:$0xff] }
 0x7cb   : > { %v2474_v11 = vsel %vm9441_vm10, 0.0, %v2458_v59  ;;  %vm9447_vm8 = vcmp.le.s32.totalorder %v7051_v32, %v9446_v7 }
 0x7cc   : > { %v2457_v18 = vsel %vm1720_vm2, %v2443_v34, %v2444_v52  ;;  %v2490_v16 = vsel %vm9443_vm9, %v2402_v8, %v2474_v11  ;;  %v9448_v11 = vld [vmem:[#allocation53_spill] sm:$0xff] }
 0x7cd   : > { %v7771_v42 = vadd.f32 %v2490_v16, %v7609_v26  ;;  %v2475_v51 = vsel %vm9445_vm11, 0.0, %v2457_v18  ;;  %vm9449_vm10 = vcmp.eq.s32.totalorder %v7051_v32, %v9448_v11  ;;  %v9452_v16 = vld [vmem:[#allocation55_spill] sm:$0xff] }
 0x7ce   : > { %v2491_v6 = vsel %vm9447_vm8, %v2406_v56, %v2475_v51  ;;  %v9450_v56 = vld [vmem:[#allocation51_spill] sm:$0xff]  ;;  %vm9453_vm11 = vcmp.eq.s32.totalorder %v7051_v32, %v9452_v16 }
 0x7cf   : > { %2529 = vmax.xlane.f32.xlu1 %v7771_v42  ;;  %v2414_v59 = vpop.permute.xlu1 %2413  ;;  %v7781_v34 = vadd.f32 %v2491_v6, %v7615_v20  ;;  %vm9451_vm9 = vcmp.le.s32.totalorder %v7051_v32, %v9450_v56 }
 0x7d0   : > { %v2445_v13 = vrot.slane %v2414_v59, 1 }
 0x7d1   : > { %v2418_v15 = vpop.permute.xlu0 %2417  ;;  %2531 = vmax.xlane.f32.xlu0 %v7781_v34 }
 0x7d2   : > { %v2456_v26 = vsel %vm1720_vm2, %v2444_v52, %v2445_v13  ;;  %v2446_v8 = vrot.slane %v2418_v15, 1  ;;  %v9454_v52 = vld [vmem:[#allocation54_spill] sm:$0xff] }
 0x7d3   : > { %v2476_v18 = vsel %vm9449_vm10, 0.0, %v2456_v26  ;;  %vm9455_vm8 = vcmp.le.s32.totalorder %v7051_v32, %v9454_v52 }
 0x7d4   : > { %v2455_v51 = vsel %vm1720_vm2, %v2445_v13, %v2446_v8  ;;  %v2492_v20 = vsel %vm9451_vm9, %v2410_v29, %v2476_v18  ;;  %v9456_v18 = vld [vmem:[#allocation58_spill] sm:$0xff] }
 0x7d5   : > { %v7795_v6 = vadd.f32 %v2492_v20, %v7619_v31  ;;  %v2477_v7 = vsel %vm9453_vm11, 0.0, %v2455_v51  ;;  %vm9457_vm10 = vcmp.eq.s32.totalorder %v7051_v32, %v9456_v18  ;;  %v9460_v20 = vld [vmem:[#allocation59_spill] sm:$0xff] }
 0x7d6   : > { %v2493_v40 = vsel %vm9455_vm8, %v2414_v59, %v2477_v7  ;;  %v9458_v59 = vld [vmem:[#allocation56_spill] sm:$0xff]  ;;  %vm9461_vm11 = vcmp.eq.s32.totalorder %v7051_v32, %v9460_v20 }
 0x7d7   : > { %2533 = vmax.xlane.f32.xlu1 %v7795_v6  ;;  %v2422_v26 = vpop.permute.xlu1 %2421  ;;  %v7805_v13 = vadd.f32 %v2493_v40, %v7625_v53  ;;  %vm9459_vm9 = vcmp.le.s32.totalorder %v7051_v32, %v9458_v59 }
 0x7d8   : > { %v2447_v11 = vrot.slane %v2422_v26, 1 }
 0x7d9   : > { %v2426_v56 = vpop.permute.xlu0 %2425  ;;  %2535 = vmax.xlane.f32.xlu0 %v7805_v13 }
 0x7da   : > { %v2454_v31 = vsel %vm1720_vm2, %v2446_v8, %v2447_v11  ;;  %v2448_v29 = vrot.slane %v2426_v56, 1  ;;  %v9462_v8 = vld [vmem:[#allocation57_spill] sm:$0xff] }
 0x7db   : > { %v2478_v51 = vsel %vm9457_vm10, 0.0, %v2454_v31  ;;  %vm9463_vm8 = vcmp.le.s32.totalorder %v7051_v32, %v9462_v8  ;;  %vm9464_vm10 = vcmp.eq.s32.totalorder %v7051_v32, %v7326_v4 }
 0x7dc   : > { %v2453_v7 = vsel %vm1720_vm2, %v2447_v11, %v2448_v29  ;;  %v2494_v53 = vsel %vm9459_vm9, %v2418_v15, %v2478_v51  ;;  %vm9493_vm9 = vcmp.le.s32.totalorder %v7051_v32, %v7069_v62 }
 0x7dd   : > { %v7819_v40 = vadd.f32 %v2494_v53, %v7629_v36  ;;  %v2479_v52 = vsel %vm9461_vm11, 0.0, %v2453_v7 }
 0x7de   : > { %v2495_v16 = vsel %vm9463_vm8, %v2422_v26, %v2479_v52  ;;  %v9465_v26 = vrot.slane %v7670_v63, 1 }
 0x7df   : > { %2537 = vmax.xlane.f32.xlu1 %v7819_v40  ;;  %v2430_v31 = vpop.permute.xlu1 %2429  ;;  %v7829_v11 = vadd.f32 %v2495_v16, %v7635_v38 }
 0x7e0   : > { %v2449_v18 = vrot.slane %v2430_v31, 1 }
 0x7e1   : > { %v2434_v59 = vpop.permute.xlu0 %2433  ;;  %2539 = vmax.xlane.f32.xlu0 %v7829_v11 }
 0x7e2   : > { %v2452_v36 = vsel %vm1720_vm2, %v2448_v29, %v2449_v18  ;;  %v2450_v15 = vrot.slane %v2434_v59, 1 }
 0x7e3   : > { %v2480_v51 = vsel %vm9464_vm10, 0.0, %v2452_v36  ;;  %v9579_v36 = vld [vmem:[#allocation29_spill] sm:$0xff] }
 0x7e4   : > { %v2451_v52 = vsel %vm1720_vm2, %v2449_v18, %v2450_v15  ;;  %v2466_v38 = vsel %vm1720_vm2, %v2450_v15, %v9465_v26  ;;  %v2496_v16 = vsel %vm1750_vm15, %v2426_v56, %v2480_v51  ;;  %v2751_v15 = vpop.permute.xlu1 %2750 }
 0x7e5   : > { %v2482_v29 = vsel %vm1784_vm0, 0.0, %v2466_v38  ;;  %v2749_v7 = vpop.permute.xlu0 %2748  ;;  %v7850_v53 = vadd.f32 %v2496_v16, %v7639_v17  ;;  %v2481_v18 = vsel %vm1783_vm13, 0.0, %v2451_v52 }
 0x7e6   : > { %v2498_v63 = vsel %vm1752_vm12, %v2434_v59, %v2482_v29  ;;  %5417 = vmatprep.subr.bf16.mxu1 %v2749_v7  ;;  %v2497_v56 = vsel %vm1751_vm14, %v2430_v31, %v2481_v18 }
 0x7e7   : > { %5418 = vmatpush3.bf16.msra.mxu1 %v2749_v7  ;;  %2541 = vmax.xlane.f32.xlu1 %v7850_v53  ;;  %v7863_v17 = vadd.f32 %v2497_v56, %v7645_v24  ;;  %v7867_v52 = vadd.f32 %v2498_v63, %v7649_v33  ;;  %v1091_v24 = vld [vmem:[%s9180_s7 + $0x48] sm:$0xff]  ;;  %v1090_v33 = vld [vmem:[%s9180_s7 + $0x40] sm:$0xff] }
 0x7e8   : > { %5419 = vmatprep.subr.bf16.mxu1 %v2751_v15  ;;  %v2757_v31 = vpop.permute.xlu1 %2756 }
 0x7e9   : > { %v2753_v51 = vpop.permute.xlu0 %2752  ;;  %2543 = vmax.xlane.f32.xlu0 %v7863_v17 }
 0x7eb   : > { %2545 = vmax.xlane.f32.xlu1 %v7867_v52  ;;  %5420 = vmatpush3.bf16.msra.mxu1 %v2751_v15 }
 0x7ec   : > { %5421 = vmatprep.subr.bf16.mxu1 %v2753_v51  ;;  %v2759_v26 = vpop.permute.xlu1 %2758 }
 0x7ed   : > { %v2755_v59 = vpop.permute.xlu0 %2754 }
 0x7ef   : > { %5422 = vmatpush3.bf16.msra.mxu1 %v2753_v51 }
 0x7f0   : > { %5423 = vmatprep.subr.bf16.mxu1 %v2755_v59  ;;  %v2763_v16 = vpop.permute.xlu1 %2762 }
 0x7f1   : > { %v2761_v38 = vpop.permute.xlu0 %2760 }
 0x7f3   : > { %5424 = vmatpush3.bf16.msra.mxu1 %v2755_v59 }
 0x7f4   : > { %5425 = vmatprep.subr.bf16.mxu1 %v2757_v31 }
 0x7f7   : > { %5426 = vmatpush3.bf16.msra.mxu1 %v2757_v31 }
 0x7f8   : > { %5427 = vmatprep.subr.bf16.mxu1 %v2759_v26 }
 0x7fb   : > { %5428 = vmatpush3.bf16.msra.mxu1 %v2759_v26 }
 0x7fc   : > { %1145 = vperm.xlu1 %5656, %v1091_v24   ;;  %5429 = vmatprep.subr.bf16.mxu1 %v2761_v38 }
 0x7ff   : > { %1140 = vperm.xlu0 %5657, %v1090_v33   ;;  %5430 = vmatpush3.bf16.msra.mxu1 %v2761_v38 }
 0x800   : > { %5431 = vmatprep.subr.bf16.mxu1 %v2763_v16 }
 0x803   : > { %5432 = vmatpush3.bf16.msra.mxu1 %v2763_v16 }
 0x83e   : > { %v2516_v29 = vpop.xlane.xlu1 %2515 }
 0x83f   : > { %v2547_v7 = vsub.f32 %v7685_v5, %v2516_v29 }
 0x841   : > { %v2563_v18 = vmul.f32 1.442695, %v2547_v7 }
 0x843   : > { %5802 = vpow2.f32 %v2563_v18 }
 0x844   : > { %v2518_v63 = vpop.xlane.xlu0 %2517 }
 0x845   : > { %v2548_v56 = vsub.f32 %v7699_v44, %v2518_v63 }
 0x847   : > { %v2565_v15 = vmul.f32 1.442695, %v2548_v56 }
 0x848   : > { %v2520_v51 = vpop.xlane.xlu0 %2519 }
 0x849   : > { %5804 = vpow2.f32 %v2565_v15  ;;  %v2549_v59 = vsub.f32 %v7709_v30, %v2520_v51 }
 0x84b   : > { %v2567_v31 = vmul.f32 1.442695, %v2549_v59 }
 0x84c   : > { %v2522_v26 = vpop.xlane.xlu1 %2521 }
 0x84d   : > { %v7879_v24 = vpop.eup %5802  ;;  %5806 = vpow2.f32 %v2567_v31  ;;  %v2550_v38 = vsub.f32 %v7723_v54, %v2522_v26 }
 0x84e   : > { %v2524_v33 = vpop.xlane.xlu0 %2523  ;;  %2595 = vadd.xlane.f32.xlu1 %v7879_v24 }
 0x84f   : > { %v2569_v5 = vmul.f32 1.442695, %v2550_v38  ;;  %v2551_v16 = vsub.f32 %v7733_v21, %v2524_v33 }
 0x851   : > { %5808 = vpow2.f32 %v2569_v5  ;;  %v2571_v44 = vmul.f32 1.442695, %v2551_v16 }
 0x853   : > { %v7884_v29 = vpop.eup %5804  ;;  %5810 = vpow2.f32 %v2571_v44 }
 0x854   : > { %2597 = vadd.xlane.f32.xlu1 %v7884_v29  ;;  %v2526_v30 = vpop.xlane.xlu1 %2525 }
 0x855   : > { %v2552_v7 = vsub.f32 %v7747_v19, %v2526_v30 }
 0x856   : > { %v2528_v18 = vpop.xlane.xlu0 %2527 }
 0x857   : > { %v7888_v63 = vpop.eup %5806  ;;  %v2573_v54 = vmul.f32 1.442695, %v2552_v7  ;;  %v2553_v56 = vsub.f32 %v7757_v2, %v2528_v18 }
 0x858   : > { %2599 = vadd.xlane.f32.xlu1 %v7888_v63 }
 0x859   : > { %5812 = vpow2.f32 %v2573_v54  ;;  %v2575_v21 = vmul.f32 1.442695, %v2553_v56 }
 0x85b   : > { %v7892_v15 = vpop.eup %5808  ;;  %5814 = vpow2.f32 %v2575_v21 }
 0x85c   : > { %2601 = vadd.xlane.f32.xlu1 %v7892_v15  ;;  %v2530_v51 = vpop.xlane.xlu1 %2529 }
 0x85d   : > { %v7895_v59 = vpop.eup %5810  ;;  %v2554_v19 = vsub.f32 %v7771_v42, %v2530_v51 }
 0x85e   : > { %v2532_v31 = vpop.xlane.xlu0 %2531  ;;  %2603 = vadd.xlane.f32.xlu0 %v7895_v59 }
 0x85f   : > { %v2577_v26 = vmul.f32 1.442695, %v2554_v19  ;;  %v2555_v2 = vsub.f32 %v7781_v34, %v2532_v31 }
 0x861   : > { %5816 = vpow2.f32 %v2577_v26  ;;  %v2579_v38 = vmul.f32 1.442695, %v2555_v2 }
 0x863   : > { %v7900_v33 = vpop.eup %5812  ;;  %5818 = vpow2.f32 %v2579_v38  ;;  %v5694_v38 = vld [vmem:[#allocation6 + $0x20] sm:$0xff]  }
 0x864   : > { %2605 = vadd.xlane.f32.xlu1 %v7900_v33  ;;  %v2534_v5 = vpop.xlane.xlu1 %2533  ;;  %2958 = vmatprep.subr.bf16.mxu1 %v5694_v38 }
 0x865   : > { %v7903_v16 = vpop.eup %5814  ;;  %v2556_v44 = vsub.f32 %v7795_v6, %v2534_v5 }
 0x866   : > { %v2536_v30 = vpop.xlane.xlu0 %2535  ;;  %2607 = vadd.xlane.f32.xlu0 %v7903_v16 }
 0x867   : > { %v2581_v42 = vmul.f32 1.442695, %v2556_v44  ;;  %v2557_v7 = vsub.f32 %v7805_v13, %v2536_v30 }
 0x869   : > { %5820 = vpow2.f32 %v2581_v42  ;;  %v2583_v34 = vmul.f32 1.442695, %v2557_v7 }
 0x86b   : > { %v7908_v18 = vpop.eup %5816  ;;  %5822 = vpow2.f32 %v2583_v34 }
 0x86c   : > { %2609 = vadd.xlane.f32.xlu0 %v7908_v18  ;;  %v2538_v54 = vpop.xlane.xlu1 %2537 }
 0x86d   : > { %v2558_v56 = vsub.f32 %v7819_v40, %v2538_v54  ;;  %v7912_v51 = vpop.eup %5818 }
 0x86e   : > { %v2540_v21 = vpop.xlane.xlu0 %2539 }
 0x86f   : > { %v2585_v6 = vmul.f32 1.442695, %v2558_v56  ;;  %v2559_v19 = vsub.f32 %v7829_v11, %v2540_v21 }
 0x870   : > { %2611 = vadd.xlane.f32.xlu0 %v7912_v51 }
 0x871   : > { %5824 = vpow2.f32 %v2585_v6  ;;  %v2587_v13 = vmul.f32 1.442695, %v2559_v19  ;;  %v9468_v19 = vld [vmem:[#allocation33_spill] sm:$0xff] }
 0x873   : > { %v7916_v31 = vpop.eup %5820  ;;  %5826 = vpow2.f32 %v2587_v13 }
 0x874   : > { %2613 = vadd.xlane.f32.xlu1 %v7916_v31  ;;  %v2542_v26 = vpop.xlane.xlu1 %2541 }
 0x875   : > { %v7919_v2 = vpop.eup %5822  ;;  %v2560_v40 = vsub.f32 %v7850_v53, %v2542_v26 }
 0x876   : > { %v2544_v5 = vpop.xlane.xlu0 %2543  ;;  %2615 = vadd.xlane.f32.xlu0 %v7919_v2 }
 0x877   : > { %v2589_v44 = vmul.f32 1.442695, %v2560_v40  ;;  %v2561_v11 = vsub.f32 %v7863_v17, %v2544_v5  ;;  %v9467_v17 = vld [vmem:[#allocation35_spill] sm:$0xff] }
 0x878   : > { %v2546_v30 = vpop.xlane.xlu1 %2545  ;;  %v1092_v5 = vld [vmem:[%s9180_s7 + $0x50] sm:$0xff] }
 0x879   : > { %5828 = vpow2.f32 %v2589_v44  ;;  %v2591_v42 = vmul.f32 1.442695, %v2561_v11  ;;  %v2562_v7 = vsub.f32 %v7867_v52, %v2546_v30  ;;  %v1093_v44 = vld [vmem:[%s9180_s7 + $0x58] sm:$0xff] }
 0x87b   : > { %v7925_v34 = vpop.eup %5824  ;;  %5830 = vpow2.f32 %v2591_v42  ;;  %v2593_v54 = vmul.f32 1.442695, %v2562_v7 }
 0x87c   : > { %2617 = vadd.xlane.f32.xlu0 %v7925_v34  ;;  %v1146_v53 = vpop.permute.xlu1 %1145 }
 0x87d   : > { %v7928_v56 = vpop.eup %5826  ;;  %5832 = vpow2.f32 %v2593_v54  ;;  %v1296_v6 = vadd.f32 %v9467_v17, %v1146_v53 }
 0x87e   : > { %v1141_v21 = vpop.permute.xlu0 %1140  ;;  %2619 = vadd.xlane.f32.xlu1 %v7928_v56 }
 0x87f   : > { %v1293_v13 = vadd.f32 %v9468_v19, %v1141_v21 }
 0x881   : > { %v1327_v26 = vpack.c.bf16 %v1296_v6, %v1293_v13 }
 0x883   : > { %v7933_v40 = vpop.eup %5828 }
 0x884   : > { %2621 = vadd.xlane.f32.xlu0 %v7933_v40 }
 0x885   : > { %v7936_v52 = vpop.eup %5830 }
 0x886   : > { %2623 = vadd.xlane.f32.xlu1 %v7936_v52 }
 0x887   : > { %v7939_v38 = vpop.eup %5832 }
 0x888   : > { %2625 = vadd.xlane.f32.xlu0 %v7939_v38 }
 0x897   : > { %1150 = vperm.xlu1 %5656, %v1092_v5  }
 0x89b   : > { %2918 = vrot.lane.b32.xlu1 %v6831_v43, %s9301_s3 }
 0x89e   : > { %1155 = vperm.xlu0 %5657, %v1093_v44  }
 0x89f   : > { %2922 = vrot.lane.b32.xlu1 %v6855_v60, %s9301_s3 }
 0x8a2   : > { %2920 = vrot.lane.b32.xlu0 %v6845_v25, %s9301_s3 }
 0x8a3   : > { %2926 = vrot.lane.b32.xlu1 %v6875_v55, %s9301_s3 }
 0x8a6   : > { %2924 = vrot.lane.b32.xlu0 %v6865_v9, %s9301_s3 }
 0x8a7   : > { %2930 = vrot.lane.b32.xlu1 %v6895_v49, %s9301_s3 }
 0x8aa   : > { %2928 = vrot.lane.b32.xlu0 %v6885_v35, %s9301_s3 }
 0x8ae   : > { %2932 = vrot.lane.b32.xlu0 %v6905_v57, %s9301_s3  ;;  %v5695_v57 = vld [vmem:[#allocation6 + $0x28] sm:$0xff]   ;;  %s9491_s3 = smov 289  }
 0x8db   : > { %v2596_v11 = vpop.xlane.xlu1 %2595 }
 0x8dc   : > { %5834 = vrcp.f32 %v2596_v11 }
 0x8e1   : > { %v2598_v30 = vpop.xlane.xlu1 %2597 }
 0x8e2   : > { %5836 = vrcp.f32 %v2598_v30 }
 0x8e5   : > { %v2600_v42 = vpop.xlane.xlu1 %2599 }
 0x8e6   : > { %5838 = vrcp.f32 %v2600_v42  ;;  %v5835_v54 = vpop.eup %5834 }
 0x8e7   : > { %v2643_v17 = vmul.f32 %v5835_v54, %v7879_v24 }
 0x8e9   : > { %v2602_v7 = vpop.xlane.xlu1 %2601 }
 0x8ea   : > { %5840 = vrcp.f32 %v2602_v7 }
 0x8eb   : > { %v2604_v21 = vpop.xlane.xlu0 %2603 }
 0x8ec   : > { %v5837_v53 = vpop.eup %5836  ;;  %5842 = vrcp.f32 %v2604_v21 }
 0x8ed   : > { %v2644_v6 = vmul.f32 %v5837_v53, %v7884_v29 }
 0x8ef   : > { %v2659_v19 = vpack.c.bf16 %v2644_v6, %v2643_v17 }
 0x8f0   : > { %v5839_v5 = vpop.eup %5838 }
 0x8f1   : > { %5204 = vst [vmem:[%s7508_s25 + $0x40] sm:$0xff] %v2659_v19   ;;  %5433 = vmatprep.mubr.bf16.mxu1 %v2659_v19  ;;  %v2606_v13 = vpop.xlane.xlu1 %2605  ;;  %v2645_v11 = vmul.f32 %v5839_v5, %v7888_v63 }
 0x8f2   : > { %5844 = vrcp.f32 %v2606_v13 }
 0x8f3   : > { %v2608_v42 = vpop.xlane.xlu0 %2607 }
 0x8f4   : > { %v5841_v44 = vpop.eup %5840  ;;  %5846 = vrcp.f32 %v2608_v42 }
 0x8f5   : > { %v2646_v30 = vmul.f32 %v5841_v44, %v7892_v15 }
 0x8f6   : > { %v5843_v29 = vpop.eup %5842 }
 0x8f7   : > { %v2660_v7 = vpack.c.bf16 %v2646_v30, %v2645_v11  ;;  %v2647_v21 = vmul.f32 %v5843_v29, %v7895_v59 }
 0x8f9   : > { %v2610_v24 = vpop.xlane.xlu0 %2609  ;;  %5205 = vst [vmem:[%s7508_s25 + $0x48] sm:$0xff] %v2660_v7   ;;  %5434 = vmatmul.mubr.bf16.vlgmr.msra.gmra.mrb[52].mxu1 %v2660_v7 }
 0x8fa   : > { %5848 = vrcp.f32 %v2610_v24  ;;  %2959 = vmatpush1.bf16.msra.mxu1 %v1327_v26 }
 0x8fb   : > { %2960 = vmatprep.subr.bf16.mxu1 %v5695_v57 }
 0x8fc   : > { %v5845_v54 = vpop.eup %5844 }
 0x8fd   : > { %v2612_v53 = vpop.xlane.xlu0 %2611  ;;  %v2648_v63 = vmul.f32 %v5845_v54, %v7900_v33 }
 0x8fe   : > { %5850 = vrcp.f32 %v2612_v53  ;;  %v5847_v6 = vpop.eup %5846 }
 0x8ff   : > { %v2661_v15 = vpack.c.bf16 %v2648_v63, %v2647_v21  ;;  %v2649_v5 = vmul.f32 %v5847_v6, %v7903_v16 }
 0x901   : > { %5206 = vst [vmem:[%s7508_s25 + $0x50] sm:$0xff] %v2661_v15   ;;  %5437 = vmatprep.mubr.bf16.mxu1 %v2661_v15  ;;  %v2614_v17 = vpop.xlane.xlu1 %2613 }
 0x902   : > { %5852 = vrcp.f32 %v2614_v17 }
 0x903   : > { %v2616_v13 = vpop.xlane.xlu0 %2615 }
 0x904   : > { %v5849_v19 = vpop.eup %5848  ;;  %5854 = vrcp.f32 %v2616_v13 }
 0x905   : > { %v2650_v57 = vmul.f32 %v5849_v19, %v7908_v18 }
 0x907   : > { %v2662_v26 = vpack.c.bf16 %v2650_v57, %v2649_v5  ;;  %v9469_v5 = vld [vmem:[#allocation32_spill] sm:$0xff] }
 0x908   : > { %v5851_v33 = vpop.eup %5850 }
 0x909   : > { %v2618_v59 = vpop.xlane.xlu0 %2617  ;;  %5207 = vst [vmem:[%s7508_s25 + $0x58] sm:$0xff] %v2662_v26   ;;  %5438 = vmatmul.mubr.bf16.gmra.mrb[56].mxu1 %v2662_v26  ;;  %v2651_v30 = vmul.f32 %v5851_v33, %v7912_v51 }
 0x90a   : > { %5856 = vrcp.f32 %v2618_v59 }
 0x90b   : > { %v2620_v11 = vpop.xlane.xlu1 %2619 }
 0x90c   : > { %v5853_v44 = vpop.eup %5852  ;;  %5858 = vrcp.f32 %v2620_v11 }
 0x90d   : > { %v2652_v42 = vmul.f32 %v5853_v44, %v7916_v31 }
 0x90e   : > { %v5855_v18 = vpop.eup %5854 }
 0x90f   : > { %v2663_v7 = vpack.c.bf16 %v2652_v42, %v2651_v30  ;;  %v2653_v53 = vmul.f32 %v5855_v18, %v7919_v2  ;;  %v9470_v2 = vld [vmem:[#allocation34_spill] sm:$0xff] }
 0x911   : > { %v2622_v16 = vpop.xlane.xlu0 %2621  ;;  %5208 = vst [vmem:[%s7508_s25 + $0x60] sm:$0xff] %v2663_v7   ;;  %5441 = vmatprep.mubr.bf16.mxu1 %v2663_v7 }
 0x912   : > { %5860 = vrcp.f32 %v2622_v16 }
 0x913   : > { %v2624_v24 = vpop.xlane.xlu1 %2623 }
 0x914   : > { %v5857_v29 = vpop.eup %5856  ;;  %5862 = vrcp.f32 %v2624_v24 }
 0x915   : > { %v2626_v54 = vpop.xlane.xlu0 %2625  ;;  %v2654_v21 = vmul.f32 %v5857_v29, %v7925_v34 }
 0x916   : > { %5864 = vrcp.f32 %v2626_v54  ;;  %v5859_v31 = vpop.eup %5858 }
 0x917   : > { %v2664_v51 = vpack.c.bf16 %v2654_v21, %v2653_v53  ;;  %v1151_v63 = vpop.permute.xlu1 %1150  ;;  %v2655_v6 = vmul.f32 %v5859_v31, %v7928_v56 }
 0x918   : > { %v1301_v57 = vadd.f32 %v9469_v5, %v1151_v63 }
 0x919   : > { %5209 = vst [vmem:[%s7508_s25 + $0x68] sm:$0xff] %v2664_v51   ;;  %5442 = vmatmul.mubr.bf16.gmra.mrb[60].mxu1 %v2664_v51 }
 0x91b   : > { %v2919_v56 = vpop.permute.xlu1 %2918 }
 0x91c   : > { %v5861_v15 = vpop.eup %5860 }
 0x91d   : > { %v1156_v17 = vpop.permute.xlu0 %1155  ;;  %v2656_v19 = vmul.f32 %v5861_v15, %v7933_v40 }
 0x91e   : > { %v5863_v13 = vpop.eup %5862  ;;  %v1304_v26 = vadd.f32 %v9470_v2, %v1156_v17 }
 0x91f   : > { %v2665_v34 = vpack.c.bf16 %v2656_v19, %v2655_v6  ;;  %v2657_v44 = vmul.f32 %v5863_v13, %v7936_v52  ;;  %v2923_v42 = vpop.permute.xlu1 %2922 }
 0x920   : > { %v5865_v59 = vpop.eup %5864  ;;  %v1328_v33 = vpack.c.bf16 %v1304_v26, %v1301_v57 }
 0x921   : > { %5210 = vst [vmem:[%s7508_s25 + $0x70] sm:$0xff] %v2665_v34   ;;  %5445 = vmatprep.mubr.bf16.mxu1 %v2665_v34  ;;  %v2658_v11 = vmul.f32 %v5865_v59, %v7939_v38  ;;  %v2921_v40 = vpop.permute.xlu0 %2920 }
 0x922   : > { %2961 = vmatpush1.bf16.msra.mxu1 %v1328_v33 }
 0x923   : > { %v2666_v30 = vpack.c.bf16 %v2658_v11, %v2657_v44  ;;  %v2927_v38 = vpop.permute.xlu1 %2926  ;;  %v3073_v11 = vsub.s32 2, %v6810_v14 }
 0x925   : > { %5211 = vst [vmem:[%s7508_s25 + $0x78] sm:$0xff] %v2666_v30   ;;  %5446 = vmatmul.mubr.bf16.gmra.mrb[64].mxu1 %v2666_v30  ;;  %v2925_v52 = vpop.permute.xlu0 %2924 }
 0x926   : > { %2990 = vmatprep.mubr.bf16.mxu1 %v9415_v23 }
 0x927   : > { %v2931_v16 = vpop.permute.xlu1 %2930 }
 0x929   : > { %v2929_v7 = vpop.permute.xlu0 %2928 }
 0x92d   : > { %4873 = vmatmul.mubr.msk.bf16.vlgmr.msra.gmra.mrb[68].mxu1 %vm1462_vm1, %v2919_v56  ;;  %v2933_v18 = vpop.permute.xlu0 %2932 }
 0x92e   : > { %3000 = vmatprep.mubr.bf16.mxu1 %v9415_v23 }
 0x935   : > { %4874 = vmatmul.mubr.msk.bf16.gmra.mrb[72].mxu1 %vm1462_vm1, %v2921_v40 }
 0x936   : > { %3010 = vmatprep.mubr.bf16.mxu1 %v9415_v23 }
 0x93d   : > { %4875 = vmatmul.mubr.msk.bf16.gmra.mrb[76].mxu1 %vm1462_vm1, %v2923_v42  ;;  %v8056_v42 = vrot.slane %v7564_v22, %v3073_v11 }
 0x93e   : > { %3020 = vmatprep.mubr.bf16.mxu1 %v9415_v23 }
 0x945   : > { %4876 = vmatmul.mubr.msk.bf16.gmra.mrb[80].mxu1 %vm1462_vm1, %v2925_v52  ;;  %v8059_v52 = vrot.slane %v6958_v45, %v3073_v11 }
 0x946   : > { %3030 = vmatprep.mubr.bf16.mxu1 %v9415_v23 }
 0x94d   : > { %4877 = vmatmul.mubr.msk.bf16.gmra.mrb[84].mxu1 %vm1462_vm1, %v2927_v38 }
 0x94e   : > { %3040 = vmatprep.mubr.bf16.mxu1 %v9415_v23 }
 0x955   : > { %4878 = vmatmul.mubr.msk.bf16.gmra.mrb[88].mxu1 %vm1462_vm1, %v2929_v7 }
 0x956   : > { %3050 = vmatprep.mubr.bf16.mxu1 %v9415_v23 }
 0x95d   : > { %4879 = vmatmul.mubr.msk.bf16.gmra.mrb[92].mxu1 %vm1462_vm1, %v2931_v16 }
 0x95e   : > { %3060 = vmatprep.mubr.bf16.mxu1 %v9415_v23 }
 0x965   : > { %4880 = vmatmul.mubr.msk.bf16.gmra.mrb[96].mxu1 %vm1462_vm1, %v2933_v18 }
 0x9cc   : > { %v8006_v24 = vpop.f32.mrb[52].mxu1 }
 0x9cd   : > { %9471 = vst [vmem:[#allocation59_spill] sm:$0xff] %v8006_v24  ;;  %v8008_v29 = vpop.f32.mrb[53].mxu1 }
 0x9ce   : > { %9472 = vst [vmem:[#allocation57_spill] sm:$0xff] %v8008_v29  ;;  %v8010_v54 = vpop.f32.mrb[54].mxu1 }
 0x9cf   : > { %9473 = vst [vmem:[#allocation60_spill] sm:$0xff] %v8010_v54  ;;  %v8014_v21 = vpop.f32.mrb[55].mxu1  ;;  %v9500_v54 = vld [vmem:[#allocation42_spill] sm:$0xff] }
 0x9d0   : > { %9474 = vst [vmem:[#allocation35_spill] sm:$0xff] %v8014_v21 }
 0x9dc   : > { %v8018_v31 = vpop.f32.mrb[56].mxu1 }
 0x9dd   : > { %9475 = vst [vmem:[#allocation33_spill] sm:$0xff] %v8018_v31  ;;  %v8020_v63 = vpop.f32.mrb[57].mxu1 }
 0x9de   : > { %9476 = vst [vmem:[#allocation32_spill] sm:$0xff] %v8020_v63  ;;  %v8022_v15 = vpop.f32.mrb[58].mxu1 }
 0x9df   : > { %9477 = vst [vmem:[#allocation34_spill] sm:$0xff] %v8022_v15  ;;  %v8026_v6 = vpop.f32.mrb[59].mxu1 }
 0x9e0   : > { %9478 = vst [vmem:[#allocation61_spill] sm:$0xff] %v8026_v6 }
 0x9ec   : > { %v8030_v13 = vpop.f32.mrb[60].mxu1 }
 0x9ed   : > { %9479 = vst [vmem:[#allocation62_spill] sm:$0xff] %v8030_v13  ;;  %v8032_v5 = vpop.f32.mrb[61].mxu1 }
 0x9ee   : > { %9480 = vst [vmem:[#allocation63_spill] sm:$0xff] %v8032_v5  ;;  %v8034_v57 = vpop.f32.mrb[62].mxu1 }
 0x9ef   : > { %9481 = vst [vmem:[#allocation64_spill] sm:$0xff] %v8034_v57  ;;  %v8038_v26 = vpop.f32.mrb[63].mxu1 }
 0x9f0   : > { %9482 = vst [vmem:[#allocation65_spill] sm:$0xff] %v8038_v26 }
 0x9f8   : > { %v8042_v59 = vpop.f32.mrb[64].mxu1 }
 0x9f9   : > { %9483 = vst [vmem:[#allocation66_spill] sm:$0xff] %v8042_v59  ;;  %v8044_v33 = vpop.f32.mrb[65].mxu1 }
 0x9fa   : > { %9484 = vst [vmem:[#allocation67_spill] sm:$0xff] %v8044_v33  ;;  %v8046_v44 = vpop.f32.mrb[66].mxu1 }
 0x9fb   : > { %9485 = vst [vmem:[#allocation68_spill] sm:$0xff] %v8046_v44  ;;  %v8051_v56 = vpop.f32.mrb[67].mxu1 }
 0x9fc   : > { %9486 = vst [vmem:[#allocation69_spill] sm:$0xff] %v8051_v56 }
 0xa00   : > { %v2992_v38 = vpop.f32.mrb[68].mxu1 }
 0xa01   : > { %v8062_v7 = vadd.f32 %v8059_v52, %v2992_v38  ;;  %v2994_v16 = vpop.f32.mrb[69].mxu1 }
 0xa02   : > { %v3095_v18 = vadd.f32 %v8056_v42, %v2994_v16  ;;  %v2996_v2 = vpop.f32.mrb[70].mxu1 }
 0xa03   : > { %v8066_v30 = vadd.f32 %v8059_v52, %v2996_v2  ;;  %v2998_v17 = vpop.f32.mrb[71].mxu1 }
 0xa04   : > { %v3096_v40 = vadd.f32 %v8056_v42, %v2998_v17  ;;  %3113 = vrot.lane.b32.xlu1 %v3095_v18, %s9487_s6 }
 0xa06   : > { %3117 = vrot.lane.b32.xlu0 %v3096_v40, %s9488_s1 }
 0xa08   : > { %v3002_v22 = vpop.f32.mrb[72].mxu1 }
 0xa09   : > { %v8072_v11 = vadd.f32 %v8059_v52, %v3002_v22  ;;  %v3004_v38 = vpop.f32.mrb[73].mxu1 }
 0xa0a   : > { %v3097_v51 = vadd.f32 %v8056_v42, %v3004_v38  ;;  %v3006_v34 = vpop.f32.mrb[74].mxu1 }
 0xa0b   : > { %v8076_v16 = vadd.f32 %v8059_v52, %v3006_v34  ;;  %v3008_v2 = vpop.f32.mrb[75].mxu1 }
 0xa0c   : > { %v3098_v19 = vadd.f32 %v8056_v42, %v3008_v2  ;;  %3121 = vrot.lane.b32.xlu1 %v3097_v51, %s9489_s2 }
 0xa0e   : > { %3125 = vrot.lane.b32.xlu0 %v3098_v19, %s9490_s4 }
 0xa10   : > { %v3012_v17 = vpop.f32.mrb[76].mxu1 }
 0xa11   : > { %v8082_v40 = vadd.f32 %v8059_v52, %v3012_v17  ;;  %v3014_v18 = vpop.f32.mrb[77].mxu1 }
 0xa12   : > { %v3099_v22 = vadd.f32 %v8056_v42, %v3014_v18  ;;  %v3016_v53 = vpop.f32.mrb[78].mxu1 }
 0xa13   : > { %v8086_v38 = vadd.f32 %v8059_v52, %v3016_v53  ;;  %v3018_v34 = vpop.f32.mrb[79].mxu1 }
 0xa14   : > { %v3100_v33 = vadd.f32 %v8056_v42, %v3018_v34  ;;  %3129 = vrot.lane.b32.xlu1 %v3099_v22, %s9491_s3 }
 0xa16   : > { %3133 = vrot.lane.b32.xlu0 %v3100_v33, %s9416_s28 }
 0xa18   : > { %v3022_v51 = vpop.f32.mrb[80].mxu1 }
 0xa19   : > { %v8092_v19 = vadd.f32 %v8059_v52, %v3022_v51  ;;  %v3024_v2 = vpop.f32.mrb[81].mxu1 }
 0xa1a   : > { %v3101_v17 = vadd.f32 %v8056_v42, %v3024_v2  ;;  %v3026_v56 = vpop.f32.mrb[82].mxu1 }
 0xa1b   : > { %v8096_v18 = vadd.f32 %v8059_v52, %v3026_v56  ;;  %v3028_v53 = vpop.f32.mrb[83].mxu1 }
 0xa1c   : > { %v3102_v59 = vadd.f32 %v8056_v42, %v3028_v53  ;;  %3137 = vrot.lane.b32.xlu1 %v3101_v17, %s9417_s23 }
 0xa1e   : > { %3141 = vrot.lane.b32.xlu0 %v3102_v59, %s9418_s21 }
 0xa20   : > { %v3032_v22 = vpop.f32.mrb[84].mxu1 }
 0xa21   : > { %v8102_v33 = vadd.f32 %v8059_v52, %v3032_v22  ;;  %v3034_v34 = vpop.f32.mrb[85].mxu1 }
 0xa22   : > { %v3103_v51 = vadd.f32 %v8056_v42, %v3034_v34  ;;  %v3036_v44 = vpop.f32.mrb[86].mxu1 }
 0xa23   : > { %v8106_v2 = vadd.f32 %v8059_v52, %v3036_v44  ;;  %v3038_v56 = vpop.f32.mrb[87].mxu1 }
 0xa24   : > { %v3104_v13 = vadd.f32 %v8056_v42, %v3038_v56  ;;  %3145 = vrot.lane.b32.xlu1 %v3103_v51, %s9419_s13 }
 0xa26   : > { %3149 = vrot.lane.b32.xlu0 %v3104_v13, %s9420_s26 }
 0xa28   : > { %v3042_v17 = vpop.f32.mrb[88].mxu1 }
 0xa29   : > { %v8112_v59 = vadd.f32 %v8059_v52, %v3042_v17  ;;  %v3044_v53 = vpop.f32.mrb[89].mxu1 }
 0xa2a   : > { %v3105_v22 = vadd.f32 %v8056_v42, %v3044_v53  ;;  %v3046_v57 = vpop.f32.mrb[90].mxu1 }
 0xa2b   : > { %v8116_v34 = vadd.f32 %v8059_v52, %v3046_v57  ;;  %v3048_v44 = vpop.f32.mrb[91].mxu1 }
 0xa2c   : > { %v3106_v31 = vadd.f32 %v8056_v42, %v3048_v44  ;;  %3153 = vrot.lane.b32.xlu1 %v3105_v22, %s9421_s29 }
 0xa2e   : > { %3157 = vrot.lane.b32.xlu0 %v3106_v31, %s9422_s8 }
 0xa30   : > { %v3052_v51 = vpop.f32.mrb[92].mxu1 }
 0xa31   : > { %v8122_v13 = vadd.f32 %v8059_v52, %v3052_v51  ;;  %v3054_v56 = vpop.f32.mrb[93].mxu1 }
 0xa32   : > { %v3107_v17 = vadd.f32 %v8056_v42, %v3054_v56  ;;  %v3056_v15 = vpop.f32.mrb[94].mxu1 }
 0xa33   : > { %v8126_v53 = vadd.f32 %v8059_v52, %v3056_v15  ;;  %v3058_v57 = vpop.f32.mrb[95].mxu1 }
 0xa34   : > { %v3108_v29 = vadd.f32 %v8056_v42, %v3058_v57  ;;  %3161 = vrot.lane.b32.xlu1 %v3107_v17, %s9423_s5 }
 0xa36   : > { %3165 = vrot.lane.b32.xlu0 %v3108_v29, %s9424_s24 }
 0xa38   : > { %v3062_v22 = vpop.f32.mrb[96].mxu1 }
 0xa39   : > { %v8132_v31 = vadd.f32 %v8059_v52, %v3062_v22  ;;  %v3064_v44 = vpop.f32.mrb[97].mxu1 }
 0xa3a   : > { %v3109_v51 = vadd.f32 %v8056_v42, %v3064_v44  ;;  %v3066_v21 = vpop.f32.mrb[98].mxu1 }
 0xa3b   : > { %v8136_v56 = vadd.f32 %v8059_v52, %v3066_v21  ;;  %v3068_v15 = vpop.f32.mrb[99].mxu1 }
 0xa3c   : > { %v3110_v5 = vadd.f32 %v8056_v42, %v3068_v15  ;;  %3169 = vrot.lane.b32.xlu1 %v3109_v51, %s9425_s27 }
 0xa3e   : > { %3173 = vrot.lane.b32.xlu0 %v3110_v5, %s9426_s19 }
 0xa40   : > { %3482 = vrot.lane.b32.xlu1 %v6847_v0, %s9492_s9 }
 0xa42   : > { %3480 = vrot.lane.b32.xlu0 %v6833_v10, %s9492_s9 }
 0xa44   : > { %3488 = vrot.lane.b32.xlu1 %v6877_v12, %s9492_s9 }
 0xa46   : > { %3484 = vrot.lane.b32.xlu0 %v6857_v61, %s9492_s9 }
 0xa48   : > { %3490 = vrot.lane.b32.xlu1 %v6887_v37, %s9492_s9 }
 0xa4a   : > { %3486 = vrot.lane.b32.xlu0 %v6867_v48, %s9492_s9 }
 0xa4c   : > { %3494 = vrot.lane.b32.xlu1 %v6907_v58, %s9492_s9 }
 0xa4e   : > { %3492 = vrot.lane.b32.xlu0 %v6897_v39, %s9492_s9 }
 0xa76   : > { %v8157_v29 = vpop.permute.xlu1 %3113 }
 0xa77   : > { %v9313_v5 = vrot.slane %v8157_v29, 1 }
 0xa78   : > { %v3118_v21 = vpop.permute.xlu0 %3117 }
 0xa79   : > { %v3176_v42 = vrot.slane %v3118_v21, 1 }
 0xa7b   : > { %v3205_v52 = vsel %vm1720_vm2, %v9313_v5, %v3176_v42 }
 0xa7c   : > { %v3207_v17 = vsel %vm1769_vm3, 0.0, %v3205_v52 }
 0xa7d   : > { %v3223_v57 = vsel %vm1737_vm4, %v8157_v29, %v3207_v17 }
 0xa7e   : > { %v3122_v22 = vpop.permute.xlu1 %3121  ;;  %v8172_v44 = vadd.f32 %v3223_v57, %v8062_v7 }
 0xa7f   : > { %v3177_v51 = vrot.slane %v3122_v22, 1 }
 0xa80   : > { %v3126_v15 = vpop.permute.xlu0 %3125  ;;  %3255 = vmax.xlane.f32.xlu1 %v8172_v44 }
 0xa81   : > { %v3204_v5 = vsel %vm1720_vm2, %v3176_v42, %v3177_v51  ;;  %v3178_v26 = vrot.slane %v3126_v15, 1 }
 0xa82   : > { %v3208_v52 = vsel %vm1770_vm5, 0.0, %v3204_v5 }
 0xa83   : > { %v3203_v63 = vsel %vm1720_vm2, %v3177_v51, %v3178_v26  ;;  %v3224_v7 = vsel %vm1738_vm6, %v3118_v21, %v3208_v52 }
 0xa84   : > { %v8186_v17 = vadd.f32 %v3224_v7, %v8066_v30  ;;  %v3209_v57 = vsel %vm1771_vm7, 0.0, %v3203_v63  ;;  %v9494_v63 = vld [vmem:[#allocation41_spill] sm:$0xff]  ;;  %v9496_v7 = vld [vmem:[#allocation40_spill] sm:$0xff] }
 0xa85   : > { %v3225_v42 = vsel %vm9493_vm9, %v3122_v22, %v3209_v57  ;;  %vm9495_vm11 = vcmp.eq.s32.totalorder %v7051_v32, %v9494_v63  ;;  %vm9497_vm8 = vcmp.le.s32.totalorder %v7051_v32, %v9496_v7  ;;  %vm9501_vm9 = vcmp.le.s32.totalorder %v7051_v32, %v9500_v54 }
 0xa86   : > { %3257 = vmax.xlane.f32.xlu0 %v8186_v17  ;;  %v3130_v5 = vpop.permute.xlu1 %3129  ;;  %v8196_v24 = vadd.f32 %v3225_v42, %v8072_v11  ;;  %v9498_v42 = vld [vmem:[#allocation43_spill] sm:$0xff] }
 0xa87   : > { %v3179_v6 = vrot.slane %v3130_v5, 1  ;;  %vm9499_vm10 = vcmp.eq.s32.totalorder %v7051_v32, %v9498_v42 }
 0xa88   : > { %v3134_v51 = vpop.permute.xlu0 %3133 }
 0xa89   : > { %v3202_v30 = vsel %vm1720_vm2, %v3178_v26, %v3179_v6  ;;  %v3180_v21 = vrot.slane %v3134_v51, 1 }
 0xa8a   : > { %3259 = vmax.xlane.f32.xlu0 %v8196_v24  ;;  %v3210_v52 = vsel %vm9495_vm11, 0.0, %v3202_v30 }
 0xa8b   : > { %v3201_v22 = vsel %vm1720_vm2, %v3179_v6, %v3180_v21  ;;  %v3226_v57 = vsel %vm9497_vm8, %v3126_v15, %v3210_v52  ;;  %v9502_v52 = vld [vmem:[#allocation46_spill] sm:$0xff] }
 0xa8c   : > { %v8210_v11 = vadd.f32 %v3226_v57, %v8076_v16  ;;  %v3211_v26 = vsel %vm9499_vm10, 0.0, %v3201_v22  ;;  %vm9503_vm11 = vcmp.eq.s32.totalorder %v7051_v32, %v9502_v52  ;;  %v9504_v57 = vld [vmem:[#allocation44_spill] sm:$0xff] }
 0xa8d   : > { %v3227_v58 = vsel %vm9501_vm9, %v3130_v5, %v3211_v26  ;;  %vm9505_vm8 = vcmp.le.s32.totalorder %v7051_v32, %v9504_v57  ;;  %v9506_v26 = vld [vmem:[#allocation47_spill] sm:$0xff] }
 0xa8e   : > { %3261 = vmax.xlane.f32.xlu1 %v8210_v11  ;;  %v3138_v30 = vpop.permute.xlu1 %3137  ;;  %v8220_v6 = vadd.f32 %v3227_v58, %v8082_v40  ;;  %vm9507_vm10 = vcmp.eq.s32.totalorder %v7051_v32, %v9506_v26 }
 0xa8f   : > { %v3181_v37 = vrot.slane %v3138_v30, 1 }
 0xa90   : > { %v3142_v39 = vpop.permute.xlu0 %3141  ;;  %3263 = vmax.xlane.f32.xlu0 %v8220_v6 }
 0xa91   : > { %v3200_v16 = vsel %vm1720_vm2, %v3180_v21, %v3181_v37  ;;  %v3182_v15 = vrot.slane %v3142_v39, 1  ;;  %v9508_v21 = vld [vmem:[#allocation45_spill] sm:$0xff] }
 0xa92   : > { %v3212_v22 = vsel %vm9503_vm11, 0.0, %v3200_v16  ;;  %vm9509_vm9 = vcmp.le.s32.totalorder %v7051_v32, %v9508_v21 }
 0xa93   : > { %v3199_v5 = vsel %vm1720_vm2, %v3181_v37, %v3182_v15  ;;  %v3228_v58 = vsel %vm9505_vm8, %v3134_v51, %v3212_v22  ;;  %v9510_v22 = vld [vmem:[#allocation49_spill] sm:$0xff] }
 0xa94   : > { %v8234_v40 = vadd.f32 %v3228_v58, %v8086_v38  ;;  %v3213_v48 = vsel %vm9507_vm10, 0.0, %v3199_v5  ;;  %vm9511_vm11 = vcmp.eq.s32.totalorder %v7051_v32, %v9510_v22  ;;  %v9514_v58 = vld [vmem:[#allocation52_spill] sm:$0xff] }
 0xa95   : > { %v3229_v61 = vsel %vm9509_vm9, %v3138_v30, %v3213_v48  ;;  %v9512_v30 = vld [vmem:[#allocation48_spill] sm:$0xff]  ;;  %vm9515_vm10 = vcmp.eq.s32.totalorder %v7051_v32, %v9514_v58 }
 0xa96   : > { %3265 = vmax.xlane.f32.xlu1 %v8234_v40  ;;  %v3146_v16 = vpop.permute.xlu1 %3145  ;;  %v8244_v37 = vadd.f32 %v3229_v61, %v8092_v19  ;;  %vm9513_vm8 = vcmp.le.s32.totalorder %v7051_v32, %v9512_v30 }
 0xa97   : > { %v3183_v12 = vrot.slane %v3146_v16, 1 }
 0xa98   : > { %v3150_v57 = vpop.permute.xlu0 %3149  ;;  %3267 = vmax.xlane.f32.xlu0 %v8244_v37 }
 0xa99   : > { %v3198_v38 = vsel %vm1720_vm2, %v3182_v15, %v3183_v12  ;;  %v3184_v51 = vrot.slane %v3150_v57, 1  ;;  %v9516_v15 = vld [vmem:[#allocation50_spill] sm:$0xff] }
 0xa9a   : > { %v3214_v5 = vsel %vm9511_vm11, 0.0, %v3198_v38  ;;  %vm9517_vm9 = vcmp.le.s32.totalorder %v7051_v32, %v9516_v15 }
 0xa9b   : > { %v3197_v48 = vsel %vm1720_vm2, %v3183_v12, %v3184_v51  ;;  %v3230_v61 = vsel %vm9513_vm8, %v3142_v39, %v3214_v5  ;;  %v9518_v5 = vld [vmem:[#allocation53_spill] sm:$0xff] }
 0xa9c   : > { %v8258_v19 = vadd.f32 %v3230_v61, %v8096_v18  ;;  %v3215_v21 = vsel %vm9515_vm10, 0.0, %v3197_v48  ;;  %vm9519_vm11 = vcmp.eq.s32.totalorder %v7051_v32, %v9518_v5  ;;  %v9522_v61 = vld [vmem:[#allocation55_spill] sm:$0xff] }
 0xa9d   : > { %v3231_v26 = vsel %vm9517_vm9, %v3146_v16, %v3215_v21  ;;  %v9520_v16 = vld [vmem:[#allocation51_spill] sm:$0xff]  ;;  %vm9523_vm10 = vcmp.eq.s32.totalorder %v7051_v32, %v9522_v61 }
 0xa9e   : > { %3269 = vmax.xlane.f32.xlu1 %v8258_v19  ;;  %v3154_v38 = vpop.permute.xlu1 %3153  ;;  %v8268_v12 = vadd.f32 %v3231_v26, %v8102_v33  ;;  %vm9521_vm8 = vcmp.le.s32.totalorder %v7051_v32, %v9520_v16 }
 0xa9f   : > { %v3185_v22 = vrot.slane %v3154_v38, 1 }
 0xaa0   : > { %v3158_v30 = vpop.permute.xlu0 %3157  ;;  %3271 = vmax.xlane.f32.xlu0 %v8268_v12 }
 0xaa1   : > { %v3196_v39 = vsel %vm1720_vm2, %v3184_v51, %v3185_v22  ;;  %v3186_v18 = vrot.slane %v3158_v30, 1  ;;  %v9524_v51 = vld [vmem:[#allocation54_spill] sm:$0xff] }
 0xaa2   : > { %v3216_v48 = vsel %vm9519_vm11, 0.0, %v3196_v39  ;;  %vm9525_vm9 = vcmp.le.s32.totalorder %v7051_v32, %v9524_v51 }
 0xaa3   : > { %v3195_v21 = vsel %vm1720_vm2, %v3185_v22, %v3186_v18  ;;  %v3232_v33 = vsel %vm9521_vm8, %v3150_v57, %v3216_v48  ;;  %v9526_v48 = vld [vmem:[#allocation58_spill] sm:$0xff] }
 0xaa4   : > { %v8282_v26 = vadd.f32 %v3232_v33, %v8106_v2  ;;  %v3217_v15 = vsel %vm9523_vm10, 0.0, %v3195_v21  ;;  %vm9527_vm11 = vcmp.eq.s32.totalorder %v7051_v32, %v9526_v48  ;;  %vm9530_vm10 = vcmp.eq.s32.totalorder %v7051_v32, %v9460_v20 }
 0xaa5   : > { %v3233_v58 = vsel %vm9525_vm9, %v3154_v38, %v3217_v15  ;;  %v9528_v38 = vld [vmem:[#allocation56_spill] sm:$0xff]  ;;  %vm9531_vm9 = vcmp.le.s32.totalorder %v7051_v32, %v9462_v8 }
 0xaa6   : > { %3273 = vmax.xlane.f32.xlu1 %v8282_v26  ;;  %v3162_v39 = vpop.permute.xlu1 %3161  ;;  %v8292_v22 = vadd.f32 %v3233_v58, %v8112_v59  ;;  %vm9529_vm8 = vcmp.le.s32.totalorder %v7051_v32, %v9528_v38 }
 0xaa7   : > { %v3187_v5 = vrot.slane %v3162_v39, 1 }
 0xaa8   : > { %v3166_v16 = vpop.permute.xlu0 %3165  ;;  %3275 = vmax.xlane.f32.xlu0 %v8292_v22 }
 0xaa9   : > { %v3194_v2 = vsel %vm1720_vm2, %v3186_v18, %v3187_v5  ;;  %v3188_v57 = vrot.slane %v3166_v16, 1 }
 0xaaa   : > { %v3218_v21 = vsel %vm9527_vm11, 0.0, %v3194_v2  ;;  %vm9532_vm11 = vcmp.eq.s32.totalorder %v7051_v32, %v7326_v4 }
 0xaab   : > { %v3193_v15 = vsel %vm1720_vm2, %v3187_v5, %v3188_v57  ;;  %v3234_v59 = vsel %vm9529_vm8, %v3158_v30, %v3218_v21 }
 0xaac   : > { %v8306_v58 = vadd.f32 %v3234_v59, %v8116_v34  ;;  %v3219_v33 = vsel %vm9530_vm10, 0.0, %v3193_v15  ;;  %v9533_v15 = vrot.slane %v8157_v29, 1 }
 0xaad   : > { %v3235_v18 = vsel %vm9531_vm9, %v3162_v39, %v3219_v33 }
 0xaae   : > { %3277 = vmax.xlane.f32.xlu1 %v8306_v58  ;;  %v3170_v2 = vpop.permute.xlu1 %3169  ;;  %v8316_v5 = vadd.f32 %v3235_v18, %v8122_v13 }
 0xaaf   : > { %v3189_v48 = vrot.slane %v3170_v2, 1 }
 0xab0   : > { %v3174_v38 = vpop.permute.xlu0 %3173  ;;  %3279 = vmax.xlane.f32.xlu0 %v8316_v5 }
 0xab1   : > { %v3192_v34 = vsel %vm1720_vm2, %v3188_v57, %v3189_v48  ;;  %v3190_v30 = vrot.slane %v3174_v38, 1 }
 0xab2   : > { %v3220_v21 = vsel %vm9532_vm11, 0.0, %v3192_v34  ;;  %v3483_v34 = vpop.permute.xlu1 %3482 }
 0xab3   : > { %v3191_v39 = vsel %vm1720_vm2, %v3189_v48, %v3190_v30  ;;  %v3206_v13 = vsel %vm1720_vm2, %v3190_v30, %v9533_v15  ;;  %v3236_v59 = vsel %vm1750_vm15, %v3166_v16, %v3220_v21 }
 0xab4   : > { %v3222_v57 = vsel %vm1784_vm0, 0.0, %v3206_v13  ;;  %v3481_v33 = vpop.permute.xlu0 %3480  ;;  %v8337_v18 = vadd.f32 %v3236_v59, %v8126_v53  ;;  %v3221_v48 = vsel %vm1783_vm13, 0.0, %v3191_v39 }
 0xab5   : > { %v3238_v29 = vsel %vm1752_vm12, %v3174_v38, %v3222_v57  ;;  %5449 = vmatprep.subr.bf16.mxu0 %v3481_v33  ;;  %v3237_v16 = vsel %vm1751_vm14, %v3170_v2, %v3221_v48 }
 0xab6   : > { %5450 = vmatpush3.bf16.msra.mxu0 %v3481_v33  ;;  %3281 = vmax.xlane.f32.xlu1 %v8337_v18  ;;  %v8350_v53 = vadd.f32 %v3237_v16, %v8132_v31  ;;  %v8354_v21 = vadd.f32 %v3238_v29, %v8136_v56  ;;  %v3489_v2 = vpop.permute.xlu1 %3488  ;;  %v1095_v31 = vld [vmem:[%s9180_s7 + $0x68] sm:$0xff]  ;;  %v1094_v56 = vld [vmem:[%s9180_s7 + $0x60] sm:$0xff] }
 0xab7   : > { %5451 = vmatprep.subr.bf16.mxu0 %v3483_v34 }
 0xab8   : > { %v3485_v30 = vpop.permute.xlu0 %3484  ;;  %3283 = vmax.xlane.f32.xlu0 %v8350_v53 }
 0xaba   : > { %3285 = vmax.xlane.f32.xlu1 %v8354_v21  ;;  %5452 = vmatpush3.bf16.msra.mxu0 %v3483_v34  ;;  %v3491_v39 = vpop.permute.xlu1 %3490 }
 0xabb   : > { %5453 = vmatprep.subr.bf16.mxu0 %v3485_v30 }
 0xabc   : > { %v3487_v38 = vpop.permute.xlu0 %3486 }
 0xabe   : > { %5454 = vmatpush3.bf16.msra.mxu0 %v3485_v30  ;;  %v3495_v13 = vpop.permute.xlu1 %3494 }
 0xabf   : > { %5455 = vmatprep.subr.bf16.mxu0 %v3487_v38 }
 0xac0   : > { %v3493_v15 = vpop.permute.xlu0 %3492 }
 0xac2   : > { %5456 = vmatpush3.bf16.msra.mxu0 %v3487_v38 }
 0xac3   : > { %5457 = vmatprep.subr.bf16.mxu0 %v3489_v2 }
 0xac6   : > { %5458 = vmatpush3.bf16.msra.mxu0 %v3489_v2 }
 0xac7   : > { %5459 = vmatprep.subr.bf16.mxu0 %v3491_v39 }
 0xaca   : > { %5460 = vmatpush3.bf16.msra.mxu0 %v3491_v39 }
 0xacb   : > { %1165 = vperm.xlu1 %5656, %v1095_v31   ;;  %5461 = vmatprep.subr.bf16.mxu0 %v3493_v15 }
 0xace   : > { %1160 = vperm.xlu0 %5657, %v1094_v56   ;;  %5462 = vmatpush3.bf16.msra.mxu0 %v3493_v15 }
 0xacf   : > { %5463 = vmatprep.subr.bf16.mxu0 %v3495_v13 }
 0xad2   : > { %5464 = vmatpush3.bf16.msra.mxu0 %v3495_v13 }
 0xb0d   : > { %v3256_v59 = vpop.xlane.xlu1 %3255 }
 0xb0e   : > { %v3287_v57 = vsub.f32 %v8172_v44, %v3256_v59 }
 0xb10   : > { %v3303_v33 = vmul.f32 1.442695, %v3287_v57 }
 0xb12   : > { %5866 = vpow2.f32 %v3303_v33 }
 0xb13   : > { %v3258_v48 = vpop.xlane.xlu0 %3257 }
 0xb14   : > { %v3288_v29 = vsub.f32 %v8186_v17, %v3258_v48 }
 0xb16   : > { %v3305_v16 = vmul.f32 1.442695, %v3288_v29 }
 0xb17   : > { %v3260_v34 = vpop.xlane.xlu0 %3259 }
 0xb18   : > { %5868 = vpow2.f32 %v3305_v16  ;;  %v3289_v30 = vsub.f32 %v8196_v24, %v3260_v34 }
 0xb1a   : > { %v3307_v38 = vmul.f32 1.442695, %v3289_v30 }
 0xb1b   : > { %v3262_v2 = vpop.xlane.xlu1 %3261 }
 0xb1c   : > { %v8366_v39 = vpop.eup %5866  ;;  %5870 = vpow2.f32 %v3307_v38  ;;  %v3290_v31 = vsub.f32 %v8210_v11, %v3262_v2 }
 0xb1d   : > { %v3264_v15 = vpop.xlane.xlu0 %3263  ;;  %3335 = vadd.xlane.f32.xlu1 %v8366_v39 }
 0xb1e   : > { %v3309_v44 = vmul.f32 1.442695, %v3290_v31  ;;  %v3291_v56 = vsub.f32 %v8220_v6, %v3264_v15 }
 0xb20   : > { %5872 = vpow2.f32 %v3309_v44  ;;  %v3311_v17 = vmul.f32 1.442695, %v3291_v56 }
 0xb22   : > { %v8371_v13 = vpop.eup %5868  ;;  %5874 = vpow2.f32 %v3311_v17 }
 0xb23   : > { %3337 = vadd.xlane.f32.xlu1 %v8371_v13  ;;  %v3266_v24 = vpop.xlane.xlu1 %3265 }
 0xb24   : > { %v3292_v59 = vsub.f32 %v8234_v40, %v3266_v24 }
 0xb25   : > { %v3268_v57 = vpop.xlane.xlu0 %3267 }
 0xb26   : > { %v8375_v33 = vpop.eup %5870  ;;  %v3313_v11 = vmul.f32 1.442695, %v3292_v59  ;;  %v3293_v48 = vsub.f32 %v8244_v37, %v3268_v57 }
 0xb27   : > { %3339 = vadd.xlane.f32.xlu1 %v8375_v33 }
 0xb28   : > { %5876 = vpow2.f32 %v3313_v11  ;;  %v3315_v6 = vmul.f32 1.442695, %v3293_v48 }
 0xb2a   : > { %v8379_v29 = vpop.eup %5872  ;;  %5878 = vpow2.f32 %v3315_v6 }
 0xb2b   : > { %3341 = vadd.xlane.f32.xlu1 %v8379_v29  ;;  %v3270_v16 = vpop.xlane.xlu1 %3269 }
 0xb2c   : > { %v8382_v34 = vpop.eup %5874  ;;  %v3294_v40 = vsub.f32 %v8258_v19, %v3270_v16 }
 0xb2d   : > { %v3272_v30 = vpop.xlane.xlu0 %3271  ;;  %3343 = vadd.xlane.f32.xlu0 %v8382_v34 }
 0xb2e   : > { %v3317_v38 = vmul.f32 1.442695, %v3294_v40  ;;  %v3295_v37 = vsub.f32 %v8268_v12, %v3272_v30 }
 0xb30   : > { %5880 = vpow2.f32 %v3317_v38  ;;  %v3319_v2 = vmul.f32 1.442695, %v3295_v37  ;;  %v5696_v37 = vld [vmem:[#allocation6 + $0x30] sm:$0xff]  }
 0xb31   : > { %3690 = vmatprep.subr.bf16.mxu0 %v5696_v37  ;;  %v1096_v37 = vld [vmem:[%s9180_s7 + $0x70] sm:$0xff] }
 0xb32   : > { %v8387_v31 = vpop.eup %5876  ;;  %5882 = vpow2.f32 %v3319_v2 }
 0xb33   : > { %3345 = vadd.xlane.f32.xlu1 %v8387_v31  ;;  %v3274_v15 = vpop.xlane.xlu1 %3273 }
 0xb34   : > { %v8390_v44 = vpop.eup %5878  ;;  %v3296_v56 = vsub.f32 %v8282_v26, %v3274_v15 }
 0xb35   : > { %v3276_v17 = vpop.xlane.xlu0 %3275  ;;  %3347 = vadd.xlane.f32.xlu0 %v8390_v44 }
 0xb36   : > { %v3321_v19 = vmul.f32 1.442695, %v3296_v56  ;;  %v3297_v24 = vsub.f32 %v8292_v22, %v3276_v17 }
 0xb38   : > { %5884 = vpow2.f32 %v3321_v19  ;;  %v3323_v12 = vmul.f32 1.442695, %v3297_v24 }
 0xb3a   : > { %v8395_v59 = vpop.eup %5880  ;;  %5886 = vpow2.f32 %v3323_v12 }
 0xb3b   : > { %3349 = vadd.xlane.f32.xlu0 %v8395_v59  ;;  %v3278_v57 = vpop.xlane.xlu1 %3277 }
 0xb3c   : > { %v3298_v11 = vsub.f32 %v8306_v58, %v3278_v57  ;;  %v8399_v6 = vpop.eup %5882 }
 0xb3d   : > { %v3280_v48 = vpop.xlane.xlu0 %3279 }
 0xb3e   : > { %v3325_v26 = vmul.f32 1.442695, %v3298_v11  ;;  %v3299_v16 = vsub.f32 %v8316_v5, %v3280_v48 }
 0xb3f   : > { %3351 = vadd.xlane.f32.xlu0 %v8399_v6 }
 0xb40   : > { %5888 = vpow2.f32 %v3325_v26  ;;  %v3327_v22 = vmul.f32 1.442695, %v3299_v16  ;;  %v9535_v26 = vld [vmem:[#allocation37_spill] sm:$0xff] }
 0xb42   : > { %v8403_v40 = vpop.eup %5884  ;;  %5890 = vpow2.f32 %v3327_v22 }
 0xb43   : > { %3353 = vadd.xlane.f32.xlu1 %v8403_v40  ;;  %v3282_v30 = vpop.xlane.xlu1 %3281 }
 0xb44   : > { %v8406_v38 = vpop.eup %5886  ;;  %v3300_v58 = vsub.f32 %v8337_v18, %v3282_v30 }
 0xb45   : > { %v3284_v2 = vpop.xlane.xlu0 %3283  ;;  %3355 = vadd.xlane.f32.xlu0 %v8406_v38 }
 0xb46   : > { %v3329_v15 = vmul.f32 1.442695, %v3300_v58  ;;  %v3301_v5 = vsub.f32 %v8350_v53, %v3284_v2  ;;  %v9534_v53 = vld [vmem:[#allocation39_spill] sm:$0xff]  ;;  %v1097_v2 = vld [vmem:[%s9180_s7 + $0x78] sm:$0xff] }
 0xb47   : > { %v3286_v56 = vpop.xlane.xlu1 %3285 }
 0xb48   : > { %5892 = vpow2.f32 %v3329_v15  ;;  %v3331_v17 = vmul.f32 1.442695, %v3301_v5  ;;  %v3302_v19 = vsub.f32 %v8354_v21, %v3286_v56 }
 0xb4a   : > { %v8412_v24 = vpop.eup %5888  ;;  %5894 = vpow2.f32 %v3331_v17  ;;  %v3333_v12 = vmul.f32 1.442695, %v3302_v19 }
 0xb4b   : > { %3357 = vadd.xlane.f32.xlu0 %v8412_v24  ;;  %v1166_v18 = vpop.permute.xlu1 %1165 }
 0xb4c   : > { %v8415_v57 = vpop.eup %5890  ;;  %5896 = vpow2.f32 %v3333_v12  ;;  %v1312_v48 = vadd.f32 %v9534_v53, %v1166_v18 }
 0xb4d   : > { %v1161_v11 = vpop.permute.xlu0 %1160  ;;  %3359 = vadd.xlane.f32.xlu1 %v8415_v57 }
 0xb4e   : > { %v1309_v16 = vadd.f32 %v9535_v26, %v1161_v11 }
 0xb50   : > { %v1329_v22 = vpack.c.bf16 %v1312_v48, %v1309_v16  ;;  %v5697_v16 = vld [vmem:[#allocation6 + $0x38] sm:$0xff]  }
 0xb52   : > { %v8420_v30 = vpop.eup %5892 }
 0xb53   : > { %3361 = vadd.xlane.f32.xlu0 %v8420_v30 }
 0xb54   : > { %v8423_v21 = vpop.eup %5894 }
 0xb55   : > { %3363 = vadd.xlane.f32.xlu1 %v8423_v21 }
 0xb56   : > { %v8426_v58 = vpop.eup %5896 }
 0xb57   : > { %3365 = vadd.xlane.f32.xlu0 %v8426_v58 }
 0xb66   : > { %1170 = vperm.xlu1 %5656, %v1096_v37  }
 0xb6a   : > { %3650 = vrot.lane.b32.xlu1 %v6831_v43, %s6263_s15  ;;  %v9536_v43 = vld [vmem:[#allocation30_spill] sm:$0xff] }
 0xb6d   : > { %1175 = vperm.xlu0 %5657, %v1097_v2  }
 0xb6e   : > { %3654 = vrot.lane.b32.xlu1 %v6855_v60, %s6263_s15 }
 0xb71   : > { %3652 = vrot.lane.b32.xlu0 %v6845_v25, %s6263_s15 }
 0xb72   : > { %3658 = vrot.lane.b32.xlu1 %v6875_v55, %s6263_s15 }
 0xb75   : > { %3656 = vrot.lane.b32.xlu0 %v6865_v9, %s6263_s15 }
 0xb76   : > { %3662 = vrot.lane.b32.xlu1 %v6895_v49, %s6263_s15 }
 0xb79   : > { %3660 = vrot.lane.b32.xlu0 %v6885_v35, %s6263_s15 }
 0xb7d   : > { %3664 = vrot.lane.b32.xlu0 %v9536_v43, %s6263_s15 }
 0xbaa   : > { %v3336_v60 = vpop.xlane.xlu1 %3335 }
 0xbab   : > { %5898 = vrcp.f32 %v3336_v60 }
 0xbb0   : > { %v3338_v15 = vpop.xlane.xlu1 %3337 }
 0xbb1   : > { %5900 = vrcp.f32 %v3338_v15 }
 0xbb4   : > { %v3340_v25 = vpop.xlane.xlu1 %3339 }
 0xbb5   : > { %5902 = vrcp.f32 %v3340_v25  ;;  %v5899_v5 = vpop.eup %5898 }
 0xbb6   : > { %v3383_v49 = vmul.f32 %v5899_v5, %v8366_v39 }
 0xbb8   : > { %v3342_v55 = vpop.xlane.xlu1 %3341 }
 0xbb9   : > { %5904 = vrcp.f32 %v3342_v55 }
 0xbba   : > { %v3344_v56 = vpop.xlane.xlu0 %3343 }
 0xbbb   : > { %v5901_v9 = vpop.eup %5900  ;;  %5906 = vrcp.f32 %v3344_v56 }
 0xbbc   : > { %v3384_v17 = vmul.f32 %v5901_v9, %v8371_v13 }
 0xbbe   : > { %v3399_v35 = vpack.c.bf16 %v3384_v17, %v3383_v49 }
 0xbbf   : > { %v5903_v12 = vpop.eup %5902 }
 0xbc0   : > { %5212 = vst [vmem:[%s7508_s25 + $0x80] sm:$0xff] %v3399_v35   ;;  %5465 = vmatprep.mubr.bf16.mxu0 %v3399_v35  ;;  %v3346_v19 = vpop.xlane.xlu1 %3345  ;;  %v3385_v11 = vmul.f32 %v5903_v12, %v8375_v33 }
 0xbc1   : > { %5908 = vrcp.f32 %v3346_v19 }
 0xbc2   : > { %v3348_v48 = vpop.xlane.xlu0 %3347 }
 0xbc3   : > { %v5905_v18 = vpop.eup %5904  ;;  %5910 = vrcp.f32 %v3348_v48 }
 0xbc4   : > { %v3386_v53 = vmul.f32 %v5905_v18, %v8379_v29 }
 0xbc5   : > { %v5907_v13 = vpop.eup %5906 }
 0xbc6   : > { %v3400_v26 = vpack.c.bf16 %v3386_v53, %v3385_v11  ;;  %v3387_v43 = vmul.f32 %v5907_v13, %v8382_v34 }
 0xbc8   : > { %v3350_v39 = vpop.xlane.xlu0 %3349  ;;  %5213 = vst [vmem:[%s7508_s25 + $0x88] sm:$0xff] %v3400_v26   ;;  %5466 = vmatmul.mubr.bf16.vlgmr.msra.gmra.mrb[80].mxu0 %v3400_v26 }
 0xbc9   : > { %5912 = vrcp.f32 %v3350_v39  ;;  %3691 = vmatpush1.bf16.msra.mxu0 %v1329_v22 }
 0xbca   : > { %3692 = vmatprep.subr.bf16.mxu0 %v5697_v16 }
 0xbcb   : > { %v5909_v37 = vpop.eup %5908 }
 0xbcc   : > { %v3352_v2 = vpop.xlane.xlu0 %3351  ;;  %v3388_v33 = vmul.f32 %v5909_v37, %v8387_v31 }
 0xbcd   : > { %5914 = vrcp.f32 %v3352_v2  ;;  %v5911_v15 = vpop.eup %5910 }
 0xbce   : > { %v3401_v29 = vpack.c.bf16 %v3388_v33, %v3387_v43  ;;  %v3389_v5 = vmul.f32 %v5911_v15, %v8390_v44  ;;  %v9537_v43 = vld [vmem:[#allocation36_spill] sm:$0xff] }
 0xbd0   : > { %5214 = vst [vmem:[%s7508_s25 + $0x90] sm:$0xff] %v3401_v29   ;;  %5469 = vmatprep.mubr.bf16.mxu0 %v3401_v29  ;;  %v3354_v60 = vpop.xlane.xlu1 %3353 }
 0xbd1   : > { %5916 = vrcp.f32 %v3354_v60 }
 0xbd2   : > { %v3356_v55 = vpop.xlane.xlu0 %3355 }
 0xbd3   : > { %v5913_v25 = vpop.eup %5912  ;;  %5918 = vrcp.f32 %v3356_v55 }
 0xbd4   : > { %v3390_v22 = vmul.f32 %v5913_v25, %v8395_v59 }
 0xbd6   : > { %v3402_v9 = vpack.c.bf16 %v3390_v22, %v3389_v5 }
 0xbd7   : > { %v5915_v31 = vpop.eup %5914 }
 0xbd8   : > { %v3358_v34 = vpop.xlane.xlu0 %3357  ;;  %5215 = vst [vmem:[%s7508_s25 + $0x98] sm:$0xff] %v3402_v9   ;;  %5470 = vmatmul.mubr.bf16.gmra.mrb[84].mxu0 %v3402_v9  ;;  %v3391_v17 = vmul.f32 %v5915_v31, %v8399_v6 }
 0xbd9   : > { %5920 = vrcp.f32 %v3358_v34 }
 0xbda   : > { %v3360_v49 = vpop.xlane.xlu1 %3359 }
 0xbdb   : > { %v5917_v56 = vpop.eup %5916  ;;  %5922 = vrcp.f32 %v3360_v49 }
 0xbdc   : > { %v3392_v35 = vmul.f32 %v5917_v56, %v8403_v40 }
 0xbdd   : > { %v5919_v59 = vpop.eup %5918 }
 0xbde   : > { %v3403_v19 = vpack.c.bf16 %v3392_v35, %v3391_v17  ;;  %v3393_v53 = vmul.f32 %v5919_v59, %v8406_v38  ;;  %v9538_v38 = vld [vmem:[#allocation38_spill] sm:$0xff] }
 0xbe0   : > { %v3362_v44 = vpop.xlane.xlu0 %3361  ;;  %5216 = vst [vmem:[%s7508_s25 + $0xa0] sm:$0xff] %v3403_v19   ;;  %5473 = vmatprep.mubr.bf16.mxu0 %v3403_v19 }
 0xbe1   : > { %5924 = vrcp.f32 %v3362_v44 }
 0xbe2   : > { %v3364_v12 = vpop.xlane.xlu1 %3363 }
 0xbe3   : > { %v5921_v18 = vpop.eup %5920  ;;  %5926 = vrcp.f32 %v3364_v12 }
 0xbe4   : > { %v3366_v11 = vpop.xlane.xlu0 %3365  ;;  %v3394_v48 = vmul.f32 %v5921_v18, %v8412_v24 }
 0xbe5   : > { %5928 = vrcp.f32 %v3366_v11  ;;  %v5923_v40 = vpop.eup %5922 }
 0xbe6   : > { %v3404_v6 = vpack.c.bf16 %v3394_v48, %v3393_v53  ;;  %v1171_v26 = vpop.permute.xlu1 %1170  ;;  %v3395_v13 = vmul.f32 %v5923_v40, %v8415_v57 }
 0xbe7   : > { %v1317_v33 = vadd.f32 %v9537_v43, %v1171_v26  ;;  %v3805_v43 = vsub.s32 3, %v6810_v14 }
 0xbe8   : > { %5217 = vst [vmem:[%s7508_s25 + $0xa8] sm:$0xff] %v3404_v6   ;;  %5474 = vmatmul.mubr.bf16.gmra.mrb[88].mxu0 %v3404_v6 }
 0xbea   : > { %v3651_v57 = vpop.permute.xlu1 %3650 }
 0xbeb   : > { %v5925_v16 = vpop.eup %5924 }
 0xbec   : > { %v1176_v39 = vpop.permute.xlu0 %1175  ;;  %v3396_v37 = vmul.f32 %v5925_v16, %v8420_v30 }
 0xbed   : > { %v5927_v2 = vpop.eup %5926  ;;  %v1320_v29 = vadd.f32 %v9538_v38, %v1176_v39 }
 0xbee   : > { %v3405_v24 = vpack.c.bf16 %v3396_v37, %v3395_v13  ;;  %v3397_v25 = vmul.f32 %v5927_v2, %v8423_v21  ;;  %v3655_v22 = vpop.permute.xlu1 %3654 }
 0xbef   : > { %v5929_v60 = vpop.eup %5928  ;;  %v1330_v15 = vpack.c.bf16 %v1320_v29, %v1317_v33 }
 0xbf0   : > { %5218 = vst [vmem:[%s7508_s25 + $0xb0] sm:$0xff] %v3405_v24   ;;  %5477 = vmatprep.mubr.bf16.mxu0 %v3405_v24  ;;  %v3398_v55 = vmul.f32 %v5929_v60, %v8426_v58  ;;  %v3653_v30 = vpop.permute.xlu0 %3652  ;;  %v5995_v24 = vld [vmem:[%s9392_s20] sm:$0xff] }
 0xbf1   : > { %3693 = vmatpush1.bf16.msra.mxu0 %v1330_v15  ;;  %v8545_v60 = vrot.slane %v5995_v24, %v3805_v43  ;;  %v8548_v15 = vrot.slane %v6958_v45, %v3805_v43 }
 0xbf2   : > { %v3406_v5 = vpack.c.bf16 %v3398_v55, %v3397_v25  ;;  %v3659_v58 = vpop.permute.xlu1 %3658 }
 0xbf4   : > { %5219 = vst [vmem:[%s7508_s25 + $0xb8] sm:$0xff] %v3406_v5   ;;  %5478 = vmatmul.mubr.bf16.gmra.mrb[92].mxu0 %v3406_v5  ;;  %v3657_v21 = vpop.permute.xlu0 %3656 }
 0xbf5   : > { %3722 = vmatprep.mubr.bf16.mxu0 %v9415_v23 }
 0xbf6   : > { %v3663_v34 = vpop.permute.xlu1 %3662 }
 0xbf8   : > { %v3661_v9 = vpop.permute.xlu0 %3660 }
 0xbfc   : > { %4913 = vmatmul.mubr.msk.bf16.vlgmr.msra.gmra.mrb[96].mxu0 %vm1462_vm1, %v3651_v57  ;;  %v3665_v31 = vpop.permute.xlu0 %3664 }
 0xbfd   : > { %3732 = vmatprep.mubr.bf16.mxu0 %v9415_v23 }
 0xc04   : > { %4914 = vmatmul.mubr.msk.bf16.gmra.mrb[100].mxu0 %vm1462_vm1, %v3653_v30 }
 0xc05   : > { %3742 = vmatprep.mubr.bf16.mxu0 %v9415_v23 }
 0xc0c   : > { %4915 = vmatmul.mubr.msk.bf16.gmra.mrb[104].mxu0 %vm1462_vm1, %v3655_v22 }
 0xc0d   : > { %3752 = vmatprep.mubr.bf16.mxu0 %v9415_v23 }
 0xc14   : > { %4916 = vmatmul.mubr.msk.bf16.gmra.mrb[108].mxu0 %vm1462_vm1, %v3657_v21 }
 0xc15   : > { %3762 = vmatprep.mubr.bf16.mxu0 %v9415_v23 }
 0xc1c   : > { %4917 = vmatmul.mubr.msk.bf16.gmra.mrb[112].mxu0 %vm1462_vm1, %v3659_v58 }
 0xc1d   : > { %3772 = vmatprep.mubr.bf16.mxu0 %v9415_v23 }
 0xc24   : > { %4918 = vmatmul.mubr.msk.bf16.gmra.mrb[116].mxu0 %vm1462_vm1, %v3661_v9 }
 0xc25   : > { %3782 = vmatprep.mubr.bf16.mxu0 %v9415_v23 }
 0xc2c   : > { %4919 = vmatmul.mubr.msk.bf16.gmra.mrb[120].mxu0 %vm1462_vm1, %v3663_v34 }
 0xc2d   : > { %3792 = vmatprep.mubr.bf16.mxu0 %v9415_v23 }
 0xc34   : > { %4920 = vmatmul.mubr.msk.bf16.gmra.mrb[124].mxu0 %vm1462_vm1, %v3665_v31  ;;  %vm9542_vm1 = vcmp.le.s32.totalorder %v7051_v32, %v7069_v62 }
 0xc9b   : > { %v8493_v56 = vpop.f32.mrb[80].mxu0 }
 0xc9c   : > { %v8495_v49 = vpop.f32.mrb[81].mxu0 }
 0xc9d   : > { %v8497_v17 = vpop.f32.mrb[82].mxu0 }
 0xc9e   : > { %v8501_v19 = vpop.f32.mrb[83].mxu0 }
 0xcab   : > { %v8505_v59 = vpop.f32.mrb[84].mxu0 }
 0xcac   : > { %v8507_v23 = vpop.f32.mrb[85].mxu0 }
 0xcad   : > { %v8509_v12 = vpop.f32.mrb[86].mxu0 }
 0xcae   : > { %v8513_v11 = vpop.f32.mrb[87].mxu0 }
 0xcbb   : > { %v8517_v48 = vpop.f32.mrb[88].mxu0 }
 0xcbc   : > { %v8519_v6 = vpop.f32.mrb[89].mxu0 }
 0xcbd   : > { %v8521_v40 = vpop.f32.mrb[90].mxu0 }
 0xcbe   : > { %v8525_v16 = vpop.f32.mrb[91].mxu0 }
 0xcc7   : > { %v8529_v13 = vpop.f32.mrb[92].mxu0 }
 0xcc8   : > { %9539 = vst [vmem:[#allocation41_spill] sm:$0xff] %v8529_v13  ;;  %v8531_v37 = vpop.f32.mrb[93].mxu0 }
 0xcc9   : > { %9540 = vst [vmem:[#allocation40_spill] sm:$0xff] %v8531_v37  ;;  %v8533_v2 = vpop.f32.mrb[94].mxu0 }
 0xcca   : > { %v8538_v38 = vpop.f32.mrb[95].mxu0 }
 0xccb   : > { %9541 = vst [vmem:[#allocation43_spill] sm:$0xff] %v8538_v38 }
 0xccf   : > { %v3724_v25 = vpop.f32.mrb[96].mxu0 }
 0xcd0   : > { %v8551_v55 = vadd.f32 %v8548_v15, %v3724_v25  ;;  %v3726_v5 = vpop.f32.mrb[97].mxu0 }
 0xcd1   : > { %v3827_v57 = vadd.f32 %v8545_v60, %v3726_v5  ;;  %v3728_v30 = vpop.f32.mrb[98].mxu0 }
 0xcd2   : > { %v8555_v22 = vadd.f32 %v8548_v15, %v3728_v30  ;;  %v3730_v21 = vpop.f32.mrb[99].mxu0 }
 0xcd3   : > { %v3828_v58 = vadd.f32 %v8545_v60, %v3730_v21  ;;  %3845 = vrot.lane.b32.xlu1 %v3827_v57, %s9487_s6 }
 0xcd5   : > { %3849 = vrot.lane.b32.xlu0 %v3828_v58, %s9488_s1 }
 0xcd7   : > { %v3734_v45 = vpop.f32.mrb[100].mxu0 }
 0xcd8   : > { %v8561_v9 = vadd.f32 %v8548_v15, %v3734_v45  ;;  %v3736_v34 = vpop.f32.mrb[101].mxu0 }
 0xcd9   : > { %v3829_v31 = vadd.f32 %v8545_v60, %v3736_v34  ;;  %v3738_v43 = vpop.f32.mrb[102].mxu0 }
 0xcda   : > { %v8565_v24 = vadd.f32 %v8548_v15, %v3738_v43  ;;  %v3740_v25 = vpop.f32.mrb[103].mxu0 }
 0xcdb   : > { %v3830_v5 = vadd.f32 %v8545_v60, %v3740_v25  ;;  %3853 = vrot.lane.b32.xlu1 %v3829_v31, %s9489_s2 }
 0xcdd   : > { %3857 = vrot.lane.b32.xlu0 %v3830_v5, %s9490_s4 }
 0xcdf   : > { %v3744_v57 = vpop.f32.mrb[104].mxu0 }
 0xce0   : > { %v8571_v30 = vadd.f32 %v8548_v15, %v3744_v57  ;;  %v3746_v21 = vpop.f32.mrb[105].mxu0 }
 0xce1   : > { %v3831_v58 = vadd.f32 %v8545_v60, %v3746_v21  ;;  %v3748_v45 = vpop.f32.mrb[106].mxu0 }
 0xce2   : > { %v8575_v34 = vadd.f32 %v8548_v15, %v3748_v45  ;;  %v3750_v43 = vpop.f32.mrb[107].mxu0 }
 0xce3   : > { %v3832_v29 = vadd.f32 %v8545_v60, %v3750_v43  ;;  %3861 = vrot.lane.b32.xlu1 %v3831_v58, %s9491_s3 }
 0xce5   : > { %3865 = vrot.lane.b32.xlu0 %v3832_v29, %s9416_s28 }
 0xce7   : > { %v3754_v31 = vpop.f32.mrb[108].mxu0 }
 0xce8   : > { %v8581_v25 = vadd.f32 %v8548_v15, %v3754_v31  ;;  %v3756_v5 = vpop.f32.mrb[109].mxu0 }
 0xce9   : > { %v3833_v57 = vadd.f32 %v8545_v60, %v3756_v5  ;;  %v3758_v33 = vpop.f32.mrb[110].mxu0 }
 0xcea   : > { %v8585_v21 = vadd.f32 %v8548_v15, %v3758_v33  ;;  %v3760_v45 = vpop.f32.mrb[111].mxu0 }
 0xceb   : > { %v3834_v39 = vadd.f32 %v8545_v60, %v3760_v45  ;;  %3869 = vrot.lane.b32.xlu1 %v3833_v57, %s9417_s23  ;;  %s6264_s23 = smov [#allocation12]  }
 0xced   : > { %3873 = vrot.lane.b32.xlu0 %v3834_v39, %s9418_s21  ;;  %s6130_s21 = sshll.u32 %s6264_s23, 4  ;;  %s6131_s21 = int_to_ptr.vmem [resolvable:$false] %s6130_s21 }
 0xcef   : > { %v3764_v58 = vpop.f32.mrb[112].mxu0 }
 0xcf0   : > { %v8591_v29 = vadd.f32 %v8548_v15, %v3764_v58  ;;  %v3766_v43 = vpop.f32.mrb[113].mxu0 }
 0xcf1   : > { %v3835_v31 = vadd.f32 %v8545_v60, %v3766_v43  ;;  %v3768_v26 = vpop.f32.mrb[114].mxu0 }
 0xcf2   : > { %v8595_v5 = vadd.f32 %v8548_v15, %v3768_v26  ;;  %v3770_v33 = vpop.f32.mrb[115].mxu0 }
 0xcf3   : > { %v3836_v18 = vadd.f32 %v8545_v60, %v3770_v33  ;;  %3877 = vrot.lane.b32.xlu1 %v3835_v31, %s9419_s13 }
 0xcf5   : > { %3881 = vrot.lane.b32.xlu0 %v3836_v18, %s9420_s26 }
 0xcf7   : > { %v3774_v57 = vpop.f32.mrb[116].mxu0 }
 0xcf8   : > { %v8601_v39 = vadd.f32 %v8548_v15, %v3774_v57  ;;  %v3776_v45 = vpop.f32.mrb[117].mxu0 }
 0xcf9   : > { %v3837_v58 = vadd.f32 %v8545_v60, %v3776_v45  ;;  %v3778_v35 = vpop.f32.mrb[118].mxu0 }
 0xcfa   : > { %v8605_v43 = vadd.f32 %v8548_v15, %v3778_v35  ;;  %v3780_v26 = vpop.f32.mrb[119].mxu0 }
 0xcfb   : > { %v3838_v53 = vadd.f32 %v8545_v60, %v3780_v26  ;;  %3885 = vrot.lane.b32.xlu1 %v3837_v58, %s9421_s29 }
 0xcfd   : > { %3889 = vrot.lane.b32.xlu0 %v3838_v53, %s9422_s8  ;;  %s9617_s8 = sld [smem:[#allocation83_spill]] }
 0xcff   : > { %v3784_v31 = vpop.f32.mrb[120].mxu0 }
 0xd00   : > { %v8611_v18 = vadd.f32 %v8548_v15, %v3784_v31  ;;  %v3786_v33 = vpop.f32.mrb[121].mxu0 }
 0xd01   : > { %v3839_v57 = vadd.f32 %v8545_v60, %v3786_v33  ;;  %v3788_v44 = vpop.f32.mrb[122].mxu0 }
 0xd02   : > { %v8615_v45 = vadd.f32 %v8548_v15, %v3788_v44  ;;  %v3790_v35 = vpop.f32.mrb[123].mxu0 }
 0xd03   : > { %v3840_v37 = vadd.f32 %v8545_v60, %v3790_v35  ;;  %3893 = vrot.lane.b32.xlu1 %v3839_v57, %s9423_s5 }
 0xd05   : > { %3897 = vrot.lane.b32.xlu0 %v3840_v37, %s9424_s24 }
 0xd07   : > { %v3794_v58 = vpop.f32.mrb[124].mxu0 }
 0xd08   : > { %v8621_v53 = vadd.f32 %v8548_v15, %v3794_v58  ;;  %v3796_v26 = vpop.f32.mrb[125].mxu0 }
 0xd09   : > { %v3841_v31 = vadd.f32 %v8545_v60, %v3796_v26  ;;  %v3798_v38 = vpop.f32.mrb[126].mxu0 }
 0xd0a   : > { %v8625_v33 = vadd.f32 %v8548_v15, %v3798_v38  ;;  %v3800_v44 = vpop.f32.mrb[127].mxu0 }
 0xd0b   : > { %v3842_v13 = vadd.f32 %v8545_v60, %v3800_v44  ;;  %3901 = vrot.lane.b32.xlu1 %v3841_v31, %s9425_s27  ;;  %s4625_s27 = sshll.u32 %s7508_s25, 4  ;;  %s9037_s27 = int_to_ptr.vmem [resolvable:$true] %s4625_s27 }
 0xd0c   : > { %s6126_s28 = scalar_lea.vmem %s9037_s27, 4096  ;;  %p6133_p12 = scmp.lt.s32.totalorder %s9037_s27, %s6131_s21 }
 0xd0d   : > { %3905 = vrot.lane.b32.xlu0 %v3842_v13, %s9426_s19  ;;  %s4596_s19 = scalar_lea.sflag [#allocation13], %s6546_s22  ;;  %p6127_p10 = scmp.ne.s32.totalorder %s9037_s27, %s6126_s28 }
 0xd0f   : > { %4214 = vrot.lane.b32.xlu1 %v6847_v0, %s6263_s15  ;;  %p6128_p3 = pnand %p6127_p10, %p6498_p5 }
 0xd11   : > { %4212 = vrot.lane.b32.xlu0 %v6833_v10, %s6263_s15  ;;  %p6129_p7 = pneg %p6128_p3 }
 0xd45   : > { %v8634_v37 = vpop.permute.xlu1 %3845 }
 0xd46   : > { %v9332_v35 = vrot.slane %v8634_v37, 1 }
 0xd47   : > { %v3850_v57 = vpop.permute.xlu0 %3849 }
 0xd48   : > { %v3908_v38 = vrot.slane %v3850_v57, 1 }
 0xd4a   : > { %v3937_v60 = vsel %vm1720_vm2, %v9332_v35, %v3908_v38 }
 0xd4b   : > { %v3939_v13 = vsel %vm1769_vm3, 0.0, %v3937_v60  ;;  %vm9543_vm3 = vcmp.eq.s32.totalorder %v7051_v32, %v9494_v63 }
 0xd4c   : > { %v3955_v10 = vsel %vm1737_vm4, %v8634_v37, %v3939_v13  ;;  %vm9544_vm4 = vcmp.le.s32.totalorder %v7051_v32, %v9496_v7 }
 0xd4d   : > { %v3854_v0 = vpop.permute.xlu1 %3853  ;;  %v8649_v15 = vadd.f32 %v3955_v10, %v8551_v55 }
 0xd4e   : > { %v3909_v58 = vrot.slane %v3854_v0, 1 }
 0xd4f   : > { %v3858_v26 = vpop.permute.xlu0 %3857  ;;  %3987 = vmax.xlane.f32.xlu1 %v8649_v15 }
 0xd50   : > { %v3936_v31 = vsel %vm1720_vm2, %v3908_v38, %v3909_v58  ;;  %v3910_v44 = vrot.slane %v3858_v26, 1 }
 0xd51   : > { %v3940_v46 = vsel %vm1770_vm5, 0.0, %v3936_v31  ;;  %vm9545_vm5 = vcmp.eq.s32.totalorder %v7051_v32, %v9498_v42 }
 0xd52   : > { %v3935_v60 = vsel %vm1720_vm2, %v3909_v58, %v3910_v44  ;;  %v3956_v55 = vsel %vm1738_vm6, %v3850_v57, %v3940_v46  ;;  %vm9546_vm6 = vcmp.le.s32.totalorder %v7051_v32, %v9500_v54 }
 0xd53   : > { %v8663_v13 = vadd.f32 %v3956_v55, %v8555_v22  ;;  %v3941_v10 = vsel %vm1771_vm7, 0.0, %v3935_v60  ;;  %vm9547_vm7 = vcmp.eq.s32.totalorder %v7051_v32, %v9502_v52  ;;  %v9548_v55 = vld [vmem:[#allocation44_spill] sm:$0xff] }
 0xd54   : > { %v3957_v38 = vsel %vm9542_vm1, %v3854_v0, %v3941_v10  ;;  %vm9549_vm8 = vcmp.le.s32.totalorder %v7051_v32, %v9548_v55 }
 0xd55   : > { %3989 = vmax.xlane.f32.xlu0 %v8663_v13  ;;  %v3862_v28 = vpop.permute.xlu1 %3861  ;;  %v8673_v35 = vadd.f32 %v3957_v38, %v8561_v9  ;;  %v9550_v38 = vld [vmem:[#allocation47_spill] sm:$0xff] }
 0xd56   : > { %v3911_v31 = vrot.slane %v3862_v28, 1  ;;  %vm9551_vm10 = vcmp.eq.s32.totalorder %v7051_v32, %v9550_v38 }
 0xd57   : > { %v3866_v58 = vpop.permute.xlu0 %3865 }
 0xd58   : > { %v3934_v50 = vsel %vm1720_vm2, %v3910_v44, %v3911_v31  ;;  %v3912_v22 = vrot.slane %v3866_v58, 1 }
 0xd59   : > { %3991 = vmax.xlane.f32.xlu0 %v8673_v35  ;;  %v3942_v41 = vsel %vm9543_vm3, 0.0, %v3934_v50 }
 0xd5a   : > { %v3933_v62 = vsel %vm1720_vm2, %v3911_v31, %v3912_v22  ;;  %v3958_v57 = vsel %vm9544_vm4, %v3858_v26, %v3942_v41  ;;  %v9552_v31 = vld [vmem:[#allocation45_spill] sm:$0xff] }
 0xd5b   : > { %v8687_v9 = vadd.f32 %v3958_v57, %v8565_v24  ;;  %v3943_v0 = vsel %vm9545_vm5, 0.0, %v3933_v62  ;;  %vm9553_vm9 = vcmp.le.s32.totalorder %v7051_v32, %v9552_v31  ;;  %v9554_v57 = vld [vmem:[#allocation49_spill] sm:$0xff] }
 0xd5c   : > { %v3959_v44 = vsel %vm9546_vm6, %v3862_v28, %v3943_v0  ;;  %vm9555_vm11 = vcmp.eq.s32.totalorder %v7051_v32, %v9554_v57  ;;  %v9562_v31 = vld [vmem:[#allocation53_spill] sm:$0xff] }
 0xd5d   : > { %3993 = vmax.xlane.f32.xlu1 %v8687_v9  ;;  %v3870_v63 = vpop.permute.xlu1 %3869  ;;  %v8697_v46 = vadd.f32 %v3959_v44, %v8571_v30  ;;  %vm9563_vm5 = vcmp.eq.s32.totalorder %v7051_v32, %v9562_v31 }
 0xd5e   : > { %v3913_v60 = vrot.slane %v3870_v63, 1 }
 0xd5f   : > { %v3874_v7 = vpop.permute.xlu0 %3873  ;;  %3995 = vmax.xlane.f32.xlu0 %v8697_v46 }
 0xd60   : > { %v3932_v24 = vsel %vm1720_vm2, %v3912_v22, %v3913_v60  ;;  %v3914_v26 = vrot.slane %v3874_v7, 1 }
 0xd61   : > { %v3944_v42 = vsel %vm9547_vm7, 0.0, %v3932_v24  ;;  %v9558_v24 = vld [vmem:[#allocation52_spill] sm:$0xff]  ;;  %vm9566_vm7 = vcmp.eq.s32.totalorder %v7051_v32, %v9522_v61  ;;  %v9568_v61 = vld [vmem:[#allocation58_spill] sm:$0xff] }
 0xd62   : > { %v3931_v54 = vsel %vm1720_vm2, %v3913_v60, %v3914_v26  ;;  %v3960_v30 = vsel %vm9549_vm8, %v3866_v58, %v3944_v42  ;;  %vm9559_vm3 = vcmp.eq.s32.totalorder %v7051_v32, %v9558_v24  ;;  %vm9567_vm8 = vcmp.le.s32.totalorder %v7051_v32, %v9524_v51 }
 0xd63   : > { %v8711_v10 = vadd.f32 %v3960_v30, %v8575_v34  ;;  %v3945_v28 = vsel %vm9551_vm10, 0.0, %v3931_v54  ;;  %vm9569_vm10 = vcmp.eq.s32.totalorder %v7051_v32, %v9568_v61 }
 0xd64   : > { %v3961_v50 = vsel %vm9553_vm9, %v3870_v63, %v3945_v28  ;;  %v9556_v63 = vld [vmem:[#allocation48_spill] sm:$0xff] }
 0xd65   : > { %3997 = vmax.xlane.f32.xlu1 %v8711_v10  ;;  %v3878_v52 = vpop.permute.xlu1 %3877  ;;  %v8721_v22 = vadd.f32 %v3961_v50, %v8581_v25  ;;  %vm9557_vm1 = vcmp.le.s32.totalorder %v7051_v32, %v9556_v63 }
 0xd66   : > { %v3915_v41 = vrot.slane %v3878_v52, 1 }
 0xd67   : > { %v3882_v62 = vpop.permute.xlu0 %3881  ;;  %3999 = vmax.xlane.f32.xlu0 %v8721_v22 }
 0xd68   : > { %v3930_v34 = vsel %vm1720_vm2, %v3914_v26, %v3915_v41  ;;  %v3916_v58 = vrot.slane %v3882_v62, 1  ;;  %v9560_v26 = vld [vmem:[#allocation50_spill] sm:$0xff] }
 0xd69   : > { %v3946_v0 = vsel %vm9555_vm11, 0.0, %v3930_v34  ;;  %vm9561_vm4 = vcmp.le.s32.totalorder %v7051_v32, %v9560_v26  ;;  %vm9572_vm11 = vcmp.eq.s32.totalorder %v7051_v32, %v9460_v20 }
 0xd6a   : > { %v3929_v44 = vsel %vm1720_vm2, %v3915_v41, %v3916_v58  ;;  %v3962_v25 = vsel %vm9557_vm1, %v3874_v7, %v3946_v0  ;;  %v9564_v41 = vld [vmem:[#allocation51_spill] sm:$0xff]  ;;  %vm9573_vm1 = vcmp.le.s32.totalorder %v7051_v32, %v9462_v8 }
 0xd6b   : > { %v8735_v60 = vadd.f32 %v3962_v25, %v8585_v21  ;;  %v3947_v42 = vsel %vm9559_vm3, 0.0, %v3929_v44  ;;  %vm9565_vm6 = vcmp.le.s32.totalorder %v7051_v32, %v9564_v41  ;;  %vm9574_vm3 = vcmp.eq.s32.totalorder %v7051_v32, %v7326_v4 }
 0xd6c   : > { %v3963_v54 = vsel %vm9561_vm4, %v3878_v52, %v3947_v42  ;;  %v9570_v42 = vld [vmem:[#allocation56_spill] sm:$0xff] }
 0xd6d   : > { %4001 = vmax.xlane.f32.xlu1 %v8735_v60  ;;  %v3886_v55 = vpop.permute.xlu1 %3885  ;;  %v8745_v30 = vadd.f32 %v3963_v54, %v8591_v29  ;;  %vm9571_vm9 = vcmp.le.s32.totalorder %v7051_v32, %v9570_v42  ;;  %v9577_v32 = vld [vmem:[#allocation25_spill] sm:$0xff] }
 0xd6e   : > { %v3917_v38 = vrot.slane %v3886_v55, 1 }
 0xd6f   : > { %v3890_v28 = vpop.permute.xlu0 %3889  ;;  %4003 = vmax.xlane.f32.xlu0 %v8745_v30 }
 0xd70   : > { %v3928_v21 = vsel %vm1720_vm2, %v3916_v58, %v3917_v38  ;;  %v3918_v7 = vrot.slane %v3890_v28, 1 }
 0xd71   : > { %v3948_v50 = vsel %vm9563_vm5, 0.0, %v3928_v21 }
 0xd72   : > { %v3927_v52 = vsel %vm1720_vm2, %v3917_v38, %v3918_v7  ;;  %v3964_v29 = vsel %vm9565_vm6, %v3882_v62, %v3948_v50  ;;  %v9575_v50 = vrot.slane %v8634_v37, 1 }
 0xd73   : > { %v8759_v34 = vadd.f32 %v3964_v29, %v8595_v5  ;;  %v3949_v57 = vsel %vm9566_vm7, 0.0, %v3927_v52 }
 0xd74   : > { %v3965_v58 = vsel %vm9567_vm8, %v3886_v55, %v3949_v57 }
 0xd75   : > { %4005 = vmax.xlane.f32.xlu1 %v8759_v34  ;;  %v3894_v0 = vpop.permute.xlu1 %3893  ;;  %v8769_v44 = vadd.f32 %v3965_v58, %v8601_v39 }
 0xd76   : > { %v3919_v63 = vrot.slane %v3894_v0, 1 }
 0xd77   : > { %v3898_v25 = vpop.permute.xlu0 %3897  ;;  %4007 = vmax.xlane.f32.xlu0 %v8769_v44 }
 0xd78   : > { %v3926_v5 = vsel %vm1720_vm2, %v3918_v7, %v3919_v63  ;;  %v3920_v62 = vrot.slane %v3898_v25, 1 }
 0xd79   : > { %v3950_v24 = vsel %vm9569_vm10, 0.0, %v3926_v5 }
 0xd7a   : > { %v3925_v51 = vsel %vm1720_vm2, %v3919_v63, %v3920_v62  ;;  %v3966_v39 = vsel %vm9571_vm9, %v3890_v28, %v3950_v24 }
 0xd7b   : > { %v8783_v26 = vadd.f32 %v3966_v39, %v8605_v43  ;;  %v3951_v54 = vsel %vm9572_vm11, 0.0, %v3925_v51 }
 0xd7c   : > { %v3967_v55 = vsel %vm9573_vm1, %v3894_v0, %v3951_v54 }
 0xd7d   : > { %4009 = vmax.xlane.f32.xlu1 %v8783_v26  ;;  %v3902_v38 = vpop.permute.xlu1 %3901  ;;  %v8793_v21 = vadd.f32 %v3967_v55, %v8611_v18 }
 0xd7e   : > { %v3921_v7 = vrot.slane %v3902_v38, 1 }
 0xd7f   : > { %v3906_v31 = vpop.permute.xlu0 %3905  ;;  %4011 = vmax.xlane.f32.xlu0 %v8793_v21 }
 0xd80   : > { %v3924_v43 = vsel %vm1720_vm2, %v3920_v62, %v3921_v7  ;;  %v3922_v28 = vrot.slane %v3906_v31, 1 }
 0xd81   : > { %v3952_v20 = vsel %vm9574_vm3, 0.0, %v3924_v43  ;;  %v4215_v37 = vpop.permute.xlu1 %4214 }
 0xd82   : > { %v3923_v8 = vsel %vm1720_vm2, %v3921_v7, %v3922_v28  ;;  %v3938_v18 = vsel %vm1720_vm2, %v3922_v28, %v9575_v50  ;;  %v3968_v52 = vsel %vm1750_vm15, %v3898_v25, %v3952_v20  ;;  %vm2909_vm2 = vcmask 523520  }
 0xd83   : > { %v3954_v41 = vsel %vm1784_vm0, 0.0, %v3938_v18  ;;  %v4213_v29 = vpop.permute.xlu0 %4212  ;;  %v8814_v4 = vadd.f32 %v3968_v52, %v8615_v45  ;;  %v3953_v57 = vsel %vm1783_vm13, 0.0, %v3923_v8  ;;  %vm4373_vm13 = vcmask 1048320  }
 0xd84   : > { %v3970_v14 = vsel %vm1752_vm12, %v3906_v31, %v3954_v41  ;;  %5481 = vmatprep.subr.bf16.mxu1 %v4213_v29  ;;  %v3969_v1 = vsel %vm1751_vm14, %v3902_v38, %v3953_v57  ;;  %vm3641_vm12 = vcmask 785920  }
 0xd85   : > { %v8826_v3 = vadd.f32 %v3970_v14, %v8625_v33  ;;  %5482 = vmatpush3.bf16.msra.mxu1 %v4213_v29  ;;  %4013 = vmax.xlane.f32.xlu1 %v8814_v4  ;;  %v8830_v45 = vadd.f32 %v3969_v1, %v8621_v53  ;;  %v9580_v53 = vld [vmem:[#allocation28_spill] sm:$0xff] }
 0xd86   : > { %5483 = vmatprep.subr.bf16.mxu1 %v4215_v37 }
 0xd87   : > { %4015 = vmax.xlane.f32.xlu0 %v8830_v45 }
 0xd89   : > { %5484 = vmatpush3.bf16.msra.mxu1 %v4215_v37 }
 0xd96   : > { %4220 = vrot.lane.b32.xlu1 %v9576_v27, %s6263_s15 }
 0xd9d   : > { %4216 = vrot.lane.b32.xlu0 %v9577_v32, %s6263_s15 }
 0xda1   : > { %4218 = vrot.lane.b32.xlu0 %v9578_v47, %s6263_s15 }
 0xda5   : > { %4224 = vrot.lane.b32.xlu0 %v9579_v36, %s6263_s15 }
 0xdba   : > { %4017 = vmax.xlane.f32.xlu1 %v8826_v3 }
 0xdcb   : > { %4222 = vrot.lane.b32.xlu1 %v9580_v53, %s6263_s15 }
 0xddc   : > { %v3988_v33 = vpop.xlane.xlu1 %3987 }
 0xddd   : > { %v4019_v58 = vsub.f32 %v8649_v15, %v3988_v33 }
 0xddf   : > { %v4035_v0 = vmul.f32 1.442695, %v4019_v58 }
 0xde1   : > { %5930 = vpow2.f32 %v4035_v0 }
 0xde2   : > { %v3990_v63 = vpop.xlane.xlu0 %3989 }
 0xde3   : > { %v4020_v25 = vsub.f32 %v8663_v13, %v3990_v63 }
 0xde5   : > { %v4037_v5 = vmul.f32 1.442695, %v4020_v25 }
 0xde6   : > { %v3992_v62 = vpop.xlane.xlu0 %3991 }
 0xde7   : > { %5932 = vpow2.f32 %v4037_v5  ;;  %v4021_v61 = vsub.f32 %v8673_v35, %v3992_v62 }
 0xde9   : > { %v4039_v24 = vmul.f32 1.442695, %v4021_v61 }
 0xdea   : > { %v3994_v51 = vpop.xlane.xlu1 %3993 }
 0xdeb   : > { %5934 = vpow2.f32 %v4039_v24  ;;  %v4022_v42 = vsub.f32 %v8687_v9, %v3994_v51  ;;  %v8849_v15 = vpop.eup %5930 }
 0xdec   : > { %v3996_v39 = vpop.xlane.xlu0 %3995 }
 0xded   : > { %v4041_v54 = vmul.f32 1.442695, %v4022_v42  ;;  %v4023_v55 = vsub.f32 %v8697_v46, %v3996_v39 }
 0xdef   : > { %5936 = vpow2.f32 %v4041_v54  ;;  %v4043_v38 = vmul.f32 1.442695, %v4023_v55  ;;  %4067 = vadd.xlane.f32.xlu1 %v8849_v15  ;;  %v9581_v55 = vld [vmem:[#allocation31_spill] sm:$0xff] }
 0xdf1   : > { %v8852_v13 = vpop.eup %5932  ;;  %5938 = vpow2.f32 %v4043_v38  ;;  %v9582_v38 = vld [vmem:[#allocation60_spill] sm:$0xff] }
 0xdf2   : > { %v3998_v7 = vpop.xlane.xlu1 %3997 }
 0xdf3   : > { %v4024_v35 = vsub.f32 %v8711_v10, %v3998_v7  ;;  %4069 = vadd.xlane.f32.xlu1 %v8852_v13  ;;  %v9583_v7 = vld [vmem:[#allocation59_spill] sm:$0xff] }
 0xdf4   : > { %v4000_v31 = vpop.xlane.xlu0 %3999 }
 0xdf5   : > { %v8856_v9 = vpop.eup %5934  ;;  %v4045_v43 = vmul.f32 1.442695, %v4024_v35  ;;  %v4025_v46 = vsub.f32 %v8721_v22, %v4000_v31  ;;  %v9584_v35 = vpack.c.bf16 %v9582_v38, %v9583_v7  ;;  %v9585_v31 = vpack.c.bf16 %v8501_v19, %v8495_v49 }
 0xdf7   : > { %5940 = vpow2.f32 %v4045_v43  ;;  %v4047_v28 = vmul.f32 1.442695, %v4025_v46  ;;  %4071 = vadd.xlane.f32.xlu1 %v8856_v9  ;;  %v9586_v43 = vld [vmem:[#allocation61_spill] sm:$0xff]  ;;  %v9587_v46 = vld [vmem:[#allocation32_spill] sm:$0xff] }
 0xdf9   : > { %v8860_v20 = vpop.eup %5936  ;;  %5942 = vpow2.f32 %v4047_v28  ;;  %v9588_v28 = vpack.c.bf16 %v9586_v43, %v9587_v46 }
 0xdfa   : > { %v4002_v8 = vpop.xlane.xlu1 %4001 }
 0xdfb   : > { %v8862_v50 = vpop.eup %5938  ;;  %v4026_v10 = vsub.f32 %v8735_v60, %v4002_v8  ;;  %4073 = vadd.xlane.f32.xlu1 %v8860_v20  ;;  %v9589_v8 = vpack.c.bf16 %v8513_v11, %v8507_v23  ;;  %v9593_v23 = vld [vmem:[#allocation35_spill] sm:$0xff]  ;;  %v9594_v11 = vld [vmem:[#allocation57_spill] sm:$0xff] }
 0xdfc   : > { %v4004_v18 = vpop.xlane.xlu0 %4003  ;;  %4075 = vadd.xlane.f32.xlu0 %v8862_v50 }
 0xdfd   : > { %v4049_v52 = vmul.f32 1.442695, %v4026_v10  ;;  %v4027_v22 = vsub.f32 %v8745_v30, %v4004_v18 }
 0xdff   : > { %5944 = vpow2.f32 %v4049_v52  ;;  %v4051_v41 = vmul.f32 1.442695, %v4027_v22  ;;  %v9590_v52 = vld [vmem:[#allocation65_spill] sm:$0xff]  ;;  %v9591_v22 = vld [vmem:[#allocation63_spill] sm:$0xff] }
 0xe01   : > { %v8868_v29 = vpop.eup %5940  ;;  %5946 = vpow2.f32 %v4051_v41  ;;  %v9592_v41 = vpack.c.bf16 %v9590_v52, %v9591_v22 }
 0xe02   : > { %4077 = vadd.xlane.f32.xlu1 %v8868_v29  ;;  %v4006_v57 = vpop.xlane.xlu1 %4005 }
 0xe03   : > { %v8871_v14 = vpop.eup %5942  ;;  %v4028_v60 = vsub.f32 %v8759_v34, %v4006_v57 }
 0xe04   : > { %v4008_v1 = vpop.xlane.xlu0 %4007  ;;  %4079 = vadd.xlane.f32.xlu0 %v8871_v14 }
 0xe05   : > { %v4053_v37 = vmul.f32 1.442695, %v4028_v60  ;;  %v4029_v27 = vsub.f32 %v8769_v44, %v4008_v1  ;;  %v9596_v1 = vpack.c.bf16 %v8497_v17, %v8493_v56 }
 0xe07   : > { %5948 = vpow2.f32 %v4053_v37  ;;  %v4055_v30 = vmul.f32 1.442695, %v4029_v27  ;;  %v9597_v37 = vld [vmem:[#allocation34_spill] sm:$0xff]  ;;  %v9598_v27 = vld [vmem:[#allocation33_spill] sm:$0xff] }
 0xe09   : > { %v8876_v32 = vpop.eup %5944  ;;  %5950 = vpow2.f32 %v4055_v30  ;;  %v9599_v30 = vpack.c.bf16 %v9597_v37, %v9598_v27 }
 0xe0a   : > { %4081 = vadd.xlane.f32.xlu0 %v8876_v32  ;;  %v4010_v47 = vpop.xlane.xlu1 %4009 }
 0xe0b   : > { %v4030_v36 = vsub.f32 %v8783_v26, %v4010_v47  ;;  %v8880_v33 = vpop.eup %5946  ;;  %v9600_v47 = vpack.c.bf16 %v8509_v12, %v8505_v59 }
 0xe0c   : > { %v4012_v53 = vpop.xlane.xlu0 %4011 }
 0xe0d   : > { %v4057_v34 = vmul.f32 1.442695, %v4030_v36  ;;  %v4031_v58 = vsub.f32 %v8793_v21, %v4012_v53  ;;  %v9601_v53 = vld [vmem:[#allocation64_spill] sm:$0xff] }
 0xe0e   : > { %4083 = vadd.xlane.f32.xlu0 %v8880_v33 }
 0xe0f   : > { %5952 = vpow2.f32 %v4057_v34  ;;  %v4059_v44 = vmul.f32 1.442695, %v4031_v58  ;;  %v9602_v34 = vld [vmem:[#allocation62_spill] sm:$0xff] }
 0xe10   : > { %v9603_v58 = vpack.c.bf16 %v9601_v53, %v9602_v34 }
 0xe11   : > { %v8884_v0 = vpop.eup %5948  ;;  %5954 = vpow2.f32 %v4059_v44 }
 0xe12   : > { %4085 = vadd.xlane.f32.xlu1 %v8884_v0  ;;  %v4014_v63 = vpop.xlane.xlu1 %4013 }
 0xe13   : > { %v8887_v25 = vpop.eup %5950  ;;  %v4032_v26 = vsub.f32 %v8814_v4, %v4014_v63 }
 0xe14   : > { %v4016_v5 = vpop.xlane.xlu0 %4015  ;;  %4087 = vadd.xlane.f32.xlu0 %v8887_v25 }
 0xe15   : > { %v4061_v62 = vmul.f32 1.442695, %v4032_v26  ;;  %v4033_v21 = vsub.f32 %v8830_v45, %v4016_v5 }
 0xe16   : > { %v4221_v4 = vpop.permute.xlu1 %4220 }
 0xe17   : > { %5956 = vpow2.f32 %v4061_v62  ;;  %v4063_v61 = vmul.f32 1.442695, %v4033_v21 }
 0xe18   : > { %v4217_v24 = vpop.permute.xlu0 %4216 }
 0xe19   : > { %v8892_v51 = vpop.eup %5952  ;;  %5958 = vpow2.f32 %v4063_v61  ;;  %5485 = vmatprep.subr.bf16.mxu1 %v4217_v24 }
 0xe1a   : > { %5486 = vmatpush3.bf16.msra.mxu1 %v4217_v24  ;;  %4089 = vadd.xlane.f32.xlu0 %v8892_v51 }
 0xe1b   : > { %v8895_v42 = vpop.eup %5954 }
 0xe1c   : > { %v4219_v39 = vpop.permute.xlu0 %4218  ;;  %4091 = vadd.xlane.f32.xlu1 %v8895_v42 }
 0xe1d   : > { %5487 = vmatprep.subr.bf16.mxu1 %v4219_v39 }
 0xe1e   : > { %5488 = vmatpush3.bf16.msra.mxu1 %v4219_v39 }
 0xe1f   : > { %5489 = vmatprep.subr.bf16.mxu1 %v4221_v4 }
 0xe20   : > { %v4225_v57 = vpop.permute.xlu0 %4224 }
 0xe21   : > { %v8898_v45 = vpop.eup %5956 }
 0xe22   : > { %4093 = vadd.xlane.f32.xlu0 %v8898_v45  ;;  %5490 = vmatpush3.bf16.msra.mxu1 %v4221_v4 }
 0xe23   : > { %v8901_v54 = vpop.eup %5958 }
 0xe24   : > { %4095 = vadd.xlane.f32.xlu1 %v8901_v54 }
 0xe35   : > { %4226 = vrot.lane.b32.xlu1 %v9581_v55, %s6263_s15 }
 0xe39   : > { %2887 = vrot.lane.b32.xlu1 %v9584_v35, %s6263_s15 }
 0xe3d   : > { %3617 = vrot.lane.b32.xlu1 %v9585_v31, %s9492_s9 }
 0xe41   : > { %2889 = vrot.lane.b32.xlu1 %v9588_v28, %s6263_s15 }
 0xe45   : > { %3621 = vrot.lane.b32.xlu1 %v9589_v8, %s9492_s9 }
 0xe47   : > { %v4018_v10 = vpop.xlane.xlu1 %4017 }
 0xe48   : > { %v4034_v18 = vsub.f32 %v8826_v3, %v4018_v10  ;;  %v9595_v3 = vpack.c.bf16 %v9593_v23, %v9594_v11 }
 0xe49   : > { %2893 = vrot.lane.b32.xlu1 %v9592_v41, %s6263_s15 }
 0xe4a   : > { %v4065_v49 = vmul.f32 1.442695, %v4034_v18 }
 0xe4b   : > { %v4223_v19 = vpop.permute.xlu1 %4222 }
 0xe4c   : > { %5960 = vpow2.f32 %v4065_v49  ;;  %5491 = vmatprep.subr.bf16.mxu1 %v4223_v19 }
 0xe4d   : > { %5492 = vmatpush3.bf16.msra.mxu1 %v4223_v19 }
 0xe4e   : > { %5493 = vmatprep.subr.bf16.mxu1 %v4225_v57 }
 0xe51   : > { %5494 = vmatpush3.bf16.msra.mxu1 %v4225_v57 }
 0xe56   : > { %v8927_v60 = vpop.eup %5960 }
 0xe57   : > { %4097 = vadd.xlane.f32.xlu0 %v8927_v60 }
 0xe6d   : > { %2885 = vrot.lane.b32.xlu0 %v9595_v3, %s6263_s15 }
 0xe71   : > { %3619 = vrot.lane.b32.xlu0 %v9596_v1, %s9492_s9 }
 0xe75   : > { %2891 = vrot.lane.b32.xlu0 %v9599_v30, %s6263_s15 }
 0xe79   : > { %3623 = vrot.lane.b32.xlu0 %v9600_v47, %s9492_s9 }
 0xe7c   : > { %v4068_v36 = vpop.xlane.xlu1 %4067 }
 0xe7d   : > { %2895 = vrot.lane.b32.xlu0 %v9603_v58, %s6263_s15  ;;  %5962 = vrcp.f32 %v4068_v36 }
 0xe80   : > { %v4070_v56 = vpop.xlane.xlu1 %4069 }
 0xe81   : > { %5964 = vrcp.f32 %v4070_v56 }
 0xe84   : > { %v4072_v17 = vpop.xlane.xlu1 %4071 }
 0xe85   : > { %5966 = vrcp.f32 %v4072_v17 }
 0xe87   : > { %v5963_v63 = vpop.eup %5962 }
 0xe88   : > { %v4074_v44 = vpop.xlane.xlu1 %4073  ;;  %v4115_v59 = vmul.f32 %v5963_v63, %v8849_v15 }
 0xe89   : > { %5968 = vrcp.f32 %v4074_v44  ;;  %v4076_v5 = vpop.xlane.xlu0 %4075 }
 0xe8a   : > { %5970 = vrcp.f32 %v4076_v5 }
 0xe8b   : > { %v5965_v26 = vpop.eup %5964 }
 0xe8c   : > { %v4116_v12 = vmul.f32 %v5965_v26, %v8852_v13 }
 0xe8e   : > { %v4131_v62 = vpack.c.bf16 %v4116_v12, %v4115_v59 }
 0xe8f   : > { %v4078_v21 = vpop.xlane.xlu1 %4077  ;;  %v5967_v61 = vpop.eup %5966 }
 0xe90   : > { %5972 = vrcp.f32 %v4078_v21  ;;  %5220 = vst [vmem:[%s7508_s25 + $0xc0] sm:$0xff] %v4131_v62   ;;  %5497 = vmatprep.mubr.bf16.mxu1 %v4131_v62  ;;  %v4117_v4 = vmul.f32 %v5967_v61, %v8856_v9  ;;  %v5698_v21 = vld [vmem:[#allocation9] sm:$0xff]   ;;  %v5699_v61 = vld [vmem:[#allocation9 + $0x8] sm:$0xff]  }
 0xe91   : > { %v4080_v39 = vpop.xlane.xlu0 %4079 }
 0xe92   : > { %5974 = vrcp.f32 %v4080_v39  ;;  %v5703_v39 = vld [vmem:[#allocation9 + $0x28] sm:$0xff]  }
 0xe93   : > { %v5969_v24 = vpop.eup %5968 }
 0xe94   : > { %v4118_v55 = vmul.f32 %v5969_v24, %v8860_v20  ;;  %v5971_v7 = vpop.eup %5970  ;;  %v5700_v24 = vld [vmem:[#allocation9 + $0x10] sm:$0xff]  }
 0xe95   : > { %v4119_v31 = vmul.f32 %v5971_v7, %v8862_v50 }
 0xe96   : > { %v4132_v38 = vpack.c.bf16 %v4118_v55, %v4117_v4  ;;  %v5704_v4 = vld [vmem:[#allocation9 + $0x30] sm:$0xff]   ;;  %v5705_v55 = vld [vmem:[#allocation9 + $0x38] sm:$0xff]  }
 0xe97   : > { %v4082_v15 = vpop.xlane.xlu0 %4081 }
 0xe98   : > { %5976 = vrcp.f32 %v4082_v15  ;;  %5221 = vst [vmem:[%s7508_s25 + $0xc8] sm:$0xff] %v4132_v38  }
 0xe9a   : > { %v5973_v13 = vpop.eup %5972 }
 0xe9b   : > { %v4084_v35 = vpop.xlane.xlu0 %4083  ;;  %v4120_v43 = vmul.f32 %v5973_v13, %v8868_v29 }
 0xe9c   : > { %5978 = vrcp.f32 %v4084_v35  ;;  %v5975_v9 = vpop.eup %5974 }
 0xe9d   : > { %v4133_v46 = vpack.c.bf16 %v4120_v43, %v4119_v31  ;;  %v4121_v10 = vmul.f32 %v5975_v9, %v8871_v14  ;;  %v9605_v9 = vpack.c.bf16 %v8525_v16, %v8519_v6 }
 0xe9f   : > { %v4086_v28 = vpop.xlane.xlu1 %4085  ;;  %5222 = vst [vmem:[%s7508_s25 + $0xd0] sm:$0xff] %v4133_v46  }
 0xea0   : > { %5980 = vrcp.f32 %v4086_v28 }
 0xea1   : > { %v4088_v8 = vpop.xlane.xlu0 %4087 }
 0xea2   : > { %v5977_v20 = vpop.eup %5976  ;;  %5982 = vrcp.f32 %v4088_v8 }
 0xea3   : > { %v4122_v18 = vmul.f32 %v5977_v20, %v8876_v32 }
 0xea5   : > { %v4134_v52 = vpack.c.bf16 %v4122_v18, %v4121_v10 }
 0xea6   : > { %v5979_v50 = vpop.eup %5978 }
 0xea7   : > { %v4090_v22 = vpop.xlane.xlu0 %4089  ;;  %5223 = vst [vmem:[%s7508_s25 + $0xd8] sm:$0xff] %v4134_v52   ;;  %v4123_v49 = vmul.f32 %v5979_v50, %v8880_v33  ;;  %v9607_v50 = vld [vmem:[#allocation66_spill] sm:$0xff] }
 0xea8   : > { %5984 = vrcp.f32 %v4090_v22  ;;  %v9606_v22 = vld [vmem:[#allocation68_spill] sm:$0xff] }
 0xea9   : > { %v4092_v41 = vpop.xlane.xlu1 %4091 }
 0xeaa   : > { %v5981_v29 = vpop.eup %5980  ;;  %5986 = vrcp.f32 %v4092_v41  ;;  %v9610_v41 = vld [vmem:[#allocation67_spill] sm:$0xff] }
 0xeab   : > { %v4124_v19 = vmul.f32 %v5981_v29, %v8884_v0  ;;  %v9609_v29 = vld [vmem:[#allocation69_spill] sm:$0xff] }
 0xeac   : > { %v5983_v14 = vpop.eup %5982  ;;  %v9611_v6 = vpack.c.bf16 %v9609_v29, %v9610_v41 }
 0xead   : > { %v4135_v57 = vpack.c.bf16 %v4124_v19, %v4123_v49  ;;  %v4125_v3 = vmul.f32 %v5983_v14, %v8887_v25 }
 0xeaf   : > { %v4094_v23 = vpop.xlane.xlu0 %4093  ;;  %5224 = vst [vmem:[%s7508_s25 + $0xe0] sm:$0xff] %v4135_v57  }
 0xeb0   : > { %5988 = vrcp.f32 %v4094_v23  ;;  %v9612_v23 = vld [vmem:[#allocation41_spill] sm:$0xff] }
 0xeb1   : > { %v4096_v32 = vpop.xlane.xlu1 %4095  ;;  %v9613_v14 = vpack.c.bf16 %v8533_v2, %v9612_v23 }
 0xeb2   : > { %v5985_v11 = vpop.eup %5984  ;;  %5990 = vrcp.f32 %v4096_v32  ;;  %v9614_v32 = vld [vmem:[#allocation43_spill] sm:$0xff] }
 0xeb3   : > { %v4126_v1 = vmul.f32 %v5985_v11, %v8892_v51  ;;  %v9615_v11 = vld [vmem:[#allocation40_spill] sm:$0xff] }
 0xeb4   : > { %v5987_v33 = vpop.eup %5986 }
 0xeb5   : > { %v4227_v37 = vpop.permute.xlu1 %4226  ;;  %v4136_v27 = vpack.c.bf16 %v4126_v1, %v4125_v3  ;;  %v4127_v47 = vmul.f32 %v5987_v33, %v8895_v42  ;;  %v9616_v3 = vpack.c.bf16 %v9614_v32, %v9615_v11 }
 0xeb6   : > { %5495 = vmatprep.subr.bf16.mxu1 %v4227_v37 }
 0xeb7   : > { %5496 = vmatpush3.bf16.msra.mxu1 %v4227_v37  ;;  %5225 = vst [vmem:[%s7508_s25 + $0xe8] sm:$0xff] %v4136_v27  }
 0xeb8   : > { %5513 = vmatprep.subr.bf16.mxu1 %v5698_v21 }
 0xeb9   : > { %v2888_v0 = vpop.permute.xlu1 %2887 }
 0xeba   : > { %v5989_v30 = vpop.eup %5988  ;;  %2911 = vst.msk [vmem:[#allocation2 + $0x8] sm:$0xff] %vm2909_vm2, %v2888_v0  ;;  %5498 = vmatmul.mubr.bf16.vlgmr.msra.gmra.mrb[100].mxu1 %v4132_v38 }
 0xebb   : > { %5501 = vmatprep.mubr.bf16.mxu1 %v4133_v46  ;;  %v4128_v25 = vmul.f32 %v5989_v30, %v8898_v45  ;;  %5514 = vmatpush3.bf16.msra.mxu1 %v5698_v21  ;;  %v9604_v46 = vpack.c.bf16 %v8521_v40, %v8517_v48  ;;  %v9608_v48 = vpack.c.bf16 %v9606_v22, %v9607_v50 }
 0xebc   : > { %v5991_v17 = vpop.eup %5990  ;;  %5515 = vmatprep.subr.bf16.mxu1 %v5699_v61 }
 0xebd   : > { %v3618_v36 = vpop.permute.xlu1 %3617  ;;  %v4137_v51 = vpack.c.bf16 %v4128_v25, %v4127_v47  ;;  %v4129_v26 = vmul.f32 %v5991_v17, %v8901_v54  ;;  %v5701_v54 = vld [vmem:[#allocation9 + $0x18] sm:$0xff]  }
 0xebf   : > { %5226 = vst [vmem:[%s7508_s25 + $0xf0] sm:$0xff] %v4137_v51   ;;  %5516 = vmatpush3.bf16.msra.mxu1 %v5699_v61 }
 0xec0   : > { %5517 = vmatprep.subr.bf16.mxu1 %v5700_v24 }
 0xec1   : > { %v2890_v53 = vpop.permute.xlu1 %2889 }
 0xec2   : > { %2912 = vst.msk [vmem:[#allocation2 + $0x10] sm:$0xff] %vm2909_vm2, %v2890_v53  ;;  %5502 = vmatmul.mubr.bf16.gmra.mrb[104].mxu1 %v4134_v52 }
 0xec3   : > { %5505 = vmatprep.mubr.bf16.mxu1 %v4135_v57  ;;  %5518 = vmatpush3.bf16.msra.mxu1 %v5700_v24 }
 0xec4   : > { %5519 = vmatprep.subr.bf16.mxu1 %v5701_v54 }
 0xec5   : > { %v3622_v34 = vpop.permute.xlu1 %3621 }
 0xec6   : > { %3644 = vst.msk [vmem:[#allocation2 + $0x10] sm:$0xff] %vm3641_vm12, %v3622_v34 }
 0xec7   : > { %5520 = vmatpush3.bf16.msra.mxu1 %v5701_v54 }
 0xec9   : > { %v2894_v58 = vpop.permute.xlu1 %2893 }
 0xeca   : > { %2914 = vst.msk [vmem:[#allocation2 + $0x20] sm:$0xff] %vm2909_vm2, %v2894_v58  ;;  %5506 = vmatmul.mubr.bf16.gmra.mrb[108].mxu1 %v4136_v27 }
 0xecb   : > { %5509 = vmatprep.mubr.bf16.mxu1 %v4137_v51 }
 0xee4   : > { %v4098_v42 = vpop.xlane.xlu0 %4097 }
 0xee5   : > { %5992 = vrcp.f32 %v4098_v42 }
 0xee8   : > { %v2886_v45 = vpop.permute.xlu0 %2885 }
 0xee9   : > { %2910 = vst.msk [vmem:[#allocation2] sm:$0xff] %vm2909_vm2, %v2886_v45 }
 0xeea   : > { %3642 = vst.msk [vmem:[#allocation2] sm:$0xff] %vm3641_vm12, %v3618_v36 }
 0xeec   : > { %v3620_v56 = vpop.permute.xlu0 %3619 }
 0xeed   : > { %3643 = vst.msk [vmem:[#allocation2 + $0x8] sm:$0xff] %vm3641_vm12, %v3620_v56 }
 0xeef   : > { %v5993_v44 = vpop.eup %5992 }
 0xef0   : > { %v2892_v63 = vpop.permute.xlu0 %2891  ;;  %v4130_v5 = vmul.f32 %v5993_v44, %v8927_v60  ;;  %v5702_v60 = vld [vmem:[#allocation9 + $0x20] sm:$0xff]  }
 0xef1   : > { %2913 = vst.msk [vmem:[#allocation2 + $0x18] sm:$0xff] %vm2909_vm2, %v2892_v63  ;;  %5521 = vmatprep.subr.bf16.mxu1 %v5702_v60 }
 0xef2   : > { %v4138_v59 = vpack.c.bf16 %v4130_v5, %v4129_v26  ;;  %5522 = vmatpush3.bf16.msra.mxu1 %v5702_v60 }
 0xef3   : > { %5523 = vmatprep.subr.bf16.mxu1 %v5703_v39 }
 0xef4   : > { %v3624_v12 = vpop.permute.xlu0 %3623  ;;  %5227 = vst [vmem:[%s7508_s25 + $0xf8] sm:$0xff] %v4138_v59   ;;  %5510 = vmatmul.mubr.bf16.gmra.mrb[112].mxu1 %v4138_v59  ;;  %s6132_s25 = scalar_lea.vmem %s6131_s21, 8192 }
 0xef5   : > { %3645 = vst.msk [vmem:[#allocation2 + $0x18] sm:$0xff] %vm3641_vm12, %v3624_v12  ;;  %p6134_p1 = scmp.lt.s32.totalorder %s6132_s25, %s6126_s28 }
 0xef6   : > { %5524 = vmatpush3.bf16.msra.mxu1 %v5703_v39 }
 0xef7   : > { %5525 = vmatprep.subr.bf16.mxu1 %v5704_v4  ;;  %p6135_p2 = por %p6134_p1, %p6133_p12 }
 0xef8   : > { %v2896_v62 = vpop.permute.xlu0 %2895 }
 0xef9   : > { %2915 = vst.msk [vmem:[#allocation2 + $0x28] sm:$0xff] %vm2909_vm2, %v2896_v62  ;;  %p6136_p4 = pnand %p6135_p2, %p6129_p7 }
 0xefa   : > { %5526 = vmatpush3.bf16.msra.mxu1 %v5704_v4 }
 0xefb   : > { %5527 = vmatprep.subr.bf16.mxu1 %v5705_v55 }
 0xefe   : > { %5528 = vmatpush3.bf16.msra.mxu1 %v5705_v55 }
 0xf8d   : > { %v5499_v38 = vpop.f32.mrb[100].mxu1 }
 0xf8e   : > { %v4270_v15 = vpop.f32.mrb[101].mxu1 }
 0xf8f   : > { %v5500_v7 = vpop.f32.mrb[102].mxu1 }
 0xf90   : > { %v4334_v13 = vpack.c.bf16 %v5500_v7, %v5499_v38  ;;  %v4273_v35 = vpop.f32.mrb[103].mxu1 }
 0xf91   : > { %v4333_v31 = vpack.c.bf16 %v4273_v35, %v4270_v15 }
 0xf92   : > { %4351 = vrot.lane.b32.xlu0 %v4334_v13, %s9427_s0 }
 0xf93   : > { %4349 = vrot.lane.b32.xlu1 %v4333_v31, %s9427_s0 }
 0xf95   : > { %v5503_v43 = vpop.f32.mrb[104].mxu1 }
 0xf96   : > { %3627 = vrot.lane.b32.xlu0 %v9604_v46, %s9492_s9  ;;  %v4286_v28 = vpop.f32.mrb[105].mxu1 }
 0xf97   : > { %3625 = vrot.lane.b32.xlu1 %v9605_v9, %s9492_s9  ;;  %v5504_v20 = vpop.f32.mrb[106].mxu1 }
 0xf98   : > { %v4336_v8 = vpack.c.bf16 %v5504_v20, %v5503_v43  ;;  %v4289_v10 = vpop.f32.mrb[107].mxu1 }
 0xf99   : > { %v4335_v18 = vpack.c.bf16 %v4289_v10, %v4286_v28 }
 0xf9a   : > { %4355 = vrot.lane.b32.xlu0 %v4336_v8, %s9427_s0 }
 0xf9b   : > { %4353 = vrot.lane.b32.xlu1 %v4335_v18, %s9427_s0 }
 0xf9d   : > { %v5507_v52 = vpop.f32.mrb[108].mxu1 }
 0xf9e   : > { %2899 = vrot.lane.b32.xlu0 %v9608_v48, %s6263_s15  ;;  %v4302_v40 = vpop.f32.mrb[109].mxu1 }
 0xf9f   : > { %2897 = vrot.lane.b32.xlu1 %v9611_v6, %s6263_s15  ;;  %v5508_v16 = vpop.f32.mrb[110].mxu1 }
 0xfa0   : > { %v4338_v49 = vpack.c.bf16 %v5508_v16, %v5507_v52  ;;  %v4305_v19 = vpop.f32.mrb[111].mxu1 }
 0xfa1   : > { %v4337_v57 = vpack.c.bf16 %v4305_v19, %v4302_v40 }
 0xfa2   : > { %4359 = vrot.lane.b32.xlu0 %v4338_v49, %s9427_s0 }
 0xfa3   : > { %4357 = vrot.lane.b32.xlu1 %v4337_v57, %s9427_s0 }
 0xfa6   : > { %3631 = vrot.lane.b32.xlu0 %v9613_v14, %s9492_s9 }
 0xfa7   : > { %3629 = vrot.lane.b32.xlu1 %v9616_v3, %s9492_s9 }
 0xfc7   : > { %v5511_v1 = vpop.f32.mrb[112].mxu1 }
 0xfc8   : > { %v4318_v37 = vpop.f32.mrb[113].mxu1 }
 0xfc9   : > { %v5512_v27 = vpop.f32.mrb[114].mxu1 }
 0xfca   : > { %v4340_v33 = vpack.c.bf16 %v5512_v27, %v5511_v1  ;;  %v4321_v0 = vpop.f32.mrb[115].mxu1 }
 0xfcb   : > { %v4339_v30 = vpack.c.bf16 %v4321_v0, %v4318_v37 }
 0xfcc   : > { %4363 = vrot.lane.b32.xlu0 %v4340_v33, %s9427_s0 }
 0xfcd   : > { %4361 = vrot.lane.b32.xlu1 %v4339_v30, %s9427_s0  ;;  %s5036_s0 = sshll.u32 %s6365_s17, 12 }
 0xfce   : > { %s9035_s29 = scalar_lea.hbm %s9617_s8, %s5036_s0 }
0x1004   : > { %v4352_v47 = vpop.permute.xlu0 %4351 }
0x1005   : > { %4375 = vst.msk [vmem:[#allocation2 + $0x8] sm:$0xff] %vm4373_vm13, %v4352_v47  ;;  %v4350_v2 = vpop.permute.xlu1 %4349 }
0x1006   : > { %4374 = vst.msk [vmem:[#allocation2] sm:$0xff] %vm4373_vm13, %v4350_v2 }
0x1008   : > { %v3628_v25 = vpop.permute.xlu0 %3627 }
0x1009   : > { %3647 = vst.msk [vmem:[#allocation2 + $0x28] sm:$0xff] %vm3641_vm12, %v3628_v25  ;;  %v3626_v36 = vpop.permute.xlu1 %3625 }
0x100a   : > { %3646 = vst.msk [vmem:[#allocation2 + $0x20] sm:$0xff] %vm3641_vm12, %v3626_v36 }
0x100c   : > { %v4356_v51 = vpop.permute.xlu0 %4355  ;;  %v4383_v58 = vld [vmem:[#allocation2 + $0x8] sm:$0xff] }
0x100d   : > { %4377 = vst.msk [vmem:[#allocation2 + $0x18] sm:$0xff] %vm4373_vm13, %v4356_v51  ;;  %v4354_v53 = vpop.permute.xlu1 %4353  ;;  %v4382_v34 = vld [vmem:[#allocation2] sm:$0xff] }
0x100e   : > { %4376 = vst.msk [vmem:[#allocation2 + $0x10] sm:$0xff] %vm4373_vm13, %v4354_v53  ;;  %5529 = vmatprep.mubr.bf16.mxu1 %v4382_v34 }
0x100f   : > { %5530 = vmatmul.mubr.bf16.vlgmr.msra.gmra.mrb[116].mxu1 %v4383_v58 }
0x1010   : > { %v2900_v42 = vpop.permute.xlu0 %2899 }
0x1011   : > { %2917 = vst.msk [vmem:[#allocation2 + $0x38] sm:$0xff] %vm2909_vm2, %v2900_v42  ;;  %v2898_v45 = vpop.permute.xlu1 %2897 }
0x1012   : > { %2916 = vst.msk [vmem:[#allocation2 + $0x30] sm:$0xff] %vm2909_vm2, %v2898_v45 }
0x1014   : > { %v4360_v56 = vpop.permute.xlu0 %4359  ;;  %v4385_v63 = vld [vmem:[#allocation2 + $0x18] sm:$0xff] }
0x1015   : > { %4379 = vst.msk [vmem:[#allocation2 + $0x28] sm:$0xff] %vm4373_vm13, %v4360_v56  ;;  %v4358_v17 = vpop.permute.xlu1 %4357  ;;  %v4384_v44 = vld [vmem:[#allocation2 + $0x10] sm:$0xff] }
0x1016   : > { %4378 = vst.msk [vmem:[#allocation2 + $0x20] sm:$0xff] %vm4373_vm13, %v4358_v17  ;;  %5533 = vmatprep.mubr.bf16.mxu1 %v4384_v44 }
0x1017   : > { %5534 = vmatmul.mubr.bf16.gmra.mrb[120].mxu1 %v4385_v63 }
0x1018   : > { %v3632_v26 = vpop.permute.xlu0 %3631 }
0x1019   : > { %3649 = vst.msk [vmem:[#allocation2 + $0x38] sm:$0xff] %vm3641_vm12, %v3632_v26  ;;  %v3630_v5 = vpop.permute.xlu1 %3629 }
0x101a   : > { %3648 = vst.msk [vmem:[#allocation2 + $0x30] sm:$0xff] %vm3641_vm12, %v3630_v5 }
0x101c   : > { %v4387_v12 = vld [vmem:[#allocation2 + $0x28] sm:$0xff] }
0x101d   : > { %v4386_v59 = vld [vmem:[#allocation2 + $0x20] sm:$0xff] }
0x101e   : > { %5537 = vmatprep.mubr.bf16.mxu1 %v4386_v59 }
0x101f   : > { %5538 = vmatmul.mubr.bf16.gmra.mrb[124].mxu1 %v4387_v12 }
0x103e   : > { %v4364_v62 = vpop.permute.xlu0 %4363 }
0x103f   : > { %4381 = vst.msk [vmem:[#allocation2 + $0x38] sm:$0xff] %vm4373_vm13, %v4364_v62  ;;  %v4362_v21 = vpop.permute.xlu1 %4361 }
0x1040   : > { %4380 = vst.msk [vmem:[#allocation2 + $0x30] sm:$0xff] %vm4373_vm13, %v4362_v21 }
0x1046   : > { %v4389_v24 = vld [vmem:[#allocation2 + $0x38] sm:$0xff] }
0x1047   : > { %v4388_v61 = vld [vmem:[#allocation2 + $0x30] sm:$0xff] }
0x1048   : > { %5541 = vmatprep.mubr.bf16.mxu1 %v4388_v61 }
0x1049   : > { %5542 = vmatmul.mubr.bf16.gmra.mrb[128].mxu1 %v4389_v24 }
0x104a   : > { %6139 = shalt.err (!%p6136_p4)
}
0x104b   : > { %s6140_s13 = scalar_lea.hbm %s9035_s29, 4096  ;;  %s6144_s6 = scalar_lea.hbm %s9617_s8, 8192 }
0x104c   : > { %p6141_p9 = scmp.ne.s32.totalorder %s9035_s29, %s6140_s13  ;;  %p6145_p8 = scmp.lt.u32.totalorder %s9035_s29, %s9617_s8 }
0x104d   : > { %p6146_p13 = scmp.lt.u32.totalorder %s6144_s6, %s6140_s13  ;;  %p6148_p10 = scmp.lt.u32.totalorder %s6140_s13, %s9035_s29 }
0x104e   : > { %p6142_p0 = pnand %p6141_p9, %p6498_p5 }
0x104f   : > { %p6147_p6 = por %p6146_p13, %p6145_p8 }
0x1050   : > { %p6143_p11 = pneg %p6142_p0 }
0x1051   : > { %p6149_p3 = por %p6148_p10, %p6147_p6 }
0x1053   : > { %p6150_p7 = pnand %p6149_p3, %p6143_p11 }
0x1055   : > { %6153 = shalt.err (!%p6150_p7)
}
0x1056   : > { %s6265_s4 = smov 4   ;;  %s9618_s10 = sld [smem:[#allocation81_spill]]  ;;  %v5996_v15 = vld [vmem:[%s6552_s18 + $0x10] sm:$0xff]  ;;  %v5997_v31 = vld [vmem:[%s6552_s18] sm:$0xff]  ;;  %v5998_v28 = vld [vmem:[%s6552_s18 + $0x18] sm:$0xff] }
0x1057   : > { %5560 = dma.vmem_to_hbm [thread:$0]  (%p6498_p5), %s9037_s27, 4096, %s9035_s29, %s4596_s19, %s9492_s9, %s9492_s9, %s6265_s4  }
0x1058   : > { %s9619_s9 = sshll.u32 %s6546_s22, 7  ;;  %v5999_v20 = vld [vmem:[%s6552_s18 + $0x8] sm:$0xff]  ;;  %v6000_v48 = vld [vmem:[%s6552_s18 + $0x30] sm:$0xff]  ;;  %v6001_v6 = vld [vmem:[%s6552_s18 + $0x20] sm:$0xff]  ;;  %s5035_s11 = sshll.u32 %s6365_s17, 11 }
0x1059   : > { %s9078_s12 = scalar_lea.vmem [#allocation11], %s9619_s9  ;;  %v6002_v19 = vld [vmem:[%s6552_s18 + $0x38] sm:$0xff]  ;;  %v6003_v23 = vld [vmem:[%s6552_s18 + $0x28] sm:$0xff]  ;;  %v6004_v27 = vld [vmem:[%s6552_s18 + $0x50] sm:$0xff]  ;;  %s9620_s17 = sld [smem:[#allocation82_spill]] }
0x105a   : > { %v6005_v47 = vld [vmem:[%s6552_s18 + $0x40] sm:$0xff]  ;;  %v6006_v36 = vld [vmem:[%s6552_s18 + $0x58] sm:$0xff]  ;;  %v6007_v53 = vld [vmem:[%s6552_s18 + $0x48] sm:$0xff]  ;;  %s4609_s0 = sshll.u32 %s9078_s12, 4  ;;  %s4591_s29 = scalar_lea.sflag [#allocation5], %s6546_s22  ;;  %s9125_s0 = int_to_ptr.vmem [resolvable:$true] %s4609_s0 }
0x105b   : > { %v6008_v44 = vld [vmem:[%s6552_s18 + $0x70] sm:$0xff]  ;;  %v6009_v59 = vld [vmem:[%s6552_s18 + $0x60] sm:$0xff]  ;;  %v6010_v21 = vld [vmem:[%s6552_s18 + $0x78] sm:$0xff]  ;;  %s6154_s19 = scalar_lea.vmem %s9125_s0, 2048  ;;  %s6266_s28 = smov [#allocation11]  }
0x105c   : > { %v9068_v54 = vld [vmem:[%s9618_s10] ss:$0 sm:$0xff]  ;;  %v6011_v24 = vld [vmem:[%s6552_s18 + $0x68] sm:$0xff]  ;;  %p6155_p12 = scmp.ne.s32.totalorder %s9125_s0, %s6154_s19  ;;  %s6158_s23 = sshll.u32 %s6266_s28, 4  ;;  %s6159_s23 = int_to_ptr.vmem [resolvable:$false] %s6158_s23 }
0x105d   : > { %s6160_s21 = scalar_lea.vmem %s6159_s23, 4096  ;;  %p6161_p4 = scmp.lt.s32.totalorder %s9125_s0, %s6159_s23 }
0x105e   : > { %p6156_p1 = pnand %p6155_p12, %p6498_p5  ;;  %p6162_p9 = scmp.lt.s32.totalorder %s6160_s21, %s6154_s19 }
0x105f   : > { %s9123_s5 = scalar_lea.hbm %s9620_s17, %s5035_s11 }
0x1060   : > { %p6157_p2 = pneg %p6156_p1  ;;  %p6163_p0 = por %p6162_p9, %p6161_p4 }
0x1062   : > { %p6164_p11 = pnand %p6163_p0, %p6157_p2 }
0x10e2   : > { %v5531_v60 = vpop.f32.mrb[116].mxu1 }
0x10e3   : > { %v4504_v39 = vadd.f32 %v5531_v60, %v9068_v54  ;;  %v4495_v4 = vpop.f32.mrb[117].mxu1 }
0x10e4   : > { %v4496_v55 = vadd.f32 %v9068_v54, %v4495_v4  ;;  %v5532_v38 = vpop.f32.mrb[118].mxu1 }
0x10e5   : > { %v4560_v7 = vadd.f32 %v5996_v15, %v4504_v39  ;;  %v4507_v13 = vadd.f32 %v5532_v38, %v9068_v54  ;;  %v4498_v35 = vpop.f32.mrb[119].mxu1 }
0x10e6   : > { %v4558_v43 = vadd.f32 %v5997_v31, %v4496_v55  ;;  %v4499_v46 = vadd.f32 %v9068_v54, %v4498_v35 }
0x10e7   : > { %4576 = vst [vmem:[%s9078_s12 + $0x10] sm:$0xff] %v4560_v7  ;;  %v4561_v9 = vadd.f32 %v5998_v28, %v4507_v13 }
0x10e8   : > { %4574 = vst [vmem:[%s9078_s12] sm:$0xff] %v4558_v43  ;;  %v4559_v8 = vadd.f32 %v5999_v20, %v4499_v46 }
0x10e9   : > { %4577 = vst [vmem:[%s9078_s12 + $0x18] sm:$0xff] %v4561_v9 }
0x10ea   : > { %4575 = vst [vmem:[%s9078_s12 + $0x8] sm:$0xff] %v4559_v8  ;;  %v5535_v10 = vpop.f32.mrb[120].mxu1 }
0x10eb   : > { %v4520_v18 = vadd.f32 %v5535_v10, %v9068_v54  ;;  %v4511_v52 = vpop.f32.mrb[121].mxu1 }
0x10ec   : > { %v4512_v22 = vadd.f32 %v9068_v54, %v4511_v52  ;;  %v5536_v50 = vpop.f32.mrb[122].mxu1 }
0x10ed   : > { %v4564_v40 = vadd.f32 %v6000_v48, %v4520_v18  ;;  %v4523_v29 = vadd.f32 %v5536_v50, %v9068_v54  ;;  %v4514_v41 = vpop.f32.mrb[123].mxu1 }
0x10ee   : > { %v4562_v16 = vadd.f32 %v6001_v6, %v4512_v22  ;;  %v4515_v49 = vadd.f32 %v9068_v54, %v4514_v41 }
0x10ef   : > { %4580 = vst [vmem:[%s9078_s12 + $0x30] sm:$0xff] %v4564_v40  ;;  %v4565_v57 = vadd.f32 %v6002_v19, %v4523_v29 }
0x10f0   : > { %4578 = vst [vmem:[%s9078_s12 + $0x20] sm:$0xff] %v4562_v16  ;;  %v4563_v14 = vadd.f32 %v6003_v23, %v4515_v49 }
0x10f1   : > { %4581 = vst [vmem:[%s9078_s12 + $0x38] sm:$0xff] %v4565_v57 }
0x10f2   : > { %4579 = vst [vmem:[%s9078_s12 + $0x28] sm:$0xff] %v4563_v14  ;;  %v5539_v32 = vpop.f32.mrb[124].mxu1 }
0x10f3   : > { %v4536_v11 = vadd.f32 %v5539_v32, %v9068_v54  ;;  %v4527_v3 = vpop.f32.mrb[125].mxu1 }
0x10f4   : > { %v4528_v1 = vadd.f32 %v9068_v54, %v4527_v3  ;;  %v5540_v37 = vpop.f32.mrb[126].mxu1 }
0x10f5   : > { %v4568_v33 = vadd.f32 %v6004_v27, %v4536_v11  ;;  %v4539_v0 = vadd.f32 %v5540_v37, %v9068_v54  ;;  %v4530_v30 = vpop.f32.mrb[127].mxu1 }
0x10f6   : > { %v4566_v2 = vadd.f32 %v6005_v47, %v4528_v1  ;;  %v4531_v25 = vadd.f32 %v9068_v54, %v4530_v30 }
0x10f7   : > { %4584 = vst [vmem:[%s9078_s12 + $0x50] sm:$0xff] %v4568_v33  ;;  %v4569_v51 = vadd.f32 %v6006_v36, %v4539_v0 }
0x10f8   : > { %4582 = vst [vmem:[%s9078_s12 + $0x40] sm:$0xff] %v4566_v2  ;;  %v4567_v34 = vadd.f32 %v6007_v53, %v4531_v25 }
0x10f9   : > { %4585 = vst [vmem:[%s9078_s12 + $0x58] sm:$0xff] %v4569_v51 }
0x10fa   : > { %4583 = vst [vmem:[%s9078_s12 + $0x48] sm:$0xff] %v4567_v34 }
0x111c   : > { %v5543_v58 = vpop.f32.mrb[128].mxu1 }
0x111d   : > { %v4552_v42 = vadd.f32 %v5543_v58, %v9068_v54  ;;  %v4543_v45 = vpop.f32.mrb[129].mxu1 }
0x111e   : > { %v4544_v56 = vadd.f32 %v9068_v54, %v4543_v45  ;;  %v5544_v17 = vpop.f32.mrb[130].mxu1 }
0x111f   : > { %v4572_v63 = vadd.f32 %v6008_v44, %v4552_v42  ;;  %v4555_v26 = vadd.f32 %v5544_v17, %v9068_v54  ;;  %v4546_v5 = vpop.f32.mrb[131].mxu1 }
0x1120   : > { %v4570_v12 = vadd.f32 %v6009_v59, %v4544_v56  ;;  %v4547_v62 = vadd.f32 %v9068_v54, %v4546_v5 }
0x1121   : > { %4588 = vst [vmem:[%s9078_s12 + $0x70] sm:$0xff] %v4572_v63  ;;  %v4573_v61 = vadd.f32 %v6010_v21, %v4555_v26 }
0x1122   : > { %4586 = vst [vmem:[%s9078_s12 + $0x60] sm:$0xff] %v4570_v12  ;;  %v4571_v60 = vadd.f32 %v6011_v24, %v4547_v62 }
0x1123   : > { %4589 = vst [vmem:[%s9078_s12 + $0x78] sm:$0xff] %v4573_v61 }
0x1124   : > { %4587 = vst [vmem:[%s9078_s12 + $0x68] sm:$0xff] %v4571_v60 }
0x1125   : > { %6167 = shalt.err (!%p6164_p11)
}
0x1126   : > { %s6168_s18 = scalar_lea.hbm %s9123_s5, 2048  ;;  %s6172_s26 = scalar_lea.hbm %s9620_s17, 4096 }
0x1127   : > { %p6169_p8 = scmp.ne.s32.totalorder %s9123_s5, %s6168_s18  ;;  %p6173_p10 = scmp.lt.u32.totalorder %s9123_s5, %s9620_s17 }
0x1128   : > { %p6174_p3 = scmp.lt.u32.totalorder %s6172_s26, %s6168_s18  ;;  %p6176_p12 = scmp.lt.u32.totalorder %s6168_s18, %s9123_s5 }
0x1129   : > { %p6170_p13 = pnand %p6169_p8, %p6498_p5 }
0x112a   : > { %p6175_p7 = por %p6174_p3, %p6173_p10 }
0x112b   : > { %p6171_p6 = pneg %p6170_p13 }
0x112c   : > { %p6177_p1 = por %p6176_p12, %p6175_p7 }
0x112e   : > { %p6178_p2 = pnand %p6177_p1, %p6171_p6 }
0x1130   : > { %6181 = shalt.err (!%p6178_p2)
}
0x1131   : > { %s6267_s1 = smov 128   ;;  %s6268_s2 = smov 8  }
0x1132   : > { %5559 = dma.vmem_to_hbm [thread:$0]  (%p6498_p5), %s9125_s0, 2048, %s9123_s5, %s4591_s29, %s6267_s1, %s6267_s1, %s6268_s2  }
0x1133 PF: > { %s9621_s4 = sld [smem:[#allocation19_spill]]  ;;  %s9622_s30 = sld [smem:[#allocation22_spill]] }
0x1134   : > { %p9624_p9 = scmp.ge.s32.totalorder %s6232_s16, 2 }
0x1139   : > { %s4640_s15 = sand.u32 1, %s9621_s4   ;;  %p9623_p4 = scmp.ne.s32.totalorder %s9622_s30, 0 }
0x113a   : > { %s4641_s10 = scalar_lea.sflag [#allocation5], %s4640_s15 }
0x113b   : > { %p5578_p0 = pnand %p9624_p9, %p9623_p4 }
0x113d   : > { %6211 = dma.done.wait (!%p5578_p0), %s4641_s10, 2048  }
0x113e   : > { %6213 = vsyncadd (!%p5578_p0), %s4641_s10, 4294965248  ;;  %s4650_s9 = scalar_lea.sflag [#allocation13], %s4640_s15 }
0x113f   : > { %6215 = dma.done.wait (!%p5578_p0), %s4650_s9, 4096  }
0x1140   : > { %6217 = vsyncadd (!%p5578_p0), %s4650_s9, 4294963200  ;;  %s9625_s16 = sld [smem:[#allocation23_spill]]  ;;  %s9626_s29 = sld [smem:[#allocation20_spill]] }
0x1141   : > { %s9627_s30 = sld [smem:[#allocation21_spill]]  ;;  %s9628_s15 = sld [smem:[#allocation24_spill]] }
0x1146   : > { %p33_p5 = scmp.ge.s32.totalorder %s9625_s16, 4  }
0x1148   :  { %35 = sbr.rel (!%p33_p5) target bundleno = 24 (0x18), region = 149 }
0x114f   :  { %4655 = vsyncpa [#allocation4], 1 }
0x1150   :  { %4657 = vsyncpa [#allocation4 + $0x1], 1 }
0x1151   :  { %4658 = vsyncpa [#allocation7], 1 }
0x1152   :  { %4659 = vsyncpa [#allocation10], 1 }
0x1153   :  { %4660 = vsyncpa [#allocation5], 1 }
0x1154   :  { %4662 = vsyncpa [#allocation5 + $0x1], 1 }
0x1155   :  { %4663 = vsyncpa [#allocation13], 1 }
0x1156   :  { %4665 = vsyncpa [#allocation13 + $0x1], 1 }

</bundles_post_ra>
